<compile_context>
chip_gen: v5e
topology: v5e:2x2
jax: 0.10.0
libtpu: 0.0.40
codegen_flags: <defaults>
</compile_context>

<pallas_src>
import functools

import jax
import jax.numpy as jnp
from jax import lax
from jax.experimental import pallas as pl
from jax.experimental.pallas import tpu as pltpu

INPUT_SIZE = 310
HIDDEN_SIZE = 256
NUM_CLASSES = 3
OUT_PAD = 128      # lane-dense padded output width
SUBLANE = 8        # batch padded to a multiple of this


def _lstm_kernel(gx_ref, whh_ref, wout_ref, bout_ref, out_ref):
    # gx_ref:  (T, B_pad, 4H) f32  precomputed x@W_ih + (b_ih+b_hh), time-major
    # whh_ref: (H, 4H)        bf16
    # wout_ref:(H, OUT_PAD)   f32  (zero-padded beyond the 3 real classes)
    # bout_ref:(1, OUT_PAD)   f32
    # out_ref: (B_pad, OUT_PAD) f32
    T = gx_ref.shape[0]
    B = gx_ref.shape[1]
    H = whh_ref.shape[0]

    # Hoist the recurrent weight into vregs once (reused every unrolled step).
    whh = whh_ref[...]

    def step(t, carry):
        h, c = carry
        # Serial critical path: one small bf16 MXU matmul + elementwise gates.
        gates = gx_ref[t] + jnp.dot(
            h.astype(jnp.bfloat16), whh,
            preferred_element_type=jnp.float32)            # (B, 4H) f32
        i_g = jax.nn.sigmoid(gates[:, 0 * H:1 * H])
        f_g = jax.nn.sigmoid(gates[:, 1 * H:2 * H])
        g_g = jnp.tanh(gates[:, 2 * H:3 * H])
        o_g = jax.nn.sigmoid(gates[:, 3 * H:4 * H])
        c_new = f_g * c + i_g * g_g
        h_new = o_g * jnp.tanh(c_new)
        return h_new, c_new

    h0 = jnp.zeros((B, H), jnp.float32)
    c0 = jnp.zeros((B, H), jnp.float32)
    h_last, _ = lax.fori_loop(0, T, step, (h0, c0), unroll=True)

    # ReLU(h_T) @ W_out + b_out  (lane-dense, sublane-full padded store)
    feat = jnp.maximum(h_last, 0.0)
    out_ref[...] = (
        jnp.dot(feat, wout_ref[...], preferred_element_type=jnp.float32)
        + bout_ref[...]
    ).astype(out_ref.dtype)


@jax.jit
def lstm_forward(x_btd, w_ih, w_hh, b_ih, b_hh, w_out, b_out):
    """x_btd: (B, T, D_in) float32 (PyTorch batch_first convention)."""
    B, T, D = x_btd.shape
    H = w_hh.shape[1]  # w_hh: (4H, H)
    B_pad = ((B + SUBLANE - 1) // SUBLANE) * SUBLANE

    # Hoisted input projection (one batched matmul, done by XLA outside the
    # serial recurrence). Bias folded in. Result is time-major (T, B_pad, 4H).
    x_f32 = x_btd.astype(jnp.float32)
    bias = (b_ih + b_hh).astype(jnp.float32)                       # (4H,)
    gates_x = jnp.einsum("btd,gd->btg", x_f32,
                         w_ih.astype(jnp.float32)) + bias          # (B, T, 4H)
    gates_x = jnp.transpose(gates_x, (1, 0, 2))                    # (T, B, 4H)
    if B_pad != B:
        gates_x = jnp.pad(gates_x, ((0, 0), (0, B_pad - B), (0, 0)))

    # Recurrent weight: bf16 operands, f32 accumulation inside the kernel.
    whh_t = jnp.transpose(w_hh).astype(jnp.bfloat16)               # (H, 4H)

    # Output head, zero-padded to a lane-dense 128-wide slab.
    wout_pad = jnp.zeros((H, OUT_PAD), jnp.float32)
    wout_pad = wout_pad.at[:, :NUM_CLASSES].set(
        jnp.transpose(w_out).astype(jnp.float32))                  # (H, 128)
    bout_pad = jnp.zeros((1, OUT_PAD), jnp.float32)
    bout_pad = bout_pad.at[:, :NUM_CLASSES].set(
        b_out.astype(jnp.float32))                                 # (1, 128)

    vmem = pl.BlockSpec(memory_space=pltpu.MemorySpace.VMEM)
    out_padded = pl.pallas_call(
        _lstm_kernel,
        out_shape=jax.ShapeDtypeStruct((B_pad, OUT_PAD), jnp.float32),
        in_specs=[vmem] * 4,
        out_specs=vmem,
    )(gates_x, whh_t, wout_pad, bout_pad)

    return out_padded[:B, :NUM_CLASSES]


def _reference_forward(x_btd, w_ih, w_hh, b_ih, b_hh, w_out, b_out):
    """Pure-JAX reference matching PyTorch nn.LSTM + ReLU + Linear semantics."""
    B, T, D = x_btd.shape
    H = w_hh.shape[1]
    h = jnp.zeros((B, H), jnp.float32)
    c = jnp.zeros((B, H), jnp.float32)
    for t in range(T):
        gates = x_btd[:, t, :] @ w_ih.T + b_ih + h @ w_hh.T + b_hh
        i = jax.nn.sigmoid(gates[:, 0 * H:1 * H])
        f = jax.nn.sigmoid(gates[:, 1 * H:2 * H])
        g = jnp.tanh(gates[:, 2 * H:3 * H])
        o = jax.nn.sigmoid(gates[:, 3 * H:4 * H])
        c = f * c + i * g
        h = o * jnp.tanh(c)
    feat = jnp.maximum(h, 0.0)
    return feat @ w_out.T + b_out


if __name__ == "__main__":
    key = jax.random.PRNGKey(0)
    B, T, D, H = 2, 8, INPUT_SIZE, HIDDEN_SIZE

    # Deterministic parameter init (PyTorch-style U(-1/sqrt(H), 1/sqrt(H))).
    k = 1.0 / jnp.sqrt(jnp.float32(H))
    keys = jax.random.split(key, 8)
    x = jax.random.normal(keys[0], (B, T, D), jnp.float32)
    w_ih = jax.random.uniform(keys[1], (4 * H, D), jnp.float32, -k, k)
    w_hh = jax.random.uniform(keys[2], (4 * H, H), jnp.float32, -k, k)
    b_ih = jax.random.uniform(keys[3], (4 * H,), jnp.float32, -k, k)
    b_hh = jax.random.uniform(keys[4], (4 * H,), jnp.float32, -k, k)
    w_out = jax.random.uniform(keys[5], (NUM_CLASSES, H), jnp.float32, -k, k)
    b_out = jax.random.uniform(keys[6], (NUM_CLASSES,), jnp.float32, -k, k)

    y = lstm_forward(x, w_ih, w_hh, b_ih, b_hh, w_out, b_out)
    jax.block_until_ready(y)

    y_ref = _reference_forward(x, w_ih, w_hh, b_ih, b_hh, w_out, b_out)
    assert y.shape == (B, NUM_CLASSES)
    assert jnp.allclose(y, y_ref, atol=2e-2, rtol=2e-2), (
        f"mismatch: max abs diff {jnp.max(jnp.abs(y - y_ref))}")

    print("KERNEL_OK")
</pallas_src>

<mosaic_0001>
module attributes {stable_mosaic.version = 11 : i64} {
  func.func @_lstm_kernel(%arg0: memref<8x8x1024xf32, #tpu.memory_space<vmem>>, %arg1: memref<256x1024xbf16, #tpu.memory_space<vmem>>, %arg2: memref<256x128xf32, #tpu.memory_space<vmem>>, %arg3: memref<1x128xf32, #tpu.memory_space<vmem>>, %arg4: memref<8x128xf32, #tpu.memory_space<vmem>>) attributes {dimension_semantics = [], scalar_prefetch = 0 : i64, scratch_operands = 0 : i64, tpu.core_type = #tpu.core_type<tc>} {
    %c0 = arith.constant 0 : index
    %c0_0 = arith.constant 0 : index
    %0 = vector.load %arg1[%c0, %c0_0] : memref<256x1024xbf16, #tpu.memory_space<vmem>>, vector<256x1024xbf16>
    %cst = arith.constant 0.000000e+00 : f32
    %1 = vector.broadcast %cst : f32 to vector<8x256xf32>
    %cst_1 = arith.constant 0.000000e+00 : f32
    %2 = vector.broadcast %cst_1 : f32 to vector<8x256xf32>
    %c0_i32 = arith.constant 0 : i32
    %3 = arith.index_cast %c0_i32 : i32 to index
    %c0_2 = arith.constant 0 : index
    %c0_3 = arith.constant 0 : index
    %4 = vector.load %arg0[%3, %c0_2, %c0_3] : memref<8x8x1024xf32, #tpu.memory_space<vmem>>, vector<1x8x1024xf32>
    %5 = vector.shape_cast %4 : vector<1x8x1024xf32> to vector<8x1024xf32>
    %6 = arith.truncf %1 : vector<8x256xf32> to vector<8x256xbf16>
    %cst_4 = arith.constant dense<0.000000e+00> : vector<8x1024xf32>
    %7 = tpu.matmul %6, %0, %cst_4 {dimension_numbers = #tpu.dot_dimension_numbers<[1], [0], [0], [1], [0, 0, 1, 1], [], []>} : vector<8x256xbf16>, vector<256x1024xbf16>, vector<8x1024xf32> -> vector<8x1024xf32>
    %8 = arith.addf %5, %7 : vector<8x1024xf32>
    %9 = vector.extract_strided_slice %8 {offsets = [0, 0], sizes = [8, 256], strides = [1, 1]} : vector<8x1024xf32> to vector<8x256xf32>
    %10 = arith.negf %9 : vector<8x256xf32>
    %11 = math.exp %10 : vector<8x256xf32>
    %cst_5 = arith.constant 1.000000e+00 : f32
    %12 = vector.broadcast %cst_5 : f32 to vector<8x256xf32>
    %13 = arith.addf %12, %11 : vector<8x256xf32>
    %14 = arith.divf %12, %13 : vector<8x256xf32>
    %15 = vector.extract_strided_slice %8 {offsets = [0, 256], sizes = [8, 256], strides = [1, 1]} : vector<8x1024xf32> to vector<8x256xf32>
    %16 = arith.negf %15 : vector<8x256xf32>
    %17 = math.exp %16 : vector<8x256xf32>
    %cst_6 = arith.constant 1.000000e+00 : f32
    %18 = vector.broadcast %cst_6 : f32 to vector<8x256xf32>
    %19 = arith.addf %18, %17 : vector<8x256xf32>
    %20 = arith.divf %18, %19 : vector<8x256xf32>
    %21 = vector.extract_strided_slice %8 {offsets = [0, 512], sizes = [8, 256], strides = [1, 1]} : vector<8x1024xf32> to vector<8x256xf32>
    %22 = math.tanh %21 : vector<8x256xf32>
    %23 = vector.extract_strided_slice %8 {offsets = [0, 768], sizes = [8, 256], strides = [1, 1]} : vector<8x1024xf32> to vector<8x256xf32>
    %24 = arith.negf %23 : vector<8x256xf32>
    %25 = math.exp %24 : vector<8x256xf32>
    %cst_7 = arith.constant 1.000000e+00 : f32
    %26 = vector.broadcast %cst_7 : f32 to vector<8x256xf32>
    %27 = arith.addf %26, %25 : vector<8x256xf32>
    %28 = arith.divf %26, %27 : vector<8x256xf32>
    %29 = arith.mulf %20, %2 : vector<8x256xf32>
    %30 = arith.mulf %14, %22 : vector<8x256xf32>
    %31 = arith.addf %29, %30 : vector<8x256xf32>
    %32 = math.tanh %31 : vector<8x256xf32>
    %33 = arith.mulf %28, %32 : vector<8x256xf32>
    %c1_i32 = arith.constant 1 : i32
    %34 = arith.index_cast %c1_i32 : i32 to index
    %c0_8 = arith.constant 0 : index
    %c0_9 = arith.constant 0 : index
    %35 = vector.load %arg0[%34, %c0_8, %c0_9] : memref<8x8x1024xf32, #tpu.memory_space<vmem>>, vector<1x8x1024xf32>
    %36 = vector.shape_cast %35 : vector<1x8x1024xf32> to vector<8x1024xf32>
    %37 = arith.truncf %33 : vector<8x256xf32> to vector<8x256xbf16>
    %cst_10 = arith.constant dense<0.000000e+00> : vector<8x1024xf32>
    %38 = tpu.matmul %37, %0, %cst_10 {dimension_numbers = #tpu.dot_dimension_numbers<[1], [0], [0], [1], [0, 0, 1, 1], [], []>} : vector<8x256xbf16>, vector<256x1024xbf16>, vector<8x1024xf32> -> vector<8x1024xf32>
    %39 = arith.addf %36, %38 : vector<8x1024xf32>
    %40 = vector.extract_strided_slice %39 {offsets = [0, 0], sizes = [8, 256], strides = [1, 1]} : vector<8x1024xf32> to vector<8x256xf32>
    %41 = arith.negf %40 : vector<8x256xf32>
    %42 = math.exp %41 : vector<8x256xf32>
    %cst_11 = arith.constant 1.000000e+00 : f32
    %43 = vector.broadcast %cst_11 : f32 to vector<8x256xf32>
    %44 = arith.addf %43, %42 : vector<8x256xf32>
    %45 = arith.divf %43, %44 : vector<8x256xf32>
    %46 = vector.extract_strided_slice %39 {offsets = [0, 256], sizes = [8, 256], strides = [1, 1]} : vector<8x1024xf32> to vector<8x256xf32>
    %47 = arith.negf %46 : vector<8x256xf32>
    %48 = math.exp %47 : vector<8x256xf32>
    %cst_12 = arith.constant 1.000000e+00 : f32
    %49 = vector.broadcast %cst_12 : f32 to vector<8x256xf32>
    %50 = arith.addf %49, %48 : vector<8x256xf32>
    %51 = arith.divf %49, %50 : vector<8x256xf32>
    %52 = vector.extract_strided_slice %39 {offsets = [0, 512], sizes = [8, 256], strides = [1, 1]} : vector<8x1024xf32> to vector<8x256xf32>
    %53 = math.tanh %52 : vector<8x256xf32>
    %54 = vector.extract_strided_slice %39 {offsets = [0, 768], sizes = [8, 256], strides = [1, 1]} : vector<8x1024xf32> to vector<8x256xf32>
    %55 = arith.negf %54 : vector<8x256xf32>
    %56 = math.exp %55 : vector<8x256xf32>
    %cst_13 = arith.constant 1.000000e+00 : f32
    %57 = vector.broadcast %cst_13 : f32 to vector<8x256xf32>
    %58 = arith.addf %57, %56 : vector<8x256xf32>
    %59 = arith.divf %57, %58 : vector<8x256xf32>
    %60 = arith.mulf %51, %31 : vector<8x256xf32>
    %61 = arith.mulf %45, %53 : vector<8x256xf32>
    %62 = arith.addf %60, %61 : vector<8x256xf32>
    %63 = math.tanh %62 : vector<8x256xf32>
    %64 = arith.mulf %59, %63 : vector<8x256xf32>
    %c2_i32 = arith.constant 2 : i32
    %65 = arith.index_cast %c2_i32 : i32 to index
    %c0_14 = arith.constant 0 : index
    %c0_15 = arith.constant 0 : index
    %66 = vector.load %arg0[%65, %c0_14, %c0_15] : memref<8x8x1024xf32, #tpu.memory_space<vmem>>, vector<1x8x1024xf32>
    %67 = vector.shape_cast %66 : vector<1x8x1024xf32> to vector<8x1024xf32>
    %68 = arith.truncf %64 : vector<8x256xf32> to vector<8x256xbf16>
    %cst_16 = arith.constant dense<0.000000e+00> : vector<8x1024xf32>
    %69 = tpu.matmul %68, %0, %cst_16 {dimension_numbers = #tpu.dot_dimension_numbers<[1], [0], [0], [1], [0, 0, 1, 1], [], []>} : vector<8x256xbf16>, vector<256x1024xbf16>, vector<8x1024xf32> -> vector<8x1024xf32>
    %70 = arith.addf %67, %69 : vector<8x1024xf32>
    %71 = vector.extract_strided_slice %70 {offsets = [0, 0], sizes = [8, 256], strides = [1, 1]} : vector<8x1024xf32> to vector<8x256xf32>
    %72 = arith.negf %71 : vector<8x256xf32>
    %73 = math.exp %72 : vector<8x256xf32>
    %cst_17 = arith.constant 1.000000e+00 : f32
    %74 = vector.broadcast %cst_17 : f32 to vector<8x256xf32>
    %75 = arith.addf %74, %73 : vector<8x256xf32>
    %76 = arith.divf %74, %75 : vector<8x256xf32>
    %77 = vector.extract_strided_slice %70 {offsets = [0, 256], sizes = [8, 256], strides = [1, 1]} : vector<8x1024xf32> to vector<8x256xf32>
    %78 = arith.negf %77 : vector<8x256xf32>
    %79 = math.exp %78 : vector<8x256xf32>
    %cst_18 = arith.constant 1.000000e+00 : f32
    %80 = vector.broadcast %cst_18 : f32 to vector<8x256xf32>
    %81 = arith.addf %80, %79 : vector<8x256xf32>
    %82 = arith.divf %80, %81 : vector<8x256xf32>
    %83 = vector.extract_strided_slice %70 {offsets = [0, 512], sizes = [8, 256], strides = [1, 1]} : vector<8x1024xf32> to vector<8x256xf32>
    %84 = math.tanh %83 : vector<8x256xf32>
    %85 = vector.extract_strided_slice %70 {offsets = [0, 768], sizes = [8, 256], strides = [1, 1]} : vector<8x1024xf32> to vector<8x256xf32>
    %86 = arith.negf %85 : vector<8x256xf32>
    %87 = math.exp %86 : vector<8x256xf32>
    %cst_19 = arith.constant 1.000000e+00 : f32
    %88 = vector.broadcast %cst_19 : f32 to vector<8x256xf32>
    %89 = arith.addf %88, %87 : vector<8x256xf32>
    %90 = arith.divf %88, %89 : vector<8x256xf32>
    %91 = arith.mulf %82, %62 : vector<8x256xf32>
    %92 = arith.mulf %76, %84 : vector<8x256xf32>
    %93 = arith.addf %91, %92 : vector<8x256xf32>
    %94 = math.tanh %93 : vector<8x256xf32>
    %95 = arith.mulf %90, %94 : vector<8x256xf32>
    %c3_i32 = arith.constant 3 : i32
    %96 = arith.index_cast %c3_i32 : i32 to index
    %c0_20 = arith.constant 0 : index
    %c0_21 = arith.constant 0 : index
    %97 = vector.load %arg0[%96, %c0_20, %c0_21] : memref<8x8x1024xf32, #tpu.memory_space<vmem>>, vector<1x8x1024xf32>
    %98 = vector.shape_cast %97 : vector<1x8x1024xf32> to vector<8x1024xf32>
    %99 = arith.truncf %95 : vector<8x256xf32> to vector<8x256xbf16>
    %cst_22 = arith.constant dense<0.000000e+00> : vector<8x1024xf32>
    %100 = tpu.matmul %99, %0, %cst_22 {dimension_numbers = #tpu.dot_dimension_numbers<[1], [0], [0], [1], [0, 0, 1, 1], [], []>} : vector<8x256xbf16>, vector<256x1024xbf16>, vector<8x1024xf32> -> vector<8x1024xf32>
    %101 = arith.addf %98, %100 : vector<8x1024xf32>
    %102 = vector.extract_strided_slice %101 {offsets = [0, 0], sizes = [8, 256], strides = [1, 1]} : vector<8x1024xf32> to vector<8x256xf32>
    %103 = arith.negf %102 : vector<8x256xf32>
    %104 = math.exp %103 : vector<8x256xf32>
    %cst_23 = arith.constant 1.000000e+00 : f32
    %105 = vector.broadcast %cst_23 : f32 to vector<8x256xf32>
    %106 = arith.addf %105, %104 : vector<8x256xf32>
    %107 = arith.divf %105, %106 : vector<8x256xf32>
    %108 = vector.extract_strided_slice %101 {offsets = [0, 256], sizes = [8, 256], strides = [1, 1]} : vector<8x1024xf32> to vector<8x256xf32>
    %109 = arith.negf %108 : vector<8x256xf32>
    %110 = math.exp %109 : vector<8x256xf32>
    %cst_24 = arith.constant 1.000000e+00 : f32
    %111 = vector.broadcast %cst_24 : f32 to vector<8x256xf32>
    %112 = arith.addf %111, %110 : vector<8x256xf32>
    %113 = arith.divf %111, %112 : vector<8x256xf32>
    %114 = vector.extract_strided_slice %101 {offsets = [0, 512], sizes = [8, 256], strides = [1, 1]} : vector<8x1024xf32> to vector<8x256xf32>
    %115 = math.tanh %114 : vector<8x256xf32>
    %116 = vector.extract_strided_slice %101 {offsets = [0, 768], sizes = [8, 256], strides = [1, 1]} : vector<8x1024xf32> to vector<8x256xf32>
    %117 = arith.negf %116 : vector<8x256xf32>
    %118 = math.exp %117 : vector<8x256xf32>
    %cst_25 = arith.constant 1.000000e+00 : f32
    %119 = vector.broadcast %cst_25 : f32 to vector<8x256xf32>
    %120 = arith.addf %119, %118 : vector<8x256xf32>
    %121 = arith.divf %119, %120 : vector<8x256xf32>
    %122 = arith.mulf %113, %93 : vector<8x256xf32>
    %123 = arith.mulf %107, %115 : vector<8x256xf32>
    %124 = arith.addf %122, %123 : vector<8x256xf32>
    %125 = math.tanh %124 : vector<8x256xf32>
    %126 = arith.mulf %121, %125 : vector<8x256xf32>
    %c4_i32 = arith.constant 4 : i32
    %127 = arith.index_cast %c4_i32 : i32 to index
    %c0_26 = arith.constant 0 : index
    %c0_27 = arith.constant 0 : index
    %128 = vector.load %arg0[%127, %c0_26, %c0_27] : memref<8x8x1024xf32, #tpu.memory_space<vmem>>, vector<1x8x1024xf32>
    %129 = vector.shape_cast %128 : vector<1x8x1024xf32> to vector<8x1024xf32>
    %130 = arith.truncf %126 : vector<8x256xf32> to vector<8x256xbf16>
    %cst_28 = arith.constant dense<0.000000e+00> : vector<8x1024xf32>
    %131 = tpu.matmul %130, %0, %cst_28 {dimension_numbers = #tpu.dot_dimension_numbers<[1], [0], [0], [1], [0, 0, 1, 1], [], []>} : vector<8x256xbf16>, vector<256x1024xbf16>, vector<8x1024xf32> -> vector<8x1024xf32>
    %132 = arith.addf %129, %131 : vector<8x1024xf32>
    %133 = vector.extract_strided_slice %132 {offsets = [0, 0], sizes = [8, 256], strides = [1, 1]} : vector<8x1024xf32> to vector<8x256xf32>
    %134 = arith.negf %133 : vector<8x256xf32>
    %135 = math.exp %134 : vector<8x256xf32>
    %cst_29 = arith.constant 1.000000e+00 : f32
    %136 = vector.broadcast %cst_29 : f32 to vector<8x256xf32>
    %137 = arith.addf %136, %135 : vector<8x256xf32>
    %138 = arith.divf %136, %137 : vector<8x256xf32>
    %139 = vector.extract_strided_slice %132 {offsets = [0, 256], sizes = [8, 256], strides = [1, 1]} : vector<8x1024xf32> to vector<8x256xf32>
    %140 = arith.negf %139 : vector<8x256xf32>
    %141 = math.exp %140 : vector<8x256xf32>
    %cst_30 = arith.constant 1.000000e+00 : f32
    %142 = vector.broadcast %cst_30 : f32 to vector<8x256xf32>
    %143 = arith.addf %142, %141 : vector<8x256xf32>
    %144 = arith.divf %142, %143 : vector<8x256xf32>
    %145 = vector.extract_strided_slice %132 {offsets = [0, 512], sizes = [8, 256], strides = [1, 1]} : vector<8x1024xf32> to vector<8x256xf32>
    %146 = math.tanh %145 : vector<8x256xf32>
    %147 = vector.extract_strided_slice %132 {offsets = [0, 768], sizes = [8, 256], strides = [1, 1]} : vector<8x1024xf32> to vector<8x256xf32>
    %148 = arith.negf %147 : vector<8x256xf32>
    %149 = math.exp %148 : vector<8x256xf32>
    %cst_31 = arith.constant 1.000000e+00 : f32
    %150 = vector.broadcast %cst_31 : f32 to vector<8x256xf32>
    %151 = arith.addf %150, %149 : vector<8x256xf32>
    %152 = arith.divf %150, %151 : vector<8x256xf32>
    %153 = arith.mulf %144, %124 : vector<8x256xf32>
    %154 = arith.mulf %138, %146 : vector<8x256xf32>
    %155 = arith.addf %153, %154 : vector<8x256xf32>
    %156 = math.tanh %155 : vector<8x256xf32>
    %157 = arith.mulf %152, %156 : vector<8x256xf32>
    %c5_i32 = arith.constant 5 : i32
    %158 = arith.index_cast %c5_i32 : i32 to index
    %c0_32 = arith.constant 0 : index
    %c0_33 = arith.constant 0 : index
    %159 = vector.load %arg0[%158, %c0_32, %c0_33] : memref<8x8x1024xf32, #tpu.memory_space<vmem>>, vector<1x8x1024xf32>
    %160 = vector.shape_cast %159 : vector<1x8x1024xf32> to vector<8x1024xf32>
    %161 = arith.truncf %157 : vector<8x256xf32> to vector<8x256xbf16>
    %cst_34 = arith.constant dense<0.000000e+00> : vector<8x1024xf32>
    %162 = tpu.matmul %161, %0, %cst_34 {dimension_numbers = #tpu.dot_dimension_numbers<[1], [0], [0], [1], [0, 0, 1, 1], [], []>} : vector<8x256xbf16>, vector<256x1024xbf16>, vector<8x1024xf32> -> vector<8x1024xf32>
    %163 = arith.addf %160, %162 : vector<8x1024xf32>
    %164 = vector.extract_strided_slice %163 {offsets = [0, 0], sizes = [8, 256], strides = [1, 1]} : vector<8x1024xf32> to vector<8x256xf32>
    %165 = arith.negf %164 : vector<8x256xf32>
    %166 = math.exp %165 : vector<8x256xf32>
    %cst_35 = arith.constant 1.000000e+00 : f32
    %167 = vector.broadcast %cst_35 : f32 to vector<8x256xf32>
    %168 = arith.addf %167, %166 : vector<8x256xf32>
    %169 = arith.divf %167, %168 : vector<8x256xf32>
    %170 = vector.extract_strided_slice %163 {offsets = [0, 256], sizes = [8, 256], strides = [1, 1]} : vector<8x1024xf32> to vector<8x256xf32>
    %171 = arith.negf %170 : vector<8x256xf32>
    %172 = math.exp %171 : vector<8x256xf32>
    %cst_36 = arith.constant 1.000000e+00 : f32
    %173 = vector.broadcast %cst_36 : f32 to vector<8x256xf32>
    %174 = arith.addf %173, %172 : vector<8x256xf32>
    %175 = arith.divf %173, %174 : vector<8x256xf32>
    %176 = vector.extract_strided_slice %163 {offsets = [0, 512], sizes = [8, 256], strides = [1, 1]} : vector<8x1024xf32> to vector<8x256xf32>
    %177 = math.tanh %176 : vector<8x256xf32>
    %178 = vector.extract_strided_slice %163 {offsets = [0, 768], sizes = [8, 256], strides = [1, 1]} : vector<8x1024xf32> to vector<8x256xf32>
    %179 = arith.negf %178 : vector<8x256xf32>
    %180 = math.exp %179 : vector<8x256xf32>
    %cst_37 = arith.constant 1.000000e+00 : f32
    %181 = vector.broadcast %cst_37 : f32 to vector<8x256xf32>
    %182 = arith.addf %181, %180 : vector<8x256xf32>
    %183 = arith.divf %181, %182 : vector<8x256xf32>
    %184 = arith.mulf %175, %155 : vector<8x256xf32>
    %185 = arith.mulf %169, %177 : vector<8x256xf32>
    %186 = arith.addf %184, %185 : vector<8x256xf32>
    %187 = math.tanh %186 : vector<8x256xf32>
    %188 = arith.mulf %183, %187 : vector<8x256xf32>
    %c6_i32 = arith.constant 6 : i32
    %189 = arith.index_cast %c6_i32 : i32 to index
    %c0_38 = arith.constant 0 : index
    %c0_39 = arith.constant 0 : index
    %190 = vector.load %arg0[%189, %c0_38, %c0_39] : memref<8x8x1024xf32, #tpu.memory_space<vmem>>, vector<1x8x1024xf32>
    %191 = vector.shape_cast %190 : vector<1x8x1024xf32> to vector<8x1024xf32>
    %192 = arith.truncf %188 : vector<8x256xf32> to vector<8x256xbf16>
    %cst_40 = arith.constant dense<0.000000e+00> : vector<8x1024xf32>
    %193 = tpu.matmul %192, %0, %cst_40 {dimension_numbers = #tpu.dot_dimension_numbers<[1], [0], [0], [1], [0, 0, 1, 1], [], []>} : vector<8x256xbf16>, vector<256x1024xbf16>, vector<8x1024xf32> -> vector<8x1024xf32>
    %194 = arith.addf %191, %193 : vector<8x1024xf32>
    %195 = vector.extract_strided_slice %194 {offsets = [0, 0], sizes = [8, 256], strides = [1, 1]} : vector<8x1024xf32> to vector<8x256xf32>
    %196 = arith.negf %195 : vector<8x256xf32>
    %197 = math.exp %196 : vector<8x256xf32>
    %cst_41 = arith.constant 1.000000e+00 : f32
    %198 = vector.broadcast %cst_41 : f32 to vector<8x256xf32>
    %199 = arith.addf %198, %197 : vector<8x256xf32>
    %200 = arith.divf %198, %199 : vector<8x256xf32>
    %201 = vector.extract_strided_slice %194 {offsets = [0, 256], sizes = [8, 256], strides = [1, 1]} : vector<8x1024xf32> to vector<8x256xf32>
    %202 = arith.negf %201 : vector<8x256xf32>
    %203 = math.exp %202 : vector<8x256xf32>
    %cst_42 = arith.constant 1.000000e+00 : f32
    %204 = vector.broadcast %cst_42 : f32 to vector<8x256xf32>
    %205 = arith.addf %204, %203 : vector<8x256xf32>
    %206 = arith.divf %204, %205 : vector<8x256xf32>
    %207 = vector.extract_strided_slice %194 {offsets = [0, 512], sizes = [8, 256], strides = [1, 1]} : vector<8x1024xf32> to vector<8x256xf32>
    %208 = math.tanh %207 : vector<8x256xf32>
    %209 = vector.extract_strided_slice %194 {offsets = [0, 768], sizes = [8, 256], strides = [1, 1]} : vector<8x1024xf32> to vector<8x256xf32>
    %210 = arith.negf %209 : vector<8x256xf32>
    %211 = math.exp %210 : vector<8x256xf32>
    %cst_43 = arith.constant 1.000000e+00 : f32
    %212 = vector.broadcast %cst_43 : f32 to vector<8x256xf32>
    %213 = arith.addf %212, %211 : vector<8x256xf32>
    %214 = arith.divf %212, %213 : vector<8x256xf32>
    %215 = arith.mulf %206, %186 : vector<8x256xf32>
    %216 = arith.mulf %200, %208 : vector<8x256xf32>
    %217 = arith.addf %215, %216 : vector<8x256xf32>
    %218 = math.tanh %217 : vector<8x256xf32>
    %219 = arith.mulf %214, %218 : vector<8x256xf32>
    %c7_i32 = arith.constant 7 : i32
    %220 = arith.index_cast %c7_i32 : i32 to index
    %c0_44 = arith.constant 0 : index
    %c0_45 = arith.constant 0 : index
    %221 = vector.load %arg0[%220, %c0_44, %c0_45] : memref<8x8x1024xf32, #tpu.memory_space<vmem>>, vector<1x8x1024xf32>
    %222 = vector.shape_cast %221 : vector<1x8x1024xf32> to vector<8x1024xf32>
    %223 = arith.truncf %219 : vector<8x256xf32> to vector<8x256xbf16>
    %cst_46 = arith.constant dense<0.000000e+00> : vector<8x1024xf32>
    %224 = tpu.matmul %223, %0, %cst_46 {dimension_numbers = #tpu.dot_dimension_numbers<[1], [0], [0], [1], [0, 0, 1, 1], [], []>} : vector<8x256xbf16>, vector<256x1024xbf16>, vector<8x1024xf32> -> vector<8x1024xf32>
    %225 = arith.addf %222, %224 : vector<8x1024xf32>
    %226 = vector.extract_strided_slice %225 {offsets = [0, 0], sizes = [8, 256], strides = [1, 1]} : vector<8x1024xf32> to vector<8x256xf32>
    %227 = arith.negf %226 : vector<8x256xf32>
    %228 = math.exp %227 : vector<8x256xf32>
    %cst_47 = arith.constant 1.000000e+00 : f32
    %229 = vector.broadcast %cst_47 : f32 to vector<8x256xf32>
    %230 = arith.addf %229, %228 : vector<8x256xf32>
    %231 = arith.divf %229, %230 : vector<8x256xf32>
    %232 = vector.extract_strided_slice %225 {offsets = [0, 256], sizes = [8, 256], strides = [1, 1]} : vector<8x1024xf32> to vector<8x256xf32>
    %233 = arith.negf %232 : vector<8x256xf32>
    %234 = math.exp %233 : vector<8x256xf32>
    %cst_48 = arith.constant 1.000000e+00 : f32
    %235 = vector.broadcast %cst_48 : f32 to vector<8x256xf32>
    %236 = arith.addf %235, %234 : vector<8x256xf32>
    %237 = arith.divf %235, %236 : vector<8x256xf32>
    %238 = vector.extract_strided_slice %225 {offsets = [0, 512], sizes = [8, 256], strides = [1, 1]} : vector<8x1024xf32> to vector<8x256xf32>
    %239 = math.tanh %238 : vector<8x256xf32>
    %240 = vector.extract_strided_slice %225 {offsets = [0, 768], sizes = [8, 256], strides = [1, 1]} : vector<8x1024xf32> to vector<8x256xf32>
    %241 = arith.negf %240 : vector<8x256xf32>
    %242 = math.exp %241 : vector<8x256xf32>
    %cst_49 = arith.constant 1.000000e+00 : f32
    %243 = vector.broadcast %cst_49 : f32 to vector<8x256xf32>
    %244 = arith.addf %243, %242 : vector<8x256xf32>
    %245 = arith.divf %243, %244 : vector<8x256xf32>
    %246 = arith.mulf %237, %217 : vector<8x256xf32>
    %247 = arith.mulf %231, %239 : vector<8x256xf32>
    %248 = arith.addf %246, %247 : vector<8x256xf32>
    %249 = math.tanh %248 : vector<8x256xf32>
    %250 = arith.mulf %245, %249 : vector<8x256xf32>
    %c8_i32 = arith.constant 8 : i32
    %cst_50 = arith.constant 0.000000e+00 : f32
    %251 = vector.broadcast %cst_50 : f32 to vector<8x256xf32>
    %252 = arith.maximumf %250, %251 : vector<8x256xf32>
    %c0_51 = arith.constant 0 : index
    %c0_52 = arith.constant 0 : index
    %253 = vector.load %arg2[%c0_51, %c0_52] : memref<256x128xf32, #tpu.memory_space<vmem>>, vector<256x128xf32>
    %cst_53 = arith.constant dense<0.000000e+00> : vector<8x128xf32>
    %254 = tpu.matmul %252, %253, %cst_53 {dimension_numbers = #tpu.dot_dimension_numbers<[1], [0], [0], [1], [0, 0, 1, 1], [], []>} : vector<8x256xf32>, vector<256x128xf32>, vector<8x128xf32> -> vector<8x128xf32>
    %c0_54 = arith.constant 0 : index
    %c0_55 = arith.constant 0 : index
    %255 = vector.load %arg3[%c0_54, %c0_55] : memref<1x128xf32, #tpu.memory_space<vmem>>, vector<1x128xf32>
    %256 = vector.broadcast %255 : vector<1x128xf32> to vector<8x128xf32>
    %257 = arith.addf %254, %256 : vector<8x128xf32>
    %c0_56 = arith.constant 0 : index
    %c0_57 = arith.constant 0 : index
    %258 = vector.load %arg4[%c0_56, %c0_57] : memref<8x128xf32, #tpu.memory_space<vmem>>, vector<8x128xf32>
    tpu.vector_store %arg4[%c0_56, %c0_57], %257 {strides = array<i32>} : memref<8x128xf32, #tpu.memory_space<vmem>>, vector<8x128xf32>,
    return
  }
}

</mosaic_0001>

<bundles_post_ra>
// kernel: lstm_forward.1
= control target key start
LH: loop header
LB: loop body
LE: loop exit
PB: predicated region body
PF: predicated region fallthrough
CT: control target
= control target key end

     0   :  { %s7920_s1 = inlined_call_operand.vmem [shape: bf16[256,1024], index: 1, kind: input, shape index: {}]   ;;  %s7921_s0 = inlined_call_operand.vmem [shape: f32[8,8,1024], index: 0, kind: input, shape index: {}]   ;;  %s7922_s3 = inlined_call_operand.vmem [shape: f32[1,128], index: 3, kind: input, shape index: {}]   ;;  %s7923_s2 = inlined_call_operand.vmem [shape: f32[256,128], index: 2, kind: input, shape index: {}]   ;;  %s7924_s4 = inlined_call_operand.vmem [shape: f32[8,128], index: 4, kind: output, shape index: {}]  }
   0x1   :  { %v3916_v0 = vld [vmem:[%s7920_s1 + $0x1c0] sm:$0xf]  ;;  %v4362_v5 = vld [vmem:[%s7920_s1 + $0x1c4] sm:$0xf] }
   0x2   :  { %v4366_v1 = vld [vmem:[%s7920_s1 + $0x1dc] sm:$0xf0]  ;;  %v3918_v6 = vld [vmem:[%s7920_s1 + $0x1e0] sm:$0xf0] }
   0x3   :  { %v4172_v2 = vld [vmem:[%s7920_s1 + $0x3c0] sm:$0xf]  ;;  %v4727_v3 = vor.u32 %v4366_v1, %v3916_v0  ;;  %v4740_v8 = vor.u32 %v4362_v5, %v3918_v6  ;;  %v4426_v9 = vld [vmem:[%s7920_s1 + $0x3c4] sm:$0xf] }
   0x4   :  { %v4430_v4 = vld [vmem:[%s7920_s1 + $0x3dc] sm:$0xf0]  ;;  %v4174_v10 = vld [vmem:[%s7920_s1 + $0x3e0] sm:$0xf0] }
   0x5   :  { %8191 = vst [vmem:[#allocation2_spill] sm:$0xff] %v4727_v3  ;;  %v4738_v7 = vor.u32 %v4430_v4, %v4172_v2  ;;  %v3884_v11 = vld [vmem:[%s7920_s1 + $0x180] sm:$0xf]  ;;  %794 = vmatpush.bf16.msra.mxu0 %v4727_v3  ;;  %v4752_v12 = vor.u32 %v4426_v9, %v4174_v10  ;;  %820 = vmatpush.bf16.msra.mxu2 %v4740_v8  ;;  %v4354_v18 = vld [vmem:[%s7920_s1 + $0x184] sm:$0xf] }
   0x6   :  { %8193 = vst [vmem:[#allocation4_spill] sm:$0xff] %v4740_v8  ;;  %v4358_v13 = vld [vmem:[%s7920_s1 + $0x19c] sm:$0xf0]  ;;  %v3886_v19 = vld [vmem:[%s7920_s1 + $0x1a0] sm:$0xf0] }
   0x7   :  { %8192 = vst [vmem:[#allocation3_spill] sm:$0xff] %v4738_v7  ;;  %v4140_v14 = vld [vmem:[%s7920_s1 + $0x380] sm:$0xf]  ;;  %807 = vmatpush.bf16.msra.mxu1 %v4738_v7  ;;  %v4765_v16 = vor.u32 %v4358_v13, %v3884_v11  ;;  %v4418_v20 = vld [vmem:[%s7920_s1 + $0x384] sm:$0xf]  ;;  %833 = vmatpush.bf16.msra.mxu3 %v4752_v12  ;;  %v4779_v21 = vor.u32 %v4354_v18, %v3886_v19 }
   0x8   :  { %8194 = vst [vmem:[#allocation5_spill] sm:$0xff] %v4752_v12  ;;  %v4422_v15 = vld [vmem:[%s7920_s1 + $0x39c] sm:$0xf0]  ;;  %v4142_v22 = vld [vmem:[%s7920_s1 + $0x3a0] sm:$0xf0] }
   0x9   :  { %8195 = vst [vmem:[#allocation6_spill] sm:$0xff] %v4765_v16  ;;  %v4767_v17 = vor.u32 %v4422_v15, %v4140_v14  ;;  %v3852_v23 = vld [vmem:[%s7920_s1 + $0x140] sm:$0xf]  ;;  %v4790_v25 = vor.u32 %v4418_v20, %v4142_v22  ;;  %v4346_v28 = vld [vmem:[%s7920_s1 + $0x144] sm:$0xf]  ;;  %795 = vmatpush.bf16.msra.mxu0 %v4765_v16  ;;  %821 = vmatpush.bf16.msra.mxu2 %v4779_v21 }
   0xa   :  { %8197 = vst [vmem:[#allocation8_spill] sm:$0xff] %v4779_v21  ;;  %v4350_v24 = vld [vmem:[%s7920_s1 + $0x15c] sm:$0xf0]  ;;  %v3854_v30 = vld [vmem:[%s7920_s1 + $0x160] sm:$0xf0] }
   0xb   :  { %8196 = vst [vmem:[#allocation7_spill] sm:$0xff] %v4767_v17  ;;  %v4108_v26 = vld [vmem:[%s7920_s1 + $0x340] sm:$0xf]  ;;  %v4802_v29 = vor.u32 %v4350_v24, %v3852_v23  ;;  %v4410_v31 = vld [vmem:[%s7920_s1 + $0x344] sm:$0xf]  ;;  %808 = vmatpush.bf16.msra.mxu1 %v4767_v17  ;;  %v4817_v34 = vor.u32 %v4346_v28, %v3854_v30  ;;  %834 = vmatpush.bf16.msra.mxu3 %v4790_v25 }
   0xc   :  { %8198 = vst [vmem:[#allocation9_spill] sm:$0xff] %v4790_v25  ;;  %v4414_v27 = vld [vmem:[%s7920_s1 + $0x35c] sm:$0xf0]  ;;  %v4110_v32 = vld [vmem:[%s7920_s1 + $0x360] sm:$0xf0] }
   0xd   :  { %8199 = vst [vmem:[#allocation10_spill] sm:$0xff] %v4802_v29  ;;  %v4815_v33 = vor.u32 %v4414_v27, %v4108_v26  ;;  %v3820_v35 = vld [vmem:[%s7920_s1 + $0x100] sm:$0xf]  ;;  %v4829_v38 = vor.u32 %v4410_v31, %v4110_v32  ;;  %v4338_v40 = vld [vmem:[%s7920_s1 + $0x104] sm:$0xf]  ;;  %796 = vmatpush.bf16.msra.mxu0 %v4802_v29  ;;  %822 = vmatpush.bf16.msra.mxu2 %v4817_v34 }
   0xe   :  { %8201 = vst [vmem:[#allocation12_spill] sm:$0xff] %v4817_v34  ;;  %v4342_v36 = vld [vmem:[%s7920_s1 + $0x11c] sm:$0xf0]  ;;  %v3822_v41 = vld [vmem:[%s7920_s1 + $0x120] sm:$0xf0] }
   0xf   :  { %8200 = vst [vmem:[#allocation11_spill] sm:$0xff] %v4815_v33  ;;  %v4076_v37 = vld [vmem:[%s7920_s1 + $0x300] sm:$0xf]  ;;  %v4402_v42 = vld [vmem:[%s7920_s1 + $0x304] sm:$0xf]  ;;  %v4847_v44 = vor.u32 %v4342_v36, %v3820_v35  ;;  %809 = vmatpush.bf16.msra.mxu1 %v4815_v33  ;;  %v4853_v46 = vor.u32 %v4338_v40, %v3822_v41  ;;  %835 = vmatpush.bf16.msra.mxu3 %v4829_v38 }
  0x10   :  { %8202 = vst [vmem:[#allocation13_spill] sm:$0xff] %v4829_v38  ;;  %v4406_v39 = vld [vmem:[%s7920_s1 + $0x31c] sm:$0xf0]  ;;  %v4078_v43 = vld [vmem:[%s7920_s1 + $0x320] sm:$0xf0] }
  0x11   :  { %8203 = vst [vmem:[#allocation14_spill] sm:$0xff] %v4847_v44  ;;  %v4851_v45 = vor.u32 %v4406_v39, %v4076_v37  ;;  %v3788_v47 = vld [vmem:[%s7920_s1 + $0xc0] sm:$0xf]  ;;  %v4865_v50 = vor.u32 %v4402_v42, %v4078_v43  ;;  %v4330_v52 = vld [vmem:[%s7920_s1 + $0xc4] sm:$0xf]  ;;  %797 = vmatpush.bf16.msra.mxu0 %v4847_v44  ;;  %823 = vmatpush.bf16.msra.mxu2 %v4853_v46 }
  0x12   :  { %8205 = vst [vmem:[#allocation16_spill] sm:$0xff] %v4853_v46  ;;  %v4334_v48 = vld [vmem:[%s7920_s1 + $0xdc] sm:$0xf0]  ;;  %v3790_v53 = vld [vmem:[%s7920_s1 + $0xe0] sm:$0xf0] }
  0x13   :  { %8204 = vst [vmem:[#allocation15_spill] sm:$0xff] %v4851_v45  ;;  %v4044_v49 = vld [vmem:[%s7920_s1 + $0x2c0] sm:$0xf]  ;;  %v4394_v54 = vld [vmem:[%s7920_s1 + $0x2c4] sm:$0xf]  ;;  %v4883_v56 = vor.u32 %v4334_v48, %v3788_v47  ;;  %810 = vmatpush.bf16.msra.mxu1 %v4851_v45  ;;  %v4889_v58 = vor.u32 %v4330_v52, %v3790_v53  ;;  %836 = vmatpush.bf16.msra.mxu3 %v4865_v50 }
  0x14   :  { %8206 = vst [vmem:[#allocation17_spill] sm:$0xff] %v4865_v50  ;;  %v4398_v51 = vld [vmem:[%s7920_s1 + $0x2dc] sm:$0xf0]  ;;  %v4046_v55 = vld [vmem:[%s7920_s1 + $0x2e0] sm:$0xf0] }
  0x15   :  { %8207 = vst [vmem:[#allocation18_spill] sm:$0xff] %v4883_v56  ;;  %v4887_v57 = vor.u32 %v4398_v51, %v4044_v49  ;;  %v3756_v59 = vld [vmem:[%s7920_s1 + $0x80] sm:$0xf]  ;;  %v4901_v62 = vor.u32 %v4394_v54, %v4046_v55  ;;  %v4322_v0 = vld [vmem:[%s7920_s1 + $0x84] sm:$0xf]  ;;  %798 = vmatpush.bf16.msra.mxu0 %v4883_v56  ;;  %824 = vmatpush.bf16.msra.mxu2 %v4889_v58 }
  0x16   :  { %8209 = vst [vmem:[#allocation20_spill] sm:$0xff] %v4889_v58  ;;  %v4326_v60 = vld [vmem:[%s7920_s1 + $0x9c] sm:$0xf0]  ;;  %v3758_v1 = vld [vmem:[%s7920_s1 + $0xa0] sm:$0xf0] }
  0x17   :  { %8208 = vst [vmem:[#allocation19_spill] sm:$0xff] %v4887_v57  ;;  %v4012_v61 = vld [vmem:[%s7920_s1 + $0x280] sm:$0xf]  ;;  %v4386_v2 = vld [vmem:[%s7920_s1 + $0x284] sm:$0xf]  ;;  %v4919_v5 = vor.u32 %v4326_v60, %v3756_v59  ;;  %811 = vmatpush.bf16.msra.mxu1 %v4887_v57  ;;  %v4925_v9 = vor.u32 %v4322_v0, %v3758_v1  ;;  %837 = vmatpush.bf16.msra.mxu3 %v4901_v62 }
  0x18   :  { %8210 = vst [vmem:[#allocation21_spill] sm:$0xff] %v4901_v62  ;;  %v4390_v63 = vld [vmem:[%s7920_s1 + $0x29c] sm:$0xf0]  ;;  %v4014_v4 = vld [vmem:[%s7920_s1 + $0x2a0] sm:$0xf0] }
  0x19   :  { %8211 = vst [vmem:[#allocation22_spill] sm:$0xff] %v4919_v5  ;;  %v4923_v6 = vor.u32 %v4390_v63, %v4012_v61  ;;  %v3724_v10 = vld [vmem:[%s7920_s1 + $0x40] sm:$0xf]  ;;  %v4937_v14 = vor.u32 %v4386_v2, %v4014_v4  ;;  %v4314_v18 = vld [vmem:[%s7920_s1 + $0x44] sm:$0xf]  ;;  %799 = vmatpush.bf16.msra.mxu0 %v4919_v5  ;;  %825 = vmatpush.bf16.msra.mxu2 %v4925_v9 }
  0x1a   :  { %8213 = vst [vmem:[#allocation24_spill] sm:$0xff] %v4925_v9  ;;  %v4318_v11 = vld [vmem:[%s7920_s1 + $0x5c] sm:$0xf0]  ;;  %v3726_v19 = vld [vmem:[%s7920_s1 + $0x60] sm:$0xf0] }
  0x1b   :  { %8212 = vst [vmem:[#allocation23_spill] sm:$0xff] %v4923_v6  ;;  %v3980_v13 = vld [vmem:[%s7920_s1 + $0x240] sm:$0xf]  ;;  %v4378_v20 = vld [vmem:[%s7920_s1 + $0x244] sm:$0xf]  ;;  %v4955_v23 = vor.u32 %v4318_v11, %v3724_v10  ;;  %812 = vmatpush.bf16.msra.mxu1 %v4923_v6  ;;  %v4967_v28 = vor.u32 %v4314_v18, %v3726_v19  ;;  %838 = vmatpush.bf16.msra.mxu3 %v4937_v14 }
  0x1c   :  { %8214 = vst [vmem:[#allocation25_spill] sm:$0xff] %v4937_v14  ;;  %v4382_v15 = vld [vmem:[%s7920_s1 + $0x25c] sm:$0xf0]  ;;  %v3982_v22 = vld [vmem:[%s7920_s1 + $0x260] sm:$0xf0] }
  0x1d   :  { %8215 = vst [vmem:[#allocation26_spill] sm:$0xff] %v4955_v23  ;;  %v3692_v24 = vld [vmem:[%s7920_s1] sm:$0xf]  ;;  %v4965_v27 = vor.u32 %v4382_v15, %v3980_v13  ;;  %v4306_v32 = vld [vmem:[%s7920_s1 + $0x4] sm:$0xf]  ;;  %v4979_v35 = vor.u32 %v4378_v20, %v3982_v22  ;;  %800 = vmatpush.bf16.msra.mxu0 %v4955_v23  ;;  %826 = vmatpush.bf16.msra.mxu2 %v4967_v28 }
  0x1e   :  { %v4310_v26 = vld [vmem:[%s7920_s1 + $0x1c] sm:$0xf0]  ;;  %8217 = vst [vmem:[#allocation28_spill] sm:$0xff] %v4967_v28  ;;  %v3694_v36 = vld [vmem:[%s7920_s1 + $0x20] sm:$0xf0] }
  0x1f   :  { %8216 = vst [vmem:[#allocation27_spill] sm:$0xff] %v4965_v27  ;;  %v3948_v30 = vld [vmem:[%s7920_s1 + $0x200] sm:$0xf]  ;;  %v4370_v37 = vld [vmem:[%s7920_s1 + $0x204] sm:$0xf]  ;;  %v5000_v43 = vor.u32 %v4310_v26, %v3692_v24  ;;  %813 = vmatpush.bf16.msra.mxu1 %v4965_v27  ;;  %v5015_v52 = vor.u32 %v4306_v32, %v3694_v36  ;;  %839 = vmatpush.bf16.msra.mxu3 %v4979_v35 }
  0x20   :  { %v4374_v31 = vld [vmem:[%s7920_s1 + $0x21c] sm:$0xf0]  ;;  %8218 = vst [vmem:[#allocation29_spill] sm:$0xff] %v4979_v35  ;;  %v3950_v39 = vld [vmem:[%s7920_s1 + $0x220] sm:$0xf0] }
  0x21   :  { %v3924_v40 = vld [vmem:[%s7920_s1 + $0x1c8] sm:$0xf]  ;;  %8219 = vst [vmem:[#allocation30_spill] sm:$0xff] %v5000_v43  ;;  %v4363_v48 = vld [vmem:[%s7920_s1 + $0x1cc] sm:$0xf]  ;;  %v5013_v51 = vor.u32 %v4374_v31, %v3948_v30  ;;  %v5024_v55 = vor.u32 %v4370_v37, %v3950_v39  ;;  %801 = vmatpush.bf16.msra.mxu0 %v5000_v43  ;;  %827 = vmatpush.bf16.msra.mxu2 %v5015_v52  ;;  %v7925_v37 = vmov 0  }
  0x22   :  { %v4367_v41 = vld [vmem:[%s7920_s1 + $0x1e4] sm:$0xf0]  ;;  %v3926_v49 = vld [vmem:[%s7920_s1 + $0x1e8] sm:$0xf0]  ;;  %8221 = vst [vmem:[#allocation32_spill] sm:$0xff] %v5015_v52 }
  0x23   :  { %v4180_v42 = vld [vmem:[%s7920_s1 + $0x3c8] sm:$0xf]  ;;  %8220 = vst [vmem:[#allocation31_spill] sm:$0xff] %v5013_v51  ;;  %v4427_v53 = vld [vmem:[%s7920_s1 + $0x3cc] sm:$0xf]  ;;  %v5026_v59 = vor.u32 %v4367_v41, %v3924_v40  ;;  %v5030_v61 = vor.u32 %v4363_v48, %v3926_v49  ;;  %814 = vmatpush.bf16.msra.mxu1 %v5013_v51  ;;  %840 = vmatpush.bf16.msra.mxu3 %v5024_v55 }
  0x24   :  { %v4431_v47 = vld [vmem:[%s7920_s1 + $0x3e4] sm:$0xf0]  ;;  %v4182_v54 = vld [vmem:[%s7920_s1 + $0x3e8] sm:$0xf0]  ;;  %8222 = vst [vmem:[#allocation33_spill] sm:$0xff] %v5024_v55  ;;  %828 = vmatmul.bf16.vlgmr.msra.gmra.mxu2 %v7925_v37  ;;  %802 = vmatmul.bf16.vlgmr.msra.gmra.mxu0 %v7925_v37 }
  0x25   :  { %8223 = vst [vmem:[#allocation34_spill] sm:$0xff] %v5026_v59  ;;  %v5028_v60 = vor.u32 %v4431_v47, %v4180_v42  ;;  %v3892_v63 = vld [vmem:[%s7920_s1 + $0x188] sm:$0xf]  ;;  %v5042_v2 = vor.u32 %v4427_v53, %v4182_v54  ;;  %v4355_v10 = vld [vmem:[%s7920_s1 + $0x18c] sm:$0xf]  ;;  %846 = vmatpush.bf16.msrb.mxu0 %v5026_v59  ;;  %872 = vmatpush.bf16.msrb.mxu2 %v5030_v61 }
  0x26   :  { %8225 = vst [vmem:[#allocation36_spill] sm:$0xff] %v5030_v61  ;;  %v4359_v0 = vld [vmem:[%s7920_s1 + $0x1a4] sm:$0xf0]  ;;  %v3894_v11 = vld [vmem:[%s7920_s1 + $0x1a8] sm:$0xf0]  ;;  %841 = vmatmul.bf16.vlgmr.msra.gmra.mxu3 %v7925_v37  ;;  %815 = vmatmul.bf16.vlgmr.msra.gmra.mxu1 %v7925_v37 }
  0x27   :  { %8224 = vst [vmem:[#allocation35_spill] sm:$0xff] %v5028_v60  ;;  %v4148_v1 = vld [vmem:[%s7920_s1 + $0x388] sm:$0xf]  ;;  %v4419_v13 = vld [vmem:[%s7920_s1 + $0x38c] sm:$0xf]  ;;  %v5063_v18 = vor.u32 %v4359_v0, %v3892_v63  ;;  %859 = vmatpush.bf16.msrb.mxu1 %v5028_v60  ;;  %v5069_v20 = vor.u32 %v4355_v10, %v3894_v11  ;;  %885 = vmatpush.bf16.msrb.mxu3 %v5042_v2 }
  0x28   :  { %8226 = vst [vmem:[#allocation37_spill] sm:$0xff] %v5042_v2  ;;  %v4423_v4 = vld [vmem:[%s7920_s1 + $0x3a4] sm:$0xf0]  ;;  %v4150_v15 = vld [vmem:[%s7920_s1 + $0x3a8] sm:$0xf0] }
  0x29   :  { %8227 = vst [vmem:[#allocation38_spill] sm:$0xff] %v5063_v18  ;;  %v5067_v19 = vor.u32 %v4423_v4, %v4148_v1  ;;  %v3860_v22 = vld [vmem:[%s7920_s1 + $0x148] sm:$0xf]  ;;  %v5081_v30 = vor.u32 %v4419_v13, %v4150_v15  ;;  %v4347_v32 = vld [vmem:[%s7920_s1 + $0x14c] sm:$0xf]  ;;  %847 = vmatpush.bf16.msrb.mxu0 %v5063_v18  ;;  %873 = vmatpush.bf16.msrb.mxu2 %v5069_v20 }
  0x2a   :  { %8229 = vst [vmem:[#allocation40_spill] sm:$0xff] %v5069_v20  ;;  %v4351_v24 = vld [vmem:[%s7920_s1 + $0x164] sm:$0xf0]  ;;  %v3862_v36 = vld [vmem:[%s7920_s1 + $0x168] sm:$0xf0] }
  0x2b   :  { %8228 = vst [vmem:[#allocation39_spill] sm:$0xff] %v5067_v19  ;;  %v4116_v26 = vld [vmem:[%s7920_s1 + $0x348] sm:$0xf]  ;;  %v4411_v39 = vld [vmem:[%s7920_s1 + $0x34c] sm:$0xf]  ;;  %v5102_v41 = vor.u32 %v4351_v24, %v3860_v22  ;;  %860 = vmatpush.bf16.msrb.mxu1 %v5067_v19  ;;  %v5109_v47 = vor.u32 %v4347_v32, %v3862_v36  ;;  %886 = vmatpush.bf16.msrb.mxu3 %v5081_v30 }
  0x2c   :  { %8230 = vst [vmem:[#allocation41_spill] sm:$0xff] %v5081_v30  ;;  %v4415_v31 = vld [vmem:[%s7920_s1 + $0x364] sm:$0xf0]  ;;  %v4118_v40 = vld [vmem:[%s7920_s1 + $0x368] sm:$0xf0] }
  0x2d   :  { %8231 = vst [vmem:[#allocation42_spill] sm:$0xff] %v5102_v41  ;;  %v5107_v42 = vor.u32 %v4415_v31, %v4116_v26  ;;  %v3828_v48 = vld [vmem:[%s7920_s1 + $0x108] sm:$0xf]  ;;  %v5121_v54 = vor.u32 %v4411_v39, %v4118_v40  ;;  %v4339_v0 = vld [vmem:[%s7920_s1 + $0x10c] sm:$0xf]  ;;  %848 = vmatpush.bf16.msrb.mxu0 %v5102_v41  ;;  %874 = vmatpush.bf16.msrb.mxu2 %v5109_v47 }
  0x2e   :  { %8233 = vst [vmem:[#allocation44_spill] sm:$0xff] %v5109_v47  ;;  %v4343_v49 = vld [vmem:[%s7920_s1 + $0x124] sm:$0xf0]  ;;  %v3830_v1 = vld [vmem:[%s7920_s1 + $0x128] sm:$0xf0] }
  0x2f   :  { %8232 = vst [vmem:[#allocation43_spill] sm:$0xff] %v5107_v42  ;;  %v4084_v53 = vld [vmem:[%s7920_s1 + $0x308] sm:$0xf]  ;;  %v4403_v4 = vld [vmem:[%s7920_s1 + $0x30c] sm:$0xf]  ;;  %v5139_v11 = vor.u32 %v4343_v49, %v3828_v48  ;;  %861 = vmatpush.bf16.msrb.mxu1 %v5107_v42  ;;  %v5145_v15 = vor.u32 %v4339_v0, %v3830_v1  ;;  %887 = vmatpush.bf16.msrb.mxu3 %v5121_v54 }
  0x30   :  { %8234 = vst [vmem:[#allocation45_spill] sm:$0xff] %v5121_v54  ;;  %v4407_v63 = vld [vmem:[%s7920_s1 + $0x324] sm:$0xf0]  ;;  %v4086_v10 = vld [vmem:[%s7920_s1 + $0x328] sm:$0xf0] }
  0x31   :  { %8235 = vst [vmem:[#allocation46_spill] sm:$0xff] %v5139_v11  ;;  %v5143_v13 = vor.u32 %v4407_v63, %v4084_v53  ;;  %v3796_v22 = vld [vmem:[%s7920_s1 + $0xc8] sm:$0xf]  ;;  %v5157_v31 = vor.u32 %v4403_v4, %v4086_v10  ;;  %v4331_v36 = vld [vmem:[%s7920_s1 + $0xcc] sm:$0xf]  ;;  %849 = vmatpush.bf16.msrb.mxu0 %v5139_v11  ;;  %875 = vmatpush.bf16.msrb.mxu2 %v5145_v15 }
  0x32   :  { %8237 = vst [vmem:[#allocation48_spill] sm:$0xff] %v5145_v15  ;;  %v4335_v24 = vld [vmem:[%s7920_s1 + $0xe4] sm:$0xf0]  ;;  %v3798_v39 = vld [vmem:[%s7920_s1 + $0xe8] sm:$0xf0] }
  0x33   :  { %8236 = vst [vmem:[#allocation47_spill] sm:$0xff] %v5143_v13  ;;  %v4052_v26 = vld [vmem:[%s7920_s1 + $0x2c8] sm:$0xf]  ;;  %v4395_v40 = vld [vmem:[%s7920_s1 + $0x2cc] sm:$0xf]  ;;  %v5175_v49 = vor.u32 %v4335_v24, %v3796_v22  ;;  %862 = vmatpush.bf16.msrb.mxu1 %v5143_v13  ;;  %v5181_v63 = vor.u32 %v4331_v36, %v3798_v39  ;;  %888 = vmatpush.bf16.msrb.mxu3 %v5157_v31 }
  0x34   :  { %8238 = vst [vmem:[#allocation49_spill] sm:$0xff] %v5157_v31  ;;  %v4399_v32 = vld [vmem:[%s7920_s1 + $0x2e4] sm:$0xf0]  ;;  %v4054_v48 = vld [vmem:[%s7920_s1 + $0x2e8] sm:$0xf0] }
  0x35   :  { %8239 = vst [vmem:[#allocation50_spill] sm:$0xff] %v5175_v49  ;;  %v5179_v53 = vor.u32 %v4399_v32, %v4052_v26  ;;  %v3764_v0 = vld [vmem:[%s7920_s1 + $0x88] sm:$0xf]  ;;  %v5193_v10 = vor.u32 %v4395_v40, %v4054_v48  ;;  %v4323_v24 = vld [vmem:[%s7920_s1 + $0x8c] sm:$0xf]  ;;  %850 = vmatpush.bf16.msrb.mxu0 %v5175_v49  ;;  %876 = vmatpush.bf16.msrb.mxu2 %v5181_v63 }
  0x36   :  { %8241 = vst [vmem:[#allocation52_spill] sm:$0xff] %v5181_v63  ;;  %v4327_v1 = vld [vmem:[%s7920_s1 + $0xa4] sm:$0xf0]  ;;  %v3766_v26 = vld [vmem:[%s7920_s1 + $0xa8] sm:$0xf0] }
  0x37   :  { %8240 = vst [vmem:[#allocation51_spill] sm:$0xff] %v5179_v53  ;;  %v4020_v4 = vld [vmem:[%s7920_s1 + $0x288] sm:$0xf]  ;;  %v4387_v32 = vld [vmem:[%s7920_s1 + $0x28c] sm:$0xf]  ;;  %v5211_v39 = vor.u32 %v4327_v1, %v3764_v0  ;;  %863 = vmatpush.bf16.msrb.mxu1 %v5179_v53  ;;  %v5217_v48 = vor.u32 %v4323_v24, %v3766_v26  ;;  %889 = vmatpush.bf16.msrb.mxu3 %v5193_v10 }
  0x38   :  { %8242 = vst [vmem:[#allocation53_spill] sm:$0xff] %v5193_v10  ;;  %v4391_v22 = vld [vmem:[%s7920_s1 + $0x2a4] sm:$0xf0]  ;;  %v4022_v36 = vld [vmem:[%s7920_s1 + $0x2a8] sm:$0xf0] }
  0x39   :  { %8243 = vst [vmem:[#allocation54_spill] sm:$0xff] %v5211_v39  ;;  %v5215_v40 = vor.u32 %v4391_v22, %v4020_v4  ;;  %v3732_v37 = vld [vmem:[%s7920_s1 + $0x48] sm:$0xf]  ;;  %v5229_v1 = vor.u32 %v4387_v32, %v4022_v36  ;;  %v4315_v22 = vld [vmem:[%s7920_s1 + $0x4c] sm:$0xf]  ;;  %851 = vmatpush.bf16.msrb.mxu0 %v5211_v39  ;;  %877 = vmatpush.bf16.msrb.mxu2 %v5217_v48 }
  0x3a   :  { %8245 = vst [vmem:[#allocation56_spill] sm:$0xff] %v5217_v48  ;;  %v4319_v31 = vld [vmem:[%s7920_s1 + $0x64] sm:$0xf0]  ;;  %v3734_v24 = vld [vmem:[%s7920_s1 + $0x68] sm:$0xf0] }
  0x3b   :  { %8244 = vst [vmem:[#allocation55_spill] sm:$0xff] %v5215_v40  ;;  %v3988_v0 = vld [vmem:[%s7920_s1 + $0x248] sm:$0xf]  ;;  %v4379_v26 = vld [vmem:[%s7920_s1 + $0x24c] sm:$0xf]  ;;  %v5247_v36 = vor.u32 %v4319_v31, %v3732_v37  ;;  %864 = vmatpush.bf16.msrb.mxu1 %v5215_v40  ;;  %v5259_v49 = vor.u32 %v4315_v22, %v3734_v24  ;;  %890 = vmatpush.bf16.msrb.mxu3 %v5229_v1 }
  0x3c   :  { %8246 = vst [vmem:[#allocation57_spill] sm:$0xff] %v5229_v1  ;;  %v4383_v4 = vld [vmem:[%s7920_s1 + $0x264] sm:$0xf0]  ;;  %v3990_v32 = vld [vmem:[%s7920_s1 + $0x268] sm:$0xf0] }
  0x3d   :  { %8247 = vst [vmem:[#allocation58_spill] sm:$0xff] %v5247_v36  ;;  %v3700_v10 = vld [vmem:[%s7920_s1 + $0x8] sm:$0xf]  ;;  %v5257_v63 = vor.u32 %v4383_v4, %v3988_v0  ;;  %v4307_v39 = vld [vmem:[%s7920_s1 + $0xc] sm:$0xf]  ;;  %v5271_v40 = vor.u32 %v4379_v26, %v3990_v32  ;;  %852 = vmatpush.bf16.msrb.mxu0 %v5247_v36  ;;  %878 = vmatpush.bf16.msrb.mxu2 %v5259_v49 }
  0x3e   :  { %v4311_v53 = vld [vmem:[%s7920_s1 + $0x24] sm:$0xf0]  ;;  %8249 = vst [vmem:[#allocation60_spill] sm:$0xff] %v5259_v49  ;;  %v3702_v0 = vld [vmem:[%s7920_s1 + $0x28] sm:$0xf0] }
  0x3f   :  { %8248 = vst [vmem:[#allocation59_spill] sm:$0xff] %v5257_v63  ;;  %v3956_v37 = vld [vmem:[%s7920_s1 + $0x208] sm:$0xf]  ;;  %v4371_v4 = vld [vmem:[%s7920_s1 + $0x20c] sm:$0xf]  ;;  %v5292_v1 = vor.u32 %v4311_v53, %v3700_v10  ;;  %865 = vmatpush.bf16.msrb.mxu1 %v5257_v63  ;;  %v5307_v53 = vor.u32 %v4307_v39, %v3702_v0  ;;  %891 = vmatpush.bf16.msrb.mxu3 %v5271_v40 }
  0x40   :  { %v4375_v31 = vld [vmem:[%s7920_s1 + $0x224] sm:$0xf0]  ;;  %8250 = vst [vmem:[#allocation61_spill] sm:$0xff] %v5271_v40  ;;  %v3958_v22 = vld [vmem:[%s7920_s1 + $0x228] sm:$0xf0] }
  0x41   :  { %v3932_v24 = vld [vmem:[%s7920_s1 + $0x1d0] sm:$0xf]  ;;  %8251 = vst [vmem:[#allocation62_spill] sm:$0xff] %v5292_v1  ;;  %v4364_v13 = vld [vmem:[%s7920_s1 + $0x1d4] sm:$0xf]  ;;  %v5305_v54 = vor.u32 %v4375_v31, %v3956_v37  ;;  %v5316_v11 = vor.u32 %v4371_v4, %v3958_v22  ;;  %853 = vmatpush.bf16.msrb.mxu0 %v5292_v1  ;;  %879 = vmatpush.bf16.msrb.mxu2 %v5307_v53 }
  0x42   :  { %v4368_v26 = vld [vmem:[%s7920_s1 + $0x1ec] sm:$0xf0]  ;;  %v3934_v15 = vld [vmem:[%s7920_s1 + $0x1f0] sm:$0xf0]  ;;  %8253 = vst [vmem:[#allocation64_spill] sm:$0xff] %v5307_v53 }
  0x43   :  { %v4188_v32 = vld [vmem:[%s7920_s1 + $0x3d0] sm:$0xf]  ;;  %8252 = vst [vmem:[#allocation63_spill] sm:$0xff] %v5305_v54  ;;  %v4428_v10 = vld [vmem:[%s7920_s1 + $0x3d4] sm:$0xf]  ;;  %v5318_v42 = vor.u32 %v4368_v26, %v3932_v24  ;;  %v5322_v37 = vor.u32 %v4364_v13, %v3934_v15  ;;  %866 = vmatpush.bf16.msrb.mxu1 %v5305_v54  ;;  %892 = vmatpush.bf16.msrb.mxu3 %v5316_v11 }
  0x44   :  { %v4432_v48 = vld [vmem:[%s7920_s1 + $0x3ec] sm:$0xf0]  ;;  %v4190_v36 = vld [vmem:[%s7920_s1 + $0x3f0] sm:$0xf0]  ;;  %8254 = vst [vmem:[#allocation65_spill] sm:$0xff] %v5316_v11 }
  0x45   :  { %8255 = vst [vmem:[#allocation66_spill] sm:$0xff] %v5318_v42  ;;  %v5320_v63 = vor.u32 %v4432_v48, %v4188_v32  ;;  %v3900_v39 = vld [vmem:[%s7920_s1 + $0x190] sm:$0xf]  ;;  %v5334_v4 = vor.u32 %v4428_v10, %v4190_v36  ;;  %v4356_v15 = vld [vmem:[%s7920_s1 + $0x194] sm:$0xf]  ;;  %898 = vmatpush.bf16.msra.mxu0 %v5318_v42  ;;  %924 = vmatpush.bf16.msra.mxu2 %v5322_v37 }
  0x46   :  { %8257 = vst [vmem:[#allocation68_spill] sm:$0xff] %v5322_v37  ;;  %v4360_v31 = vld [vmem:[%s7920_s1 + $0x1ac] sm:$0xf0]  ;;  %v3902_v48 = vld [vmem:[%s7920_s1 + $0x1b0] sm:$0xf0] }
  0x47   :  { %8256 = vst [vmem:[#allocation67_spill] sm:$0xff] %v5320_v63  ;;  %v4156_v0 = vld [vmem:[%s7920_s1 + $0x390] sm:$0xf]  ;;  %v4420_v36 = vld [vmem:[%s7920_s1 + $0x394] sm:$0xf]  ;;  %v5355_v24 = vor.u32 %v4360_v31, %v3900_v39  ;;  %911 = vmatpush.bf16.msra.mxu1 %v5320_v63  ;;  %v5361_v32 = vor.u32 %v4356_v15, %v3902_v48  ;;  %937 = vmatpush.bf16.msra.mxu3 %v5334_v4  ;;  %v8263_v48 = vmov 0  }
  0x48   :  { %8258 = vst [vmem:[#allocation69_spill] sm:$0xff] %v5334_v4  ;;  %v4424_v13 = vld [vmem:[%s7920_s1 + $0x3ac] sm:$0xf0]  ;;  %v4158_v22 = vld [vmem:[%s7920_s1 + $0x3b0] sm:$0xf0]  ;;  %854 = vmatmul.bf16.vlgmr.msrb.gmra.mxu0 %v8263_v48  ;;  %867 = vmatmul.bf16.vlgmr.msrb.gmra.mxu1 %v8263_v48 }
  0x49   :  { %8259 = vst [vmem:[#allocation70_spill] sm:$0xff] %v5355_v24  ;;  %v5359_v26 = vor.u32 %v4424_v13, %v4156_v0  ;;  %v3868_v10 = vld [vmem:[%s7920_s1 + $0x150] sm:$0xf]  ;;  %v5373_v31 = vor.u32 %v4420_v36, %v4158_v22  ;;  %v4348_v13 = vld [vmem:[%s7920_s1 + $0x154] sm:$0xf]  ;;  %880 = vmatmul.bf16.vlgmr.msrb.gmra.mxu2 %v8263_v48  ;;  %899 = vmatpush.bf16.msra.mxu0 %v5355_v24 }
  0x4a   :  { %8261 = vst [vmem:[#allocation72_spill] sm:$0xff] %v5361_v32  ;;  %v4352_v11 = vld [vmem:[%s7920_s1 + $0x16c] sm:$0xf0]  ;;  %v3870_v15 = vld [vmem:[%s7920_s1 + $0x170] sm:$0xf0]  ;;  %893 = vmatmul.bf16.vlgmr.msrb.gmra.mxu3 %v8263_v48  ;;  %925 = vmatpush.bf16.msra.mxu2 %v5361_v32 }
  0x4b   :  { %8260 = vst [vmem:[#allocation71_spill] sm:$0xff] %v5359_v26  ;;  %v4124_v39 = vld [vmem:[%s7920_s1 + $0x350] sm:$0xf]  ;;  %v4412_v4 = vld [vmem:[%s7920_s1 + $0x354] sm:$0xf]  ;;  %v5394_v22 = vor.u32 %v4352_v11, %v3868_v10  ;;  %912 = vmatpush.bf16.msra.mxu1 %v5359_v26  ;;  %v5401_v37 = vor.u32 %v4348_v13, %v3870_v15  ;;  %938 = vmatpush.bf16.msra.mxu3 %v5373_v31 }
  0x4c   :  { %8262 = vst [vmem:[#allocation73_spill] sm:$0xff] %v5373_v31  ;;  %v4416_v0 = vld [vmem:[%s7920_s1 + $0x36c] sm:$0xf0]  ;;  %v4126_v36 = vld [vmem:[%s7920_s1 + $0x370] sm:$0xf0] }
  0x4d   :  { %8264 = vst [vmem:[#allocation74_spill] sm:$0xff] %v5394_v22  ;;  %v5399_v63 = vor.u32 %v4416_v0, %v4124_v39  ;;  %v3836_v42 = vld [vmem:[%s7920_s1 + $0x110] sm:$0xf]  ;;  %v5413_v10 = vor.u32 %v4412_v4, %v4126_v36  ;;  %v4340_v0 = vld [vmem:[%s7920_s1 + $0x114] sm:$0xf]  ;;  %900 = vmatpush.bf16.msra.mxu0 %v5394_v22 }
  0x4e   :  { %8266 = vst [vmem:[#allocation76_spill] sm:$0xff] %v5401_v37  ;;  %v4344_v24 = vld [vmem:[%s7920_s1 + $0x12c] sm:$0xf0]  ;;  %v3838_v13 = vld [vmem:[%s7920_s1 + $0x130] sm:$0xf0]  ;;  %926 = vmatpush.bf16.msra.mxu2 %v5401_v37 }
  0x4f   :  { %8265 = vst [vmem:[#allocation75_spill] sm:$0xff] %v5399_v63  ;;  %v4092_v11 = vld [vmem:[%s7920_s1 + $0x310] sm:$0xf]  ;;  %v4404_v15 = vld [vmem:[%s7920_s1 + $0x314] sm:$0xf]  ;;  %v5431_v36 = vor.u32 %v4344_v24, %v3836_v42  ;;  %913 = vmatpush.bf16.msra.mxu1 %v5399_v63  ;;  %v5437_v26 = vor.u32 %v4340_v0, %v3838_v13  ;;  %939 = vmatpush.bf16.msra.mxu3 %v5413_v10 }
  0x50   :  { %8267 = vst [vmem:[#allocation77_spill] sm:$0xff] %v5413_v10  ;;  %v4408_v39 = vld [vmem:[%s7920_s1 + $0x32c] sm:$0xf0]  ;;  %v4094_v4 = vld [vmem:[%s7920_s1 + $0x330] sm:$0xf0] }
  0x51   :  { %8268 = vst [vmem:[#allocation78_spill] sm:$0xff] %v5431_v36  ;;  %v5435_v31 = vor.u32 %v4408_v39, %v4092_v11  ;;  %v3804_v32 = vld [vmem:[%s7920_s1 + $0xd0] sm:$0xf]  ;;  %v5449_v24 = vor.u32 %v4404_v15, %v4094_v4  ;;  %v4332_v39 = vld [vmem:[%s7920_s1 + $0xd4] sm:$0xf]  ;;  %901 = vmatpush.bf16.msra.mxu0 %v5431_v36 }
  0x52   :  { %8270 = vst [vmem:[#allocation80_spill] sm:$0xff] %v5437_v26  ;;  %v4336_v54 = vld [vmem:[%s7920_s1 + $0xec] sm:$0xf0]  ;;  %v3806_v0 = vld [vmem:[%s7920_s1 + $0xf0] sm:$0xf0]  ;;  %927 = vmatpush.bf16.msra.mxu2 %v5437_v26 }
  0x53   :  { %8269 = vst [vmem:[#allocation79_spill] sm:$0xff] %v5435_v31  ;;  %v4060_v42 = vld [vmem:[%s7920_s1 + $0x2d0] sm:$0xf]  ;;  %v4396_v13 = vld [vmem:[%s7920_s1 + $0x2d4] sm:$0xf]  ;;  %v5467_v4 = vor.u32 %v4336_v54, %v3804_v32  ;;  %914 = vmatpush.bf16.msra.mxu1 %v5435_v31  ;;  %v5473_v63 = vor.u32 %v4332_v39, %v3806_v0  ;;  %940 = vmatpush.bf16.msra.mxu3 %v5449_v24 }
  0x54   :  { %8271 = vst [vmem:[#allocation81_spill] sm:$0xff] %v5449_v24  ;;  %v4400_v11 = vld [vmem:[%s7920_s1 + $0x2ec] sm:$0xf0]  ;;  %v4062_v15 = vld [vmem:[%s7920_s1 + $0x2f0] sm:$0xf0] }
  0x55   :  { %8272 = vst [vmem:[#allocation82_spill] sm:$0xff] %v5467_v4  ;;  %v5471_v10 = vor.u32 %v4400_v11, %v4060_v42  ;;  %v3772_v37 = vld [vmem:[%s7920_s1 + $0x90] sm:$0xf]  ;;  %v5485_v32 = vor.u32 %v4396_v13, %v4062_v15  ;;  %v4324_v11 = vld [vmem:[%s7920_s1 + $0x94] sm:$0xf]  ;;  %902 = vmatpush.bf16.msra.mxu0 %v5467_v4 }
  0x56   :  { %8274 = vst [vmem:[#allocation84_spill] sm:$0xff] %v5473_v63  ;;  %v4328_v22 = vld [vmem:[%s7920_s1 + $0xac] sm:$0xf0]  ;;  %v3774_v39 = vld [vmem:[%s7920_s1 + $0xb0] sm:$0xf0]  ;;  %928 = vmatpush.bf16.msra.mxu2 %v5473_v63 }
  0x57   :  { %8273 = vst [vmem:[#allocation83_spill] sm:$0xff] %v5471_v10  ;;  %v4028_v54 = vld [vmem:[%s7920_s1 + $0x290] sm:$0xf]  ;;  %v4388_v0 = vld [vmem:[%s7920_s1 + $0x294] sm:$0xf]  ;;  %v5503_v15 = vor.u32 %v4328_v22, %v3772_v37  ;;  %915 = vmatpush.bf16.msra.mxu1 %v5471_v10  ;;  %v5509_v31 = vor.u32 %v4324_v11, %v3774_v39  ;;  %941 = vmatpush.bf16.msra.mxu3 %v5485_v32 }
  0x58   :  { %8275 = vst [vmem:[#allocation85_spill] sm:$0xff] %v5485_v32  ;;  %v4392_v42 = vld [vmem:[%s7920_s1 + $0x2ac] sm:$0xf0]  ;;  %v4030_v13 = vld [vmem:[%s7920_s1 + $0x2b0] sm:$0xf0] }
  0x59   :  { %8276 = vst [vmem:[#allocation86_spill] sm:$0xff] %v5503_v15  ;;  %v5507_v24 = vor.u32 %v4392_v42, %v4028_v54  ;;  %v3740_v26 = vld [vmem:[%s7920_s1 + $0x50] sm:$0xf]  ;;  %v5521_v22 = vor.u32 %v4388_v0, %v4030_v13  ;;  %v4316_v42 = vld [vmem:[%s7920_s1 + $0x54] sm:$0xf]  ;;  %903 = vmatpush.bf16.msra.mxu0 %v5503_v15 }
  0x5a   :  { %8278 = vst [vmem:[#allocation88_spill] sm:$0xff] %v5509_v31  ;;  %v4320_v36 = vld [vmem:[%s7920_s1 + $0x6c] sm:$0xf0]  ;;  %v3742_v11 = vld [vmem:[%s7920_s1 + $0x70] sm:$0xf0]  ;;  %929 = vmatpush.bf16.msra.mxu2 %v5509_v31 }
  0x5b   :  { %8277 = vst [vmem:[#allocation87_spill] sm:$0xff] %v5507_v24  ;;  %v3996_v37 = vld [vmem:[%s7920_s1 + $0x250] sm:$0xf]  ;;  %v4380_v39 = vld [vmem:[%s7920_s1 + $0x254] sm:$0xf]  ;;  %v5539_v13 = vor.u32 %v4320_v36, %v3740_v26  ;;  %916 = vmatpush.bf16.msra.mxu1 %v5507_v24  ;;  %v5551_v4 = vor.u32 %v4316_v42, %v3742_v11  ;;  %942 = vmatpush.bf16.msra.mxu3 %v5521_v22 }
  0x5c   :  { %8279 = vst [vmem:[#allocation89_spill] sm:$0xff] %v5521_v22  ;;  %v4384_v54 = vld [vmem:[%s7920_s1 + $0x26c] sm:$0xf0]  ;;  %v3998_v0 = vld [vmem:[%s7920_s1 + $0x270] sm:$0xf0] }
  0x5d   :  { %8280 = vst [vmem:[#allocation90_spill] sm:$0xff] %v5539_v13  ;;  %v3708_v32 = vld [vmem:[%s7920_s1 + $0x10] sm:$0xf]  ;;  %v5549_v63 = vor.u32 %v4384_v54, %v3996_v37  ;;  %v4308_v15 = vld [vmem:[%s7920_s1 + $0x14] sm:$0xf]  ;;  %v5563_v24 = vor.u32 %v4380_v39, %v3998_v0  ;;  %904 = vmatpush.bf16.msra.mxu0 %v5539_v13 }
  0x5e   :  { %v4312_v10 = vld [vmem:[%s7920_s1 + $0x2c] sm:$0xf0]  ;;  %8282 = vst [vmem:[#allocation92_spill] sm:$0xff] %v5551_v4  ;;  %v3710_v37 = vld [vmem:[%s7920_s1 + $0x30] sm:$0xf0]  ;;  %930 = vmatpush.bf16.msra.mxu2 %v5551_v4 }
  0x5f   :  { %8281 = vst [vmem:[#allocation91_spill] sm:$0xff] %v5549_v63  ;;  %v3964_v26 = vld [vmem:[%s7920_s1 + $0x210] sm:$0xf]  ;;  %v4372_v54 = vld [vmem:[%s7920_s1 + $0x214] sm:$0xf]  ;;  %v5584_v22 = vor.u32 %v4312_v10, %v3708_v32  ;;  %917 = vmatpush.bf16.msra.mxu1 %v5549_v63  ;;  %v5599_v10 = vor.u32 %v4308_v15, %v3710_v37  ;;  %943 = vmatpush.bf16.msra.mxu3 %v5563_v24 }
  0x60   :  { %v4376_v36 = vld [vmem:[%s7920_s1 + $0x22c] sm:$0xf0]  ;;  %8283 = vst [vmem:[#allocation93_spill] sm:$0xff] %v5563_v24  ;;  %v3966_v42 = vld [vmem:[%s7920_s1 + $0x230] sm:$0xf0] }
  0x61   :  { %v3940_v11 = vld [vmem:[%s7920_s1 + $0x1d8] sm:$0xf]  ;;  %8284 = vst [vmem:[#allocation94_spill] sm:$0xff] %v5584_v22  ;;  %v4365_v53 = vld [vmem:[%s7920_s1 + $0x1dc] sm:$0xf]  ;;  %v5597_v1 = vor.u32 %v4376_v36, %v3964_v26  ;;  %v5608_v49 = vor.u32 %v4372_v54, %v3966_v42  ;;  %905 = vmatpush.bf16.msra.mxu0 %v5584_v22 }
  0x62   :  { %v4369_v39 = vld [vmem:[%s7920_s1 + $0x1f4] sm:$0xf0]  ;;  %v3942_v40 = vld [vmem:[%s7920_s1 + $0x1f8] sm:$0xf0]  ;;  %8286 = vst [vmem:[#allocation96_spill] sm:$0xff] %v5599_v10  ;;  %931 = vmatpush.bf16.msra.mxu2 %v5599_v10 }
  0x63   :  { %v4196_v0 = vld [vmem:[%s7920_s1 + $0x3d8] sm:$0xf]  ;;  %8285 = vst [vmem:[#allocation95_spill] sm:$0xff] %v5597_v1  ;;  %v4429_v32 = vld [vmem:[%s7920_s1 + $0x3dc] sm:$0xf]  ;;  %v5610_v47 = vor.u32 %v4369_v39, %v3940_v11  ;;  %v5614_v26 = vor.u32 %v4365_v53, %v3942_v40  ;;  %918 = vmatpush.bf16.msra.mxu1 %v5597_v1  ;;  %944 = vmatpush.bf16.msra.mxu3 %v5608_v49 }
  0x64   :  { %v4433_v31 = vld [vmem:[%s7920_s1 + $0x3f4] sm:$0xf0]  ;;  %v4198_v13 = vld [vmem:[%s7920_s1 + $0x3f8] sm:$0xf0]  ;;  %8287 = vst [vmem:[#allocation97_spill] sm:$0xff] %v5608_v49  ;;  %906 = vmatmul.bf16.vlgmr.msra.gmra.mxu0 %v8263_v48 }
  0x65   :  { %8288 = vst [vmem:[#allocation98_spill] sm:$0xff] %v5610_v47  ;;  %v5612_v63 = vor.u32 %v4433_v31, %v4196_v0  ;;  %v3908_v15 = vld [vmem:[%s7920_s1 + $0x198] sm:$0xf]  ;;  %v5626_v54 = vor.u32 %v4429_v32, %v4198_v13  ;;  %v4357_v53 = vld [vmem:[%s7920_s1 + $0x19c] sm:$0xf]  ;;  %950 = vmatpush.bf16.msrb.mxu0 %v5610_v47  ;;  %932 = vmatmul.bf16.vlgmr.msra.gmra.mxu2 %v8263_v48 }
  0x66   :  { %8290 = vst [vmem:[#allocation100_spill] sm:$0xff] %v5614_v26  ;;  %v4361_v36 = vld [vmem:[%s7920_s1 + $0x1b4] sm:$0xf0]  ;;  %v3910_v31 = vld [vmem:[%s7920_s1 + $0x1b8] sm:$0xf0]  ;;  %976 = vmatpush.bf16.msrb.mxu2 %v5614_v26  ;;  %919 = vmatmul.bf16.vlgmr.msra.gmra.mxu1 %v8263_v48 }
  0x67   :  { %8289 = vst [vmem:[#allocation99_spill] sm:$0xff] %v5612_v63  ;;  %v4164_v37 = vld [vmem:[%s7920_s1 + $0x398] sm:$0xf]  ;;  %v4421_v13 = vld [vmem:[%s7920_s1 + $0x39c] sm:$0xf]  ;;  %v5647_v11 = vor.u32 %v4361_v36, %v3908_v15  ;;  %963 = vmatpush.bf16.msrb.mxu1 %v5612_v63  ;;  %v5653_v0 = vor.u32 %v4357_v53, %v3910_v31  ;;  %989 = vmatpush.bf16.msrb.mxu3 %v5626_v54 }
  0x68   :  { %8291 = vst [vmem:[#allocation101_spill] sm:$0xff] %v5626_v54  ;;  %v4425_v40 = vld [vmem:[%s7920_s1 + $0x3b4] sm:$0xf0]  ;;  %v4166_v42 = vld [vmem:[%s7920_s1 + $0x3b8] sm:$0xf0]  ;;  %945 = vmatmul.bf16.vlgmr.msra.gmra.mxu3 %v8263_v48 }
  0x69   :  { %8292 = vst [vmem:[#allocation102_spill] sm:$0xff] %v5647_v11  ;;  %v5651_v39 = vor.u32 %v4425_v40, %v4164_v37  ;;  %v3876_v32 = vld [vmem:[%s7920_s1 + $0x158] sm:$0xf]  ;;  %v5666_v36 = vor.u32 %v4421_v13, %v4166_v42  ;;  %v4349_v40 = vld [vmem:[%s7920_s1 + $0x15c] sm:$0xf]  ;;  %951 = vmatpush.bf16.msrb.mxu0 %v5647_v11 }
  0x6a   :  { %8294 = vst [vmem:[#allocation104_spill] sm:$0xff] %v5653_v0  ;;  %v4353_v49 = vld [vmem:[%s7920_s1 + $0x174] sm:$0xf0]  ;;  %v3878_v53 = vld [vmem:[%s7920_s1 + $0x178] sm:$0xf0]  ;;  %977 = vmatpush.bf16.msrb.mxu2 %v5653_v0 }
  0x6b   :  { %8293 = vst [vmem:[#allocation103_spill] sm:$0xff] %v5651_v39  ;;  %v4132_v15 = vld [vmem:[%s7920_s1 + $0x358] sm:$0xf]  ;;  %v4413_v31 = vld [vmem:[%s7920_s1 + $0x35c] sm:$0xf]  ;;  %v5687_v42 = vor.u32 %v4353_v49, %v3876_v32  ;;  %964 = vmatpush.bf16.msrb.mxu1 %v5651_v39  ;;  %v5693_v63 = vor.u32 %v4349_v40, %v3878_v53  ;;  %990 = vmatpush.bf16.msrb.mxu3 %v5666_v36 }
  0x6c   :  { %8295 = vst [vmem:[#allocation105_spill] sm:$0xff] %v5666_v36  ;;  %v4417_v37 = vld [vmem:[%s7920_s1 + $0x374] sm:$0xf0]  ;;  %v4134_v13 = vld [vmem:[%s7920_s1 + $0x378] sm:$0xf0] }
  0x6d   :  { %8296 = vst [vmem:[#allocation106_spill] sm:$0xff] %v5687_v42  ;;  %v5691_v54 = vor.u32 %v4417_v37, %v4132_v15  ;;  %v3844_v1 = vld [vmem:[%s7920_s1 + $0x118] sm:$0xf]  ;;  %v5705_v32 = vor.u32 %v4413_v31, %v4134_v13  ;;  %v4341_v37 = vld [vmem:[%s7920_s1 + $0x11c] sm:$0xf]  ;;  %952 = vmatpush.bf16.msrb.mxu0 %v5687_v42 }
  0x6e   :  { %8298 = vst [vmem:[#allocation108_spill] sm:$0xff] %v5693_v63  ;;  %v4345_v24 = vld [vmem:[%s7920_s1 + $0x134] sm:$0xf0]  ;;  %v3846_v40 = vld [vmem:[%s7920_s1 + $0x138] sm:$0xf0]  ;;  %978 = vmatpush.bf16.msrb.mxu2 %v5693_v63 }
  0x6f   :  { %8297 = vst [vmem:[#allocation107_spill] sm:$0xff] %v5691_v54  ;;  %v4100_v49 = vld [vmem:[%s7920_s1 + $0x318] sm:$0xf]  ;;  %v4405_v53 = vld [vmem:[%s7920_s1 + $0x31c] sm:$0xf]  ;;  %v5723_v13 = vor.u32 %v4345_v24, %v3844_v1  ;;  %965 = vmatpush.bf16.msrb.mxu1 %v5691_v54  ;;  %v5729_v39 = vor.u32 %v4341_v37, %v3846_v40  ;;  %991 = vmatpush.bf16.msrb.mxu3 %v5705_v32 }
  0x70   :  { %8299 = vst [vmem:[#allocation109_spill] sm:$0xff] %v5705_v32  ;;  %v4409_v15 = vld [vmem:[%s7920_s1 + $0x334] sm:$0xf0]  ;;  %v4102_v31 = vld [vmem:[%s7920_s1 + $0x338] sm:$0xf0] }
  0x71   :  { %8300 = vst [vmem:[#allocation110_spill] sm:$0xff] %v5723_v13  ;;  %v5727_v36 = vor.u32 %v4409_v15, %v4100_v49  ;;  %v3812_v0 = vld [vmem:[%s7920_s1 + $0xd8] sm:$0xf]  ;;  %v5741_v24 = vor.u32 %v4405_v53, %v4102_v31  ;;  %v4333_v15 = vld [vmem:[%s7920_s1 + $0xdc] sm:$0xf]  ;;  %953 = vmatpush.bf16.msrb.mxu0 %v5723_v13 }
  0x72   :  { %8302 = vst [vmem:[#allocation112_spill] sm:$0xff] %v5729_v39  ;;  %v4337_v11 = vld [vmem:[%s7920_s1 + $0xf4] sm:$0xf0]  ;;  %v3814_v37 = vld [vmem:[%s7920_s1 + $0xf8] sm:$0xf0]  ;;  %979 = vmatpush.bf16.msrb.mxu2 %v5729_v39 }
  0x73   :  { %8301 = vst [vmem:[#allocation111_spill] sm:$0xff] %v5727_v36  ;;  %v4068_v1 = vld [vmem:[%s7920_s1 + $0x2d8] sm:$0xf]  ;;  %v4397_v40 = vld [vmem:[%s7920_s1 + $0x2dc] sm:$0xf]  ;;  %v5759_v31 = vor.u32 %v4337_v11, %v3812_v0  ;;  %966 = vmatpush.bf16.msrb.mxu1 %v5727_v36  ;;  %v5765_v54 = vor.u32 %v4333_v15, %v3814_v37  ;;  %992 = vmatpush.bf16.msrb.mxu3 %v5741_v24 }
  0x74   :  { %8303 = vst [vmem:[#allocation113_spill] sm:$0xff] %v5741_v24  ;;  %v4401_v49 = vld [vmem:[%s7920_s1 + $0x2f4] sm:$0xf0]  ;;  %v4070_v53 = vld [vmem:[%s7920_s1 + $0x2f8] sm:$0xf0] }
  0x75   :  { %8304 = vst [vmem:[#allocation114_spill] sm:$0xff] %v5759_v31  ;;  %v5763_v32 = vor.u32 %v4401_v49, %v4068_v1  ;;  %v3780_v63 = vld [vmem:[%s7920_s1 + $0x98] sm:$0xf]  ;;  %v5777_v0 = vor.u32 %v4397_v40, %v4070_v53  ;;  %v4325_v49 = vld [vmem:[%s7920_s1 + $0x9c] sm:$0xf]  ;;  %954 = vmatpush.bf16.msrb.mxu0 %v5759_v31 }
  0x76   :  { %8306 = vst [vmem:[#allocation116_spill] sm:$0xff] %v5765_v54  ;;  %v4329_v42 = vld [vmem:[%s7920_s1 + $0xb4] sm:$0xf0]  ;;  %v3782_v15 = vld [vmem:[%s7920_s1 + $0xb8] sm:$0xf0]  ;;  %980 = vmatpush.bf16.msrb.mxu2 %v5765_v54 }
  0x77   :  { %8305 = vst [vmem:[#allocation115_spill] sm:$0xff] %v5763_v32  ;;  %v4036_v11 = vld [vmem:[%s7920_s1 + $0x298] sm:$0xf]  ;;  %v4389_v37 = vld [vmem:[%s7920_s1 + $0x29c] sm:$0xf]  ;;  %v5795_v53 = vor.u32 %v4329_v42, %v3780_v63  ;;  %967 = vmatpush.bf16.msrb.mxu1 %v5763_v32  ;;  %v5801_v36 = vor.u32 %v4325_v49, %v3782_v15  ;;  %993 = vmatpush.bf16.msrb.mxu3 %v5777_v0 }
  0x78   :  { %8307 = vst [vmem:[#allocation117_spill] sm:$0xff] %v5777_v0  ;;  %v4393_v1 = vld [vmem:[%s7920_s1 + $0x2b4] sm:$0xf0]  ;;  %v4038_v40 = vld [vmem:[%s7920_s1 + $0x2b8] sm:$0xf0] }
  0x79   :  { %8308 = vst [vmem:[#allocation118_spill] sm:$0xff] %v5795_v53  ;;  %v5799_v24 = vor.u32 %v4393_v1, %v4036_v11  ;;  %v3748_v39 = vld [vmem:[%s7920_s1 + $0x58] sm:$0xf]  ;;  %v5813_v42 = vor.u32 %v4389_v37, %v4038_v40  ;;  %v4317_v1 = vld [vmem:[%s7920_s1 + $0x5c] sm:$0xf]  ;;  %955 = vmatpush.bf16.msrb.mxu0 %v5795_v53 }
  0x7a   :  { %8310 = vst [vmem:[#allocation120_spill] sm:$0xff] %v5801_v36  ;;  %v4321_v13 = vld [vmem:[%s7920_s1 + $0x74] sm:$0xf0]  ;;  %v3750_v49 = vld [vmem:[%s7920_s1 + $0x78] sm:$0xf0]  ;;  %981 = vmatpush.bf16.msrb.mxu2 %v5801_v36 }
  0x7b   :  { %8309 = vst [vmem:[#allocation119_spill] sm:$0xff] %v5799_v24  ;;  %v4004_v63 = vld [vmem:[%s7920_s1 + $0x258] sm:$0xf]  ;;  %v4381_v15 = vld [vmem:[%s7920_s1 + $0x25c] sm:$0xf]  ;;  %v5831_v40 = vor.u32 %v4321_v13, %v3748_v39  ;;  %968 = vmatpush.bf16.msrb.mxu1 %v5799_v24  ;;  %v5837_v32 = vor.u32 %v4317_v1, %v3750_v49  ;;  %994 = vmatpush.bf16.msrb.mxu3 %v5813_v42 }
  0x7c   :  { %8311 = vst [vmem:[#allocation121_spill] sm:$0xff] %v5813_v42  ;;  %v4385_v11 = vld [vmem:[%s7920_s1 + $0x274] sm:$0xf0]  ;;  %v4006_v37 = vld [vmem:[%s7920_s1 + $0x278] sm:$0xf0] }
  0x7d   :  { %8312 = vst [vmem:[#allocation122_spill] sm:$0xff] %v5831_v40  ;;  %v5835_v0 = vor.u32 %v4385_v11, %v4004_v63  ;;  %v3716_v54 = vld [vmem:[%s7920_s1 + $0x18] sm:$0xf]  ;;  %v5849_v13 = vor.u32 %v4381_v15, %v4006_v37  ;;  %v4309_v11 = vld [vmem:[%s7920_s1 + $0x1c] sm:$0xf]  ;;  %956 = vmatpush.bf16.msrb.mxu0 %v5831_v40 }
  0x7e   :  { %8314 = vst [vmem:[#allocation124_spill] sm:$0xff] %v5837_v32  ;;  %v4313_v31 = vld [vmem:[%s7920_s1 + $0x34] sm:$0xf0]  ;;  %v3718_v1 = vld [vmem:[%s7920_s1 + $0x38] sm:$0xf0]  ;;  %982 = vmatpush.bf16.msrb.mxu2 %v5837_v32 }
  0x7f   :  { %8313 = vst [vmem:[#allocation123_spill] sm:$0xff] %v5835_v0  ;;  %v3972_v39 = vld [vmem:[%s7920_s1 + $0x218] sm:$0xf]  ;;  %v4373_v49 = vld [vmem:[%s7920_s1 + $0x21c] sm:$0xf]  ;;  %v5867_v37 = vor.u32 %v4313_v31, %v3716_v54  ;;  %969 = vmatpush.bf16.msrb.mxu1 %v5835_v0  ;;  %v5873_v24 = vor.u32 %v4309_v11, %v3718_v1  ;;  %995 = vmatpush.bf16.msrb.mxu3 %v5849_v13  ;;  %v8320_v54 = vld [vmem:[#allocation44_spill] sm:$0xff] }
  0x80   :  { %8315 = vst [vmem:[#allocation125_spill] sm:$0xff] %v5849_v13  ;;  %v4377_v63 = vld [vmem:[%s7920_s1 + $0x234] sm:$0xf0]  ;;  %v3974_v15 = vld [vmem:[%s7920_s1 + $0x238] sm:$0xf0]  ;;  %v8322_v11 = vld [vmem:[#allocation46_spill] sm:$0xff] }
  0x81   :  { %8316 = vst [vmem:[#allocation126_spill] sm:$0xff] %v5867_v37  ;;  %v5871_v42 = vor.u32 %v4377_v63, %v3972_v39  ;;  %v5876_v36 = vor.u32 %v4373_v49, %v3974_v15  ;;  %957 = vmatpush.bf16.msrb.mxu0 %v5867_v37  ;;  %v8321_v63 = vld [vmem:[#allocation43_spill] sm:$0xff]  ;;  %v8323_v1 = vld [vmem:[#allocation45_spill] sm:$0xff]  ;;  %v8324_v49 = vld [vmem:[#allocation48_spill] sm:$0xff] }
  0x82   :  { %8318 = vst [vmem:[#allocation128_spill] sm:$0xff] %v5873_v24  ;;  %983 = vmatpush.bf16.msrb.mxu2 %v5873_v24 }
  0x83   :  { %8317 = vst [vmem:[#allocation127_spill] sm:$0xff] %v5871_v42  ;;  %970 = vmatpush.bf16.msrb.mxu1 %v5871_v42  ;;  %996 = vmatpush.bf16.msrb.mxu3 %v5876_v36 }
  0x84   :  { %8319 = vst [vmem:[#allocation129_spill] sm:$0xff] %v5876_v36  ;;  %958 = vmatmul.bf16.vlgmr.msrb.gmra.mxu0 %v8263_v48 }
  0x85   :  { %1147 = vmatpush.bf16.msra.mxu0 %v4727_v3  ;;  %984 = vmatmul.bf16.vlgmr.msrb.gmra.mxu2 %v8263_v48 }
  0x86   :  { %1173 = vmatpush.bf16.msra.mxu2 %v4740_v8  ;;  %971 = vmatmul.bf16.vlgmr.msrb.gmra.mxu1 %v8263_v48 }
  0x87   :  { %997 = vmatmul.bf16.vlgmr.msrb.gmra.mxu3 %v8263_v48  ;;  %1160 = vmatpush.bf16.msra.mxu1 %v4738_v7 }
  0x88   :  { %1186 = vmatpush.bf16.msra.mxu3 %v4752_v12 }
  0x89   :  { %1148 = vmatpush.bf16.msra.mxu0 %v4765_v16 }
  0x8a   :  { %1174 = vmatpush.bf16.msra.mxu2 %v4779_v21 }
  0x8b   :  { %1161 = vmatpush.bf16.msra.mxu1 %v4767_v17 }
  0x8c   :  { %1187 = vmatpush.bf16.msra.mxu3 %v4790_v25 }
  0x8d   :  { %1149 = vmatpush.bf16.msra.mxu0 %v4802_v29 }
  0x8e   :  { %1175 = vmatpush.bf16.msra.mxu2 %v4817_v34 }
  0x8f   :  { %1162 = vmatpush.bf16.msra.mxu1 %v4815_v33 }
  0x90   :  { %1188 = vmatpush.bf16.msra.mxu3 %v4829_v38 }
  0x91   :  { %1150 = vmatpush.bf16.msra.mxu0 %v4847_v44 }
  0x92   :  { %1176 = vmatpush.bf16.msra.mxu2 %v4853_v46 }
  0x93   :  { %1163 = vmatpush.bf16.msra.mxu1 %v4851_v45 }
  0x94   :  { %1189 = vmatpush.bf16.msra.mxu3 %v4865_v50 }
  0x95   :  { %1151 = vmatpush.bf16.msra.mxu0 %v4883_v56 }
  0x96   :  { %1177 = vmatpush.bf16.msra.mxu2 %v4889_v58 }
  0x97   :  { %1164 = vmatpush.bf16.msra.mxu1 %v4887_v57 }
  0x98   :  { %1190 = vmatpush.bf16.msra.mxu3 %v4901_v62 }
  0x99   :  { %1152 = vmatpush.bf16.msra.mxu0 %v4919_v5 }
  0x9a   :  { %1178 = vmatpush.bf16.msra.mxu2 %v4925_v9 }
  0x9b   :  { %1165 = vmatpush.bf16.msra.mxu1 %v4923_v6 }
  0x9c   :  { %1191 = vmatpush.bf16.msra.mxu3 %v4937_v14 }
  0x9d   :  { %1153 = vmatpush.bf16.msra.mxu0 %v4955_v23  ;;  %v151_v23 = vld [vmem:[%s7921_s0 + $0x28] sm:$0xff] }
  0x9e   :  { %1179 = vmatpush.bf16.msra.mxu2 %v4967_v28 }
  0x9f   :  { %1166 = vmatpush.bf16.msra.mxu1 %v4965_v27 }
  0xa0   :  { %1192 = vmatpush.bf16.msra.mxu3 %v4979_v35 }
  0xa1   :  { %1154 = vmatpush.bf16.msra.mxu0 %v5000_v43  ;;  %v803_v48 = vpop.f32.mrf.mxu0 }
  0xa2   :  { %1180 = vmatpush.bf16.msra.mxu2 %v5015_v52 }
  0xa3   :  { %1167 = vmatpush.bf16.msra.mxu1 %v5013_v51  ;;  %v816_v31 = vpop.f32.mrf.mxu1 }
  0xa4   :  { %1193 = vmatpush.bf16.msra.mxu3 %v5024_v55  ;;  %v817_v39 = vadd.f32 %v816_v31, %v803_v48  ;;  %v8328_v55 = vld [vmem:[#allocation52_spill] sm:$0xff]  ;;  %v8329_v31 = vld [vmem:[#allocation51_spill] sm:$0xff] }
  0xa5   :  { %1199 = vmatpush.bf16.msrb.mxu0 %v5026_v59 }
  0xa6   :  { %1225 = vmatpush.bf16.msrb.mxu2 %v5030_v61 }
  0xa7   :  { %1212 = vmatpush.bf16.msrb.mxu1 %v5028_v60  ;;  %v829_v15 = vpop.f32.mrf.mxu2  ;;  %v8326_v60 = vld [vmem:[#allocation50_spill] sm:$0xff] }
  0xa8   :  { %1238 = vmatpush.bf16.msrb.mxu3 %v5042_v2 }
  0xa9   :  { %1200 = vmatpush.bf16.msrb.mxu0 %v5063_v18  ;;  %v842_v2 = vpop.f32.mrf.mxu3 }
  0xaa   :  { %1226 = vmatpush.bf16.msrb.mxu2 %v5069_v20 }
  0xab   :  { %1213 = vmatpush.bf16.msrb.mxu1 %v5067_v19  ;;  %v8325_v19 = vld [vmem:[#allocation47_spill] sm:$0xff]  ;;  %v818_v48 = vpop.f32.mrf.mxu1 }
  0xac   :  { %1239 = vmatpush.bf16.msrb.mxu3 %v5081_v30  ;;  %v8327_v30 = vld [vmem:[#allocation49_spill] sm:$0xff]  ;;  %v8338_v48 = vld [vmem:[#allocation62_spill] sm:$0xff] }
  0xad   :  { %1201 = vmatpush.bf16.msrb.mxu0 %v5102_v41  ;;  %v843_v41 = vadd.f32 %v842_v2, %v829_v15  ;;  %v8334_v2 = vld [vmem:[#allocation58_spill] sm:$0xff]  ;;  %v8335_v15 = vld [vmem:[#allocation57_spill] sm:$0xff] }
  0xae   :  { %1227 = vmatpush.bf16.msrb.mxu2 %v8320_v54  ;;  %v805_v54 = vpop.f32.mrf.mxu0 }
  0xaf   :  { %1214 = vmatpush.bf16.msrb.mxu1 %v8321_v63  ;;  %v8330_v63 = vld [vmem:[#allocation54_spill] sm:$0xff]  ;;  %v8336_v54 = vld [vmem:[#allocation60_spill] sm:$0xff] }
  0xb0   :  { %1240 = vmatpush.bf16.msrb.mxu3 %v8323_v1  ;;  %v8331_v1 = vld [vmem:[#allocation53_spill] sm:$0xff] }
  0xb1   :  { %1202 = vmatpush.bf16.msrb.mxu0 %v8322_v11  ;;  %v831_v11 = vpop.f32.mrf.mxu2  ;;  %v844_v51 = vpop.f32.mrf.mxu3 }
  0xb2   :  { %1228 = vmatpush.bf16.msrb.mxu2 %v8324_v49  ;;  %v8332_v49 = vld [vmem:[#allocation56_spill] sm:$0xff]  ;;  %v8342_v11 = vld [vmem:[#allocation65_spill] sm:$0xff] }
  0xb3   :  { %1215 = vmatpush.bf16.msrb.mxu1 %v8325_v19  ;;  %v8333_v19 = vld [vmem:[#allocation55_spill] sm:$0xff] }
  0xb4   :  { %1241 = vmatpush.bf16.msrb.mxu3 %v8327_v30  ;;  %v8337_v30 = vld [vmem:[#allocation59_spill] sm:$0xff] }
  0xb5   :  { %1203 = vmatpush.bf16.msrb.mxu0 %v8326_v60 }
  0xb6   :  { %1229 = vmatpush.bf16.msrb.mxu2 %v8328_v55 }
  0xb7   :  { %1216 = vmatpush.bf16.msrb.mxu1 %v8329_v31  ;;  %v8339_v31 = vld [vmem:[#allocation61_spill] sm:$0xff] }
  0xb8   :  { %1242 = vmatpush.bf16.msrb.mxu3 %v8331_v1  ;;  %v8341_v1 = vld [vmem:[#allocation63_spill] sm:$0xff] }
  0xb9   :  { %1204 = vmatpush.bf16.msrb.mxu0 %v8330_v63  ;;  %v8340_v63 = vld [vmem:[#allocation64_spill] sm:$0xff] }
  0xba   :  { %1230 = vmatpush.bf16.msrb.mxu2 %v8332_v49 }
  0xbb   :  { %1217 = vmatpush.bf16.msrb.mxu1 %v8333_v19 }
  0xbc   :  { %1243 = vmatpush.bf16.msrb.mxu3 %v8335_v15 }
  0xbd   :  { %1205 = vmatpush.bf16.msrb.mxu0 %v8334_v2 }
  0xbe   :  { %1231 = vmatpush.bf16.msrb.mxu2 %v8336_v54 }
  0xbf   :  { %1218 = vmatpush.bf16.msrb.mxu1 %v8337_v30  ;;  %v148_v30 = vld [vmem:[%s7921_s0 + $0x10] sm:$0xff] }
  0xc0   :  { %1244 = vmatpush.bf16.msrb.mxu3 %v8339_v31  ;;  %v146_v31 = vld [vmem:[%s7921_s0] sm:$0xff] }
  0xc1   :  { %1206 = vmatpush.bf16.msrb.mxu0 %v8338_v48 }
  0xc2   :  { %1232 = vmatpush.bf16.msrb.mxu2 %v8340_v63  ;;  %v1002_v63 = vadd.f32 %v817_v39, %v146_v31 }
  0xc3   :  { %1219 = vmatpush.bf16.msrb.mxu1 %v8341_v1 }
  0xc4   :  { %1245 = vmatpush.bf16.msrb.mxu3 %v8342_v11 }
  0xc5   :  { %v855_v51 = vpop.f32.mrf.mxu0  ;;  %v868_v19 = vpop.f32.mrf.mxu1 }
  0xc6   :  { %v869_v20 = vadd.f32 %v868_v19, %v855_v51  ;;  %v147_v19 = vld [vmem:[%s7921_s0 + $0x8] sm:$0xff] }
  0xc7   :  { %v1003_v18 = vadd.f32 %v843_v41, %v147_v19  ;;  %v152_v19 = vld [vmem:[%s7921_s0 + $0x30] sm:$0xff] }
  0xc8   :  { %v1004_v1 = vadd.f32 %v869_v20, %v148_v30 }
  0xca   :  { %v4204_v48 = vmul.f32 -1.442695, %v1004_v1  ;;  %v4203_v1 = vmul.f32 -1.442695, %v1003_v18 }
  0xcc   :  { %v881_v49 = vpop.f32.mrf.mxu2  ;;  %4436 = vpow2.f32 %v4204_v48 }
  0xcd   :  { %v894_v2 = vpop.f32.mrf.mxu3  ;;  %v857_v55 = vpop.f32.mrf.mxu0 }
  0xce   :  { %v870_v15 = vpop.f32.mrf.mxu1  ;;  %v895_v11 = vadd.f32 %v894_v2, %v881_v49  ;;  %v149_v55 = vld [vmem:[%s7921_s0 + $0x18] sm:$0xff] }
  0xd0   :  { %v1005_v51 = vadd.f32 %v895_v11, %v149_v55 }
  0xd2   :  { %v4205_v35 = vmul.f32 -1.442695, %v1005_v51  ;;  %v4437_v31 = vpop.eup %4436 }
  0xd3   :  { %v5962_v27 = vadd.f32 1.0, %v4437_v31 }
  0xd4   :  { %v883_v60 = vpop.f32.mrf.mxu2 }
  0xd5   :  { %v896_v54 = vpop.f32.mrf.mxu3  ;;  %vm1061_vm1 = vweird.f32 %v5962_v27 }
  0xd6   :  { %v4202_v54 = vmul.f32 -1.442695, %v1002_v63 }
  0xd8   :  { %4438 = vpow2.f32 %v4202_v54 }
  0xd9   :  { %4440 = vpow2.f32 %v4205_v35 }
  0xda   :  { %4442 = vpow2.f32 %v4203_v1 }
  0xdb   :  { %4444 = vrcp.f32 %v5962_v27 }
  0xde   :  { %v4439_v2 = vpop.eup %4438 }
  0xdf   :  { %v1016_v63 = vadd.f32 1.0, %v4439_v2  ;;  %v4441_v52 = vpop.eup %4440  ;;  %v150_v2 = vld [vmem:[%s7921_s0 + $0x20] sm:$0xff] }
  0xe0   :  { %v4443_v41 = vpop.eup %4442  ;;  %v5965_v48 = vadd.f32 1.0, %v4441_v52 }
  0xe1   :  { %v907_v15 = vpop.f32.mrf.mxu0  ;;  %4446 = vrcp.f32 %v1016_v63  ;;  %v5967_v11 = vadd.f32 1.0, %v4443_v41  ;;  %v5969_v18 = vpop.eup %4444  ;;  %v1029_v14 = vand.u32 2147483648, %v1016_v63  ;;  %vm1023_vm0 = vweird.f32 %v1016_v63 }
  0xe2   :  { %4448 = vrcp.f32 %v5965_v48  ;;  %vm1062_vm2 = vweird.f32 %v5969_v18  ;;  %vm1076_vm9 = vweird.f32 %v5965_v48 }
  0xe3   :  { %v920_v60 = vpop.f32.mrf.mxu1  ;;  %4450 = vrcp.f32 %v5967_v11  ;;  %vm6010_vm4 = vmor %vm1061_vm1, %vm1062_vm2  ;;  %vm1038_vm8 = vweird.f32 %v5967_v11 }
  0xe7   :  { %v5972_v35 = vpop.eup %4446 }
  0xe8   :  { %v933_v20 = vpop.f32.mrf.mxu2  ;;  %v5978_v54 = vpop.eup %4448  ;;  %vm1024_vm3 = vweird.f32 %v5972_v35 }
  0xe9   :  { %v909_v39 = vpop.f32.mrf.mxu0  ;;  %v1072_v41 = vmul.f32 %v5978_v54, %v5965_v48  ;;  %vm6017_vm5 = vmor %vm1023_vm0, %vm1024_vm3  ;;  %vm1077_vm11 = vweird.f32 %v5978_v54 }
  0xea   :  { %v921_v39 = vadd.f32 %v920_v60, %v907_v15  ;;  %vm6042_vm12 = vmor %vm1076_vm9, %vm1077_vm11 }
  0xeb   :  { %v946_v30 = vpop.f32.mrf.mxu3  ;;  %v922_v49 = vpop.f32.mrf.mxu1 }
  0xec   :  { %v5983_v49 = vpop.eup %4450  ;;  %v1006_v28 = vadd.f32 %v921_v39, %v150_v2 }
  0xed   :  { %v1034_v6 = vmul.f32 %v5983_v49, %v5967_v11  ;;  %vm1039_vm10 = vweird.f32 %v5983_v49 }
  0xee   :  { %vm1040_vm13 = vmor %vm1038_vm8, %vm1039_vm10 }
  0xf0   :  { %v935_v61 = vpop.f32.mrf.mxu2 }
  0xf1   :  { %v1019_v61 = vmul.f32 %v5972_v35, %v1016_v63 }
  0xf3   :  { %v948_v59 = vpop.f32.mrf.mxu3  ;;  %v1020_v31 = vsub.f32 1.0, %v1019_v61  ;;  %v1027_v61 = vand.u32 2147483647, %v1016_v63 }
  0xf4   :  { %v1057_v59 = vmul.f32 %v5969_v18, %v5962_v27 }
  0xf5   :  { %v1021_v60 = vmul.f32 %v5972_v35, %v1020_v31  ;;  %v1065_v31 = vand.u32 2147483647, %v5962_v27  ;;  %vm6021_vm6 = vcmp.eq.f32.partialorder %v1027_v61, 8.507059e+37 }
  0xf6   :  { %v1058_v52 = vsub.f32 1.0, %v1057_v59 }
  0xf7   :  { %vm1066_vm7 = vcmp.eq.f32.partialorder %v1065_v31, 8.507059e+37 }
  0xf8   :  { %v1059_v59 = vmul.f32 %v5969_v18, %v1058_v52  ;;  %v153_v52 = vld [vmem:[%s7921_s0 + $0x38] sm:$0xff] }
 0x101   :  { %v959_v55 = vpop.f32.mrf.mxu0 }
 0x103   :  { %v972_v51 = vpop.f32.mrf.mxu1 }
 0x104   :  { %v973_v1 = vadd.f32 %v972_v51, %v959_v55  ;;  %v1067_v51 = vand.u32 2147483648, %v5962_v27 }
 0x106   :  { %v1008_v43 = vadd.f32 %v973_v1, %v152_v19  ;;  %v1073_v19 = vsub.f32 1.0, %v1072_v41  ;;  %v947_v1 = vadd.f32 %v946_v30, %v933_v20  ;;  %v1035_v20 = vsub.f32 1.0, %v1034_v6 }
 0x107   :  { %v1068_v57 = vor.u32 1.1754944e-38, %v1067_v51 }
 0x108   :  { %v4206_v15 = vmul.f32 -1.442695, %v1008_v43  ;;  %v985_v55 = vpop.f32.mrf.mxu2  ;;  %v1060_v43 = vadd.f32 %v5969_v18, %v1059_v59  ;;  %v1022_v59 = vadd.f32 %v5972_v35, %v1021_v60  ;;  %v1074_v9 = vmul.f32 %v5978_v54, %v1073_v19 }
 0x109   :  { %v961_v2 = vpop.f32.mrf.mxu0  ;;  %v1007_v27 = vadd.f32 %v947_v1, %v151_v23  ;;  %v1036_v63 = vmul.f32 %v5983_v49, %v1035_v20  ;;  %v1082_v60 = vand.u32 2147483648, %v5965_v48 }
 0x10a   :  { %4452 = vpow2.f32 %v4206_v15  ;;  %v998_v39 = vpop.f32.mrf.mxu3  ;;  %v1030_v15 = vor.u32 1.1754944e-38, %v1029_v14  ;;  %v1026_v23 = vsel %vm6017_vm5, %v5972_v35, %v1022_v59  ;;  %v1075_v1 = vadd.f32 %v5978_v54, %v1074_v9 }
 0x10b   :  { %v999_v62 = vadd.f32 %v998_v39, %v985_v55  ;;  %v974_v41 = vpop.f32.mrf.mxu1  ;;  %4454 = vtanh.f32 %v1006_v28  ;;  %v1064_v28 = vsel %vm6010_vm4, %v5969_v18, %v1060_v43  ;;  %v1044_v43 = vand.u32 2147483648, %v5967_v11 }
 0x10c   :  { %v1069_v19 = vsel %vm1066_vm7, %v1068_v57, %v1064_v28  ;;  %v1031_v35 = vsel %vm6021_vm6, %v1030_v15, %v1026_v23  ;;  %v1037_v57 = vadd.f32 %v5983_v49, %v1036_v63  ;;  %v1042_v9 = vand.u32 2147483647, %v5967_v11 }
 0x10d   :  { %v1009_v2 = vadd.f32 %v999_v62, %v153_v52  ;;  %v1080_v52 = vand.u32 2147483647, %v5965_v48  ;;  %v1083_v41 = vor.u32 1.1754944e-38, %v1082_v60  ;;  %v1126_v20 = vmul.f32 0.0, %v1069_v19 }
 0x10e   :  { %v1079_v48 = vsel %vm6042_vm12, %v5978_v54, %v1075_v1  ;;  %v1041_v55 = vsel %vm1040_vm13, %v5983_v49, %v1037_v57  ;;  %vm1043_vm15 = vcmp.eq.f32.partialorder %v1042_v9, 8.507059e+37 }
 0x10f   :  { %v4207_v62 = vmul.f32 -1.442695, %v1009_v2  ;;  %vm1081_vm14 = vcmp.eq.f32.partialorder %v1080_v52, 8.507059e+37  ;;  %v1045_v2 = vor.u32 1.1754944e-38, %v1044_v43 }
 0x110   :  { %v4453_v14 = vpop.eup %4452  ;;  %v987_v61 = vpop.f32.mrf.mxu2 }
 0x111   :  { %v1094_v18 = vadd.f32 1.0, %v4453_v14  ;;  %4456 = vpow2.f32 %v4207_v62  ;;  %v4455_v51 = vpop.eup %4454  ;;  %v1084_v62 = vsel %vm1081_vm14, %v1083_v41, %v1079_v48  ;;  %v1046_v11 = vsel %vm1043_vm15, %v1045_v2, %v1041_v55  ;;  %v8352_v55 = vld [vmem:[#allocation68_spill] sm:$0xff] }
 0x112   :  { %4458 = vtanh.f32 %v1007_v27  ;;  %v1000_v39 = vpop.f32.mrf.mxu3  ;;  %v1128_v30 = vmul.f32 %v4455_v51, %v1031_v35  ;;  %v1127_v63 = vmul.f32 0.0, %v1084_v62 }
 0x113   :  { %4460 = vrcp.f32 %v1094_v18  ;;  %v1107_v54 = vand.u32 2147483648, %v1094_v18  ;;  %vm1101_vm0 = vweird.f32 %v1094_v18  ;;  %v1105_v51 = vand.u32 2147483647, %v1094_v18 }
 0x114   :  { %v6058_v28 = vadd.f32 %v1128_v30, %v1126_v20 }
 0x115   :  { %v1108_v52 = vor.u32 1.1754944e-38, %v1107_v54  ;;  %vm1106_vm3 = vcmp.eq.f32.partialorder %v1105_v51, 8.507059e+37  ;;  %v8357_v54 = vld [vmem:[#allocation74_spill] sm:$0xff]  ;;  %v8359_v51 = vld [vmem:[#allocation71_spill] sm:$0xff] }
 0x117   :  { %v4457_v59 = vpop.eup %4456 }
 0x118   :  { %v4459_v15 = vpop.eup %4458  ;;  %v1095_v6 = vadd.f32 1.0, %v4457_v59 }
 0x119   :  { %v4461_v27 = vpop.eup %4460  ;;  %v1129_v60 = vmul.f32 %v4459_v15, %v1046_v11  ;;  %v8351_v15 = vld [vmem:[#allocation66_spill] sm:$0xff] }
 0x11a   :  { %v1097_v14 = vmul.f32 %v4461_v27, %v1094_v18  ;;  %4462 = vrcp.f32 %v1095_v6  ;;  %vm1102_vm1 = vweird.f32 %v4461_v27  ;;  %v1122_v41 = vand.u32 2147483648, %v1095_v6 }
 0x11b   :  { %4464 = vtanh.f32 %v6058_v28  ;;  %v6061_v19 = vadd.f32 %v1129_v60, %v1127_v63  ;;  %vm1103_vm2 = vmor %vm1101_vm0, %vm1102_vm1  ;;  %v1120_v30 = vand.u32 2147483647, %v1095_v6  ;;  %vm1116_vm5 = vweird.f32 %v1095_v6  ;;  %v8353_v63 = vld [vmem:[#allocation70_spill] sm:$0xff]  ;;  %v8355_v60 = vld [vmem:[#allocation67_spill] sm:$0xff] }
 0x11c   :  { %v1098_v23 = vsub.f32 1.0, %v1097_v14  ;;  %v1123_v59 = vor.u32 1.1754944e-38, %v1122_v41  ;;  %v8369_v41 = vld [vmem:[#allocation86_spill] sm:$0xff] }
 0x11d   :  { %4466 = vtanh.f32 %v6061_v19  ;;  %vm1121_vm7 = vcmp.eq.f32.partialorder %v1120_v30, 8.507059e+37  ;;  %v8371_v30 = vld [vmem:[#allocation83_spill] sm:$0xff] }
 0x11e   :  { %v1099_v61 = vmul.f32 %v4461_v27, %v1098_v23  ;;  %v8356_v23 = vld [vmem:[#allocation69_spill] sm:$0xff] }
 0x120   :  { %v4463_v49 = vpop.eup %4462  ;;  %v1100_v1 = vadd.f32 %v4461_v27, %v1099_v61  ;;  %v8358_v61 = vld [vmem:[#allocation76_spill] sm:$0xff] }
 0x121   :  { %v1112_v39 = vmul.f32 %v4463_v49, %v1095_v6  ;;  %v4465_v31 = vpop.eup %4464  ;;  %vm1117_vm4 = vweird.f32 %v4463_v49  ;;  %v8354_v6 = vld [vmem:[#allocation72_spill] sm:$0xff] }
 0x122   :  { %v1104_v43 = vsel %vm1103_vm2, %v4461_v27, %v1100_v1  ;;  %vm1118_vm6 = vmor %vm1116_vm5, %vm1117_vm4  ;;  %v8361_v1 = vld [vmem:[#allocation78_spill] sm:$0xff] }
 0x123   :  { %v1109_v35 = vsel %vm1106_vm3, %v1108_v52, %v1104_v43  ;;  %v1113_v57 = vsub.f32 1.0, %v1112_v39  ;;  %v4467_v27 = vpop.eup %4466  ;;  %v8362_v52 = vld [vmem:[#allocation80_spill] sm:$0xff]  ;;  %v8363_v39 = vld [vmem:[#allocation75_spill] sm:$0xff]  ;;  %v8364_v43 = vld [vmem:[#allocation77_spill] sm:$0xff] }
 0x124   :  { %v1134_v9 = vmul.f32 %v4465_v31, %v1109_v35  ;;  %v8365_v31 = vld [vmem:[#allocation82_spill] sm:$0xff]  ;;  %v8366_v35 = vld [vmem:[#allocation84_spill] sm:$0xff] }
 0x125   :  { %v1114_v20 = vmul.f32 %v4463_v49, %v1113_v57  ;;  %v8367_v57 = vld [vmem:[#allocation79_spill] sm:$0xff] }
 0x126   :  { %v6064_v18 = vpack.c.bf16 %v1134_v9, %v1134_v9  ;;  %v8368_v9 = vld [vmem:[#allocation81_spill] sm:$0xff] }
 0x127   :  { %v1115_v48 = vadd.f32 %v4463_v49, %v1114_v20  ;;  %v8370_v20 = vld [vmem:[#allocation88_spill] sm:$0xff] }
 0x128   :  { %1155 = vmatmul.bf16.vlgmr.msra.gmra.mxu0 %v6064_v18  ;;  %1181 = vmatmul.bf16.vlgmr.msra.gmra.mxu2 %v6064_v18 }
 0x129   :  { %v1119_v2 = vsel %vm1118_vm6, %v4463_v49, %v1115_v48  ;;  %1251 = vmatpush.bf16.msra.mxu0 %v8351_v15  ;;  %1277 = vmatpush.bf16.msra.mxu2 %v8352_v55  ;;  %v8360_v49 = vld [vmem:[#allocation73_spill] sm:$0xff] }
 0x12a   :  { %v1124_v62 = vsel %vm1121_vm7, %v1123_v59, %v1119_v2  ;;  %v8372_v48 = vld [vmem:[#allocation85_spill] sm:$0xff]  ;;  %v8373_v59 = vld [vmem:[#allocation90_spill] sm:$0xff]  ;;  %v8374_v2 = vld [vmem:[#allocation87_spill] sm:$0xff] }
 0x12b   :  { %v1135_v14 = vmul.f32 %v4467_v27, %v1124_v62  ;;  %v8375_v27 = vld [vmem:[#allocation89_spill] sm:$0xff]  ;;  %v8376_v62 = vld [vmem:[#allocation91_spill] sm:$0xff] }
 0x12d   :  { %v6070_v11 = vpack.c.bf16 %v1135_v14, %v1135_v14  ;;  %1252 = vmatpush.bf16.msra.mxu0 %v8353_v63  ;;  %1278 = vmatpush.bf16.msra.mxu2 %v8354_v6  ;;  %v8377_v14 = vld [vmem:[#allocation93_spill] sm:$0xff] }
 0x12f   :  { %1168 = vmatmul.bf16.vlgmr.msra.gmra.mxu1 %v6070_v11  ;;  %1194 = vmatmul.bf16.vlgmr.msra.gmra.mxu3 %v6070_v11 }
 0x130   :  { %1264 = vmatpush.bf16.msra.mxu1 %v8355_v60  ;;  %1290 = vmatpush.bf16.msra.mxu3 %v8356_v23 }
 0x131   :  { %1253 = vmatpush.bf16.msra.mxu0 %v8357_v54  ;;  %1279 = vmatpush.bf16.msra.mxu2 %v8358_v61 }
 0x134   :  { %1265 = vmatpush.bf16.msra.mxu1 %v8359_v51  ;;  %1291 = vmatpush.bf16.msra.mxu3 %v8360_v49 }
 0x135   :  { %1254 = vmatpush.bf16.msra.mxu0 %v8361_v1  ;;  %1280 = vmatpush.bf16.msra.mxu2 %v8362_v52 }
 0x138   :  { %1266 = vmatpush.bf16.msra.mxu1 %v8363_v39  ;;  %1292 = vmatpush.bf16.msra.mxu3 %v8364_v43 }
 0x139   :  { %1207 = vmatmul.bf16.vlgmr.msrb.gmra.mxu0 %v6064_v18  ;;  %1233 = vmatmul.bf16.vlgmr.msrb.gmra.mxu2 %v6064_v18 }
 0x13a   :  { %1255 = vmatpush.bf16.msra.mxu0 %v8365_v31  ;;  %1281 = vmatpush.bf16.msra.mxu2 %v8366_v35 }
 0x13c   :  { %1267 = vmatpush.bf16.msra.mxu1 %v8367_v57  ;;  %1293 = vmatpush.bf16.msra.mxu3 %v8368_v9 }
 0x13e   :  { %1256 = vmatpush.bf16.msra.mxu0 %v8369_v41  ;;  %1282 = vmatpush.bf16.msra.mxu2 %v8370_v20 }
 0x13f   :  { %1220 = vmatmul.bf16.vlgmr.msrb.gmra.mxu1 %v6070_v11  ;;  %1246 = vmatmul.bf16.vlgmr.msrb.gmra.mxu3 %v6070_v11 }
 0x140   :  { %1268 = vmatpush.bf16.msra.mxu1 %v8371_v30  ;;  %1294 = vmatpush.bf16.msra.mxu3 %v8372_v48 }
 0x142   :  { %1257 = vmatpush.bf16.msra.mxu0 %v8373_v59  ;;  %1283 = vmatpush.bf16.msra.mxu2 %v5551_v4  ;;  %v8378_v4 = vld [vmem:[#allocation102_spill] sm:$0xff]  ;;  %v8395_v59 = vld [vmem:[#allocation113_spill] sm:$0xff] }
 0x144   :  { %1269 = vmatpush.bf16.msra.mxu1 %v8374_v2  ;;  %1295 = vmatpush.bf16.msra.mxu3 %v8375_v27  ;;  %v8379_v2 = vld [vmem:[#allocation104_spill] sm:$0xff]  ;;  %v8380_v27 = vld [vmem:[#allocation95_spill] sm:$0xff] }
 0x146   :  { %1258 = vmatpush.bf16.msra.mxu0 %v5584_v22  ;;  %1284 = vmatpush.bf16.msra.mxu2 %v5599_v10  ;;  %v8381_v22 = vld [vmem:[#allocation97_spill] sm:$0xff]  ;;  %v8382_v10 = vld [vmem:[#allocation99_spill] sm:$0xff] }
 0x148   :  { %1270 = vmatpush.bf16.msra.mxu1 %v8376_v62  ;;  %1296 = vmatpush.bf16.msra.mxu3 %v8377_v14  ;;  %v8385_v62 = vld [vmem:[#allocation108_spill] sm:$0xff]  ;;  %v8386_v14 = vld [vmem:[#allocation103_spill] sm:$0xff] }
 0x149   :  { %1259 = vmatmul.bf16.vlgmr.msra.gmra.mxu0 %v6064_v18  ;;  %1285 = vmatmul.bf16.vlgmr.msra.gmra.mxu2 %v6064_v18 }
 0x14a   :  { %1303 = vmatpush.bf16.msrb.mxu0 %v5610_v47  ;;  %1329 = vmatpush.bf16.msrb.mxu2 %v5614_v26  ;;  %v8383_v47 = vld [vmem:[#allocation101_spill] sm:$0xff]  ;;  %v8384_v26 = vld [vmem:[#allocation106_spill] sm:$0xff] }
 0x14c   :  { %1271 = vmatpush.bf16.msra.mxu1 %v8380_v27  ;;  %1297 = vmatpush.bf16.msra.mxu3 %v8381_v22  ;;  %v8389_v27 = vld [vmem:[#allocation112_spill] sm:$0xff]  ;;  %v8390_v22 = vld [vmem:[#allocation107_spill] sm:$0xff] }
 0x14e   :  { %1304 = vmatpush.bf16.msrb.mxu0 %v8378_v4  ;;  %1330 = vmatpush.bf16.msrb.mxu2 %v8379_v2  ;;  %v8387_v4 = vld [vmem:[#allocation105_spill] sm:$0xff]  ;;  %v8388_v2 = vld [vmem:[#allocation110_spill] sm:$0xff] }
 0x14f   :  { %1272 = vmatmul.bf16.vlgmr.msra.gmra.mxu1 %v6070_v11  ;;  %1298 = vmatmul.bf16.vlgmr.msra.gmra.mxu3 %v6070_v11 }
 0x150   :  { %1316 = vmatpush.bf16.msrb.mxu1 %v8382_v10  ;;  %1342 = vmatpush.bf16.msrb.mxu3 %v8383_v47  ;;  %v8391_v10 = vld [vmem:[#allocation109_spill] sm:$0xff]  ;;  %v8392_v47 = vld [vmem:[#allocation114_spill] sm:$0xff] }
 0x152   :  { %1305 = vmatpush.bf16.msrb.mxu0 %v8384_v26  ;;  %1331 = vmatpush.bf16.msrb.mxu2 %v8385_v62  ;;  %v8393_v26 = vld [vmem:[#allocation116_spill] sm:$0xff]  ;;  %v8394_v62 = vld [vmem:[#allocation111_spill] sm:$0xff] }
 0x154   :  { %1317 = vmatpush.bf16.msrb.mxu1 %v8386_v14  ;;  %1343 = vmatpush.bf16.msrb.mxu3 %v8387_v4  ;;  %v8396_v14 = vld [vmem:[#allocation120_spill] sm:$0xff]  ;;  %v8397_v4 = vld [vmem:[#allocation115_spill] sm:$0xff] }
 0x156   :  { %1306 = vmatpush.bf16.msrb.mxu0 %v8388_v2  ;;  %1332 = vmatpush.bf16.msrb.mxu2 %v8389_v27  ;;  %v8398_v2 = vld [vmem:[#allocation117_spill] sm:$0xff] }
 0x158   :  { %1318 = vmatpush.bf16.msrb.mxu1 %v8390_v22  ;;  %1344 = vmatpush.bf16.msrb.mxu3 %v8391_v10  ;;  %v8399_v10 = vld [vmem:[#allocation119_spill] sm:$0xff] }
 0x15a   :  { %1307 = vmatpush.bf16.msrb.mxu0 %v8392_v47  ;;  %1333 = vmatpush.bf16.msrb.mxu2 %v8393_v26  ;;  %v8400_v47 = vld [vmem:[#allocation121_spill] sm:$0xff] }
 0x15c   :  { %1319 = vmatpush.bf16.msrb.mxu1 %v8394_v62  ;;  %1345 = vmatpush.bf16.msrb.mxu3 %v8395_v59 }
 0x15e   :  { %1308 = vmatpush.bf16.msrb.mxu0 %v5795_v53  ;;  %1334 = vmatpush.bf16.msrb.mxu2 %v8396_v14 }
 0x160   :  { %1320 = vmatpush.bf16.msrb.mxu1 %v8397_v4  ;;  %1346 = vmatpush.bf16.msrb.mxu3 %v8398_v2 }
 0x162   :  { %1309 = vmatpush.bf16.msrb.mxu0 %v5831_v40  ;;  %1335 = vmatpush.bf16.msrb.mxu2 %v5837_v32 }
 0x164   :  { %1321 = vmatpush.bf16.msrb.mxu1 %v8399_v10  ;;  %1347 = vmatpush.bf16.msrb.mxu3 %v8400_v47 }
 0x166   :  { %1310 = vmatpush.bf16.msrb.mxu0 %v5867_v37  ;;  %1336 = vmatpush.bf16.msrb.mxu2 %v5873_v24 }
 0x168   :  { %1322 = vmatpush.bf16.msrb.mxu1 %v5835_v0  ;;  %1348 = vmatpush.bf16.msrb.mxu3 %v5849_v13 }
 0x169   :  { %1311 = vmatmul.bf16.vlgmr.msrb.gmra.mxu0 %v6064_v18  ;;  %1337 = vmatmul.bf16.vlgmr.msrb.gmra.mxu2 %v6064_v18  ;;  %v8401_v18 = vld [vmem:[#allocation24_spill] sm:$0xff] }
 0x16a   :  { %1500 = vmatpush.bf16.msra.mxu0 %v4727_v3  ;;  %1526 = vmatpush.bf16.msra.mxu2 %v4740_v8 }
 0x16c   :  { %1323 = vmatpush.bf16.msrb.mxu1 %v5871_v42  ;;  %1349 = vmatpush.bf16.msrb.mxu3 %v5876_v36 }
 0x16e   :  { %1501 = vmatpush.bf16.msra.mxu0 %v4765_v16  ;;  %1527 = vmatpush.bf16.msra.mxu2 %v4779_v21 }
 0x16f   :  { %1324 = vmatmul.bf16.vlgmr.msrb.gmra.mxu1 %v6070_v11  ;;  %1350 = vmatmul.bf16.vlgmr.msrb.gmra.mxu3 %v6070_v11  ;;  %v8402_v11 = vld [vmem:[#allocation19_spill] sm:$0xff] }
 0x170   :  { %1513 = vmatpush.bf16.msra.mxu1 %v4738_v7  ;;  %1539 = vmatpush.bf16.msra.mxu3 %v4752_v12 }
 0x172   :  { %1502 = vmatpush.bf16.msra.mxu0 %v4802_v29  ;;  %1528 = vmatpush.bf16.msra.mxu2 %v4817_v34 }
 0x174   :  { %1514 = vmatpush.bf16.msra.mxu1 %v4767_v17  ;;  %1540 = vmatpush.bf16.msra.mxu3 %v4790_v25 }
 0x176   :  { %1503 = vmatpush.bf16.msra.mxu0 %v4847_v44  ;;  %1529 = vmatpush.bf16.msra.mxu2 %v4853_v46  ;;  %v8403_v44 = vld [vmem:[#allocation21_spill] sm:$0xff]  ;;  %v8404_v46 = vld [vmem:[#allocation26_spill] sm:$0xff] }
 0x178   :  { %1515 = vmatpush.bf16.msra.mxu1 %v4815_v33  ;;  %1541 = vmatpush.bf16.msra.mxu3 %v4829_v38  ;;  %v8405_v33 = vld [vmem:[#allocation28_spill] sm:$0xff]  ;;  %v8406_v38 = vld [vmem:[#allocation23_spill] sm:$0xff] }
 0x17a   :  { %1504 = vmatpush.bf16.msra.mxu0 %v4883_v56  ;;  %1530 = vmatpush.bf16.msra.mxu2 %v4889_v58  ;;  %v8407_v56 = vld [vmem:[#allocation25_spill] sm:$0xff]  ;;  %v8408_v58 = vld [vmem:[#allocation30_spill] sm:$0xff] }
 0x17c   :  { %1516 = vmatpush.bf16.msra.mxu1 %v4851_v45  ;;  %1542 = vmatpush.bf16.msra.mxu3 %v4865_v50  ;;  %v8409_v45 = vld [vmem:[#allocation32_spill] sm:$0xff]  ;;  %v8410_v50 = vld [vmem:[#allocation34_spill] sm:$0xff] }
 0x17e   :  { %1505 = vmatpush.bf16.msra.mxu0 %v4919_v5  ;;  %1531 = vmatpush.bf16.msra.mxu2 %v8401_v18  ;;  %v8411_v5 = vld [vmem:[#allocation36_spill] sm:$0xff]  ;;  %v8412_v18 = vld [vmem:[#allocation27_spill] sm:$0xff] }
 0x180   :  { %1517 = vmatpush.bf16.msra.mxu1 %v8402_v11  ;;  %1543 = vmatpush.bf16.msra.mxu3 %v8403_v44  ;;  %v8413_v11 = vld [vmem:[#allocation29_spill] sm:$0xff]  ;;  %v8414_v44 = vld [vmem:[#allocation38_spill] sm:$0xff] }
 0x182   :  { %1506 = vmatpush.bf16.msra.mxu0 %v8404_v46  ;;  %1532 = vmatpush.bf16.msra.mxu2 %v8405_v33  ;;  %v8415_v46 = vld [vmem:[#allocation40_spill] sm:$0xff]  ;;  %v8416_v33 = vld [vmem:[#allocation31_spill] sm:$0xff] }
 0x184   :  { %1518 = vmatpush.bf16.msra.mxu1 %v8406_v38  ;;  %1544 = vmatpush.bf16.msra.mxu3 %v8407_v56  ;;  %v8417_v38 = vld [vmem:[#allocation33_spill] sm:$0xff]  ;;  %v8418_v56 = vld [vmem:[#allocation35_spill] sm:$0xff] }
 0x186   :  { %1507 = vmatpush.bf16.msra.mxu0 %v8408_v58  ;;  %1533 = vmatpush.bf16.msra.mxu2 %v8409_v45  ;;  %v8419_v58 = vld [vmem:[#allocation37_spill] sm:$0xff]  ;;  %v8420_v45 = vld [vmem:[#allocation42_spill] sm:$0xff] }
 0x188   :  { %1519 = vmatpush.bf16.msra.mxu1 %v8412_v18  ;;  %1545 = vmatpush.bf16.msra.mxu3 %v8413_v11  ;;  %v8423_v18 = vld [vmem:[#allocation41_spill] sm:$0xff]  ;;  %v8424_v11 = vld [vmem:[#allocation46_spill] sm:$0xff] }
 0x18a   :  { %1552 = vmatpush.bf16.msrb.mxu0 %v8410_v50  ;;  %1578 = vmatpush.bf16.msrb.mxu2 %v8411_v5  ;;  %v8421_v50 = vld [vmem:[#allocation44_spill] sm:$0xff]  ;;  %v8422_v5 = vld [vmem:[#allocation39_spill] sm:$0xff] }
 0x18c   :  { %1520 = vmatpush.bf16.msra.mxu1 %v8416_v33  ;;  %1546 = vmatpush.bf16.msra.mxu3 %v8417_v38  ;;  %v8427_v33 = vld [vmem:[#allocation45_spill] sm:$0xff]  ;;  %v8428_v38 = vld [vmem:[#allocation50_spill] sm:$0xff] }
 0x18e   :  { %1553 = vmatpush.bf16.msrb.mxu0 %v8414_v44  ;;  %1579 = vmatpush.bf16.msrb.mxu2 %v8415_v46  ;;  %v8425_v44 = vld [vmem:[#allocation48_spill] sm:$0xff]  ;;  %v8426_v46 = vld [vmem:[#allocation43_spill] sm:$0xff] }
 0x190   :  { %1565 = vmatpush.bf16.msrb.mxu1 %v8418_v56  ;;  %1591 = vmatpush.bf16.msrb.mxu3 %v8419_v58  ;;  %v8429_v56 = vld [vmem:[#allocation52_spill] sm:$0xff]  ;;  %v8430_v58 = vld [vmem:[#allocation47_spill] sm:$0xff] }
 0x192   :  { %1554 = vmatpush.bf16.msrb.mxu0 %v8420_v45  ;;  %1580 = vmatpush.bf16.msrb.mxu2 %v8421_v50  ;;  %v8431_v45 = vld [vmem:[#allocation49_spill] sm:$0xff]  ;;  %v8432_v50 = vld [vmem:[#allocation54_spill] sm:$0xff] }
 0x194   :  { %1566 = vmatpush.bf16.msrb.mxu1 %v8422_v5  ;;  %1592 = vmatpush.bf16.msrb.mxu3 %v8423_v18  ;;  %v8433_v5 = vld [vmem:[#allocation56_spill] sm:$0xff]  ;;  %v8434_v18 = vld [vmem:[#allocation51_spill] sm:$0xff] }
 0x196   :  { %1555 = vmatpush.bf16.msrb.mxu0 %v8424_v11  ;;  %1581 = vmatpush.bf16.msrb.mxu2 %v8425_v44  ;;  %v8435_v11 = vld [vmem:[#allocation53_spill] sm:$0xff]  ;;  %v8436_v44 = vld [vmem:[#allocation58_spill] sm:$0xff] }
 0x198   :  { %1567 = vmatpush.bf16.msrb.mxu1 %v8426_v46  ;;  %1593 = vmatpush.bf16.msrb.mxu3 %v8427_v33  ;;  %v8437_v46 = vld [vmem:[#allocation60_spill] sm:$0xff]  ;;  %v8438_v33 = vld [vmem:[#allocation55_spill] sm:$0xff] }
 0x19a   :  { %1556 = vmatpush.bf16.msrb.mxu0 %v8428_v38  ;;  %1582 = vmatpush.bf16.msrb.mxu2 %v8429_v56  ;;  %v8439_v38 = vld [vmem:[#allocation57_spill] sm:$0xff]  ;;  %v8440_v56 = vld [vmem:[#allocation62_spill] sm:$0xff] }
 0x19c   :  { %1568 = vmatpush.bf16.msrb.mxu1 %v8430_v58  ;;  %1594 = vmatpush.bf16.msrb.mxu3 %v8431_v45  ;;  %v8441_v58 = vld [vmem:[#allocation64_spill] sm:$0xff]  ;;  %v8442_v45 = vld [vmem:[#allocation59_spill] sm:$0xff] }
 0x19e   :  { %1557 = vmatpush.bf16.msrb.mxu0 %v8432_v50  ;;  %1583 = vmatpush.bf16.msrb.mxu2 %v8433_v5  ;;  %v8443_v50 = vld [vmem:[#allocation61_spill] sm:$0xff]  ;;  %v8444_v5 = vld [vmem:[#allocation63_spill] sm:$0xff] }
 0x1a0   :  { %1569 = vmatpush.bf16.msrb.mxu1 %v8434_v18  ;;  %1595 = vmatpush.bf16.msrb.mxu3 %v8435_v11  ;;  %v8445_v18 = vld [vmem:[#allocation65_spill] sm:$0xff] }
 0x1a2   :  { %1558 = vmatpush.bf16.msrb.mxu0 %v8436_v44  ;;  %1584 = vmatpush.bf16.msrb.mxu2 %v8437_v46 }
 0x1a4   :  { %1570 = vmatpush.bf16.msrb.mxu1 %v8438_v33  ;;  %1596 = vmatpush.bf16.msrb.mxu3 %v8439_v38 }
 0x1a5   :  { %v1156_v11 = vpop.f32.mrf.mxu0 }
 0x1a6   :  { %1559 = vmatpush.bf16.msrb.mxu0 %v8440_v56  ;;  %1585 = vmatpush.bf16.msrb.mxu2 %v8441_v58 }
 0x1a8   :  { %1571 = vmatpush.bf16.msrb.mxu1 %v8442_v45  ;;  %1597 = vmatpush.bf16.msrb.mxu3 %v8443_v50 }
 0x1ab   :  { %v1182_v44 = vpop.f32.mrf.mxu2 }
 0x1ac   :  { %1572 = vmatpush.bf16.msrb.mxu1 %v8444_v5  ;;  %1598 = vmatpush.bf16.msrb.mxu3 %v8445_v18  ;;  %v1169_v25 = vpop.f32.mrf.mxu1  ;;  %v4210_v5 = vld [vmem:[%s7921_s0 + $0x50] sm:$0xff] }
 0x1ad   :  { %v1158_v46 = vpop.f32.mrf.mxu0  ;;  %v1170_v42 = vadd.f32 %v1169_v25, %v1156_v11  ;;  %v4209_v25 = vld [vmem:[%s7921_s0 + $0x48] sm:$0xff] }
 0x1b2   :  { %v1195_v17 = vpop.f32.mrf.mxu3 }
 0x1b3   :  { %v1184_v33 = vpop.f32.mrf.mxu2 }
 0x1b4   :  { %v1171_v34 = vpop.f32.mrf.mxu1  ;;  %v4208_v33 = vld [vmem:[%s7921_s0 + $0x40] sm:$0xff] }
 0x1b6   :  { %v1208_v38 = vpop.f32.mrf.mxu0 }
 0x1ba   :  { %v1197_v29 = vpop.f32.mrf.mxu3 }
 0x1bb   :  { %v4211_v29 = vld [vmem:[%s7921_s0 + $0x58] sm:$0xff] }
 0x1bc   :  { %v1221_v56 = vpop.f32.mrf.mxu1  ;;  %v1234_v12 = vpop.f32.mrf.mxu2 }
 0x1bd   :  { %v1222_v45 = vadd.f32 %v1221_v56, %v1208_v38  ;;  %v1355_v38 = vadd.f32 %v4208_v33, %v1170_v42 }
 0x1be   :  { %v1210_v58 = vpop.f32.mrf.mxu0 }
 0x1bf   :  { %v1357_v21 = vadd.f32 %v4210_v5, %v1222_v45  ;;  %v1196_v58 = vadd.f32 %v1195_v17, %v1182_v44 }
 0x1c1   :  { %v4218_v56 = vmul.f32 -1.442695, %v1357_v21 }
 0x1c2   :  { %v1247_v7 = vpop.f32.mrf.mxu3 }
 0x1c3   :  { %v1248_v34 = vadd.f32 %v1247_v7, %v1234_v12  ;;  %4468 = vpow2.f32 %v4218_v56  ;;  %v1356_v7 = vadd.f32 %v4209_v25, %v1196_v58 }
 0x1c4   :  { %v1223_v50 = vpop.f32.mrf.mxu1  ;;  %v1236_v18 = vpop.f32.mrf.mxu2 }
 0x1c5   :  { %v1358_v45 = vadd.f32 %v4211_v29, %v1248_v34  ;;  %v4216_v18 = vmul.f32 -1.442695, %v1355_v38  ;;  %v4217_v13 = vmul.f32 -1.442695, %v1356_v7  ;;  %v4214_v7 = vld [vmem:[%s7921_s0 + $0x70] sm:$0xff] }
 0x1c6   :  { %v1260_v36 = vpop.f32.mrf.mxu0 }
 0x1c7   :  { %v4219_v12 = vmul.f32 -1.442695, %v1358_v45  ;;  %4470 = vpow2.f32 %v4216_v18 }
 0x1c9   :  { %v4469_v42 = vpop.eup %4468  ;;  %4472 = vpow2.f32 %v4219_v12 }
 0x1ca   :  { %v1249_v46 = vpop.f32.mrf.mxu3  ;;  %4474 = vpow2.f32 %v4217_v13  ;;  %v6226_v21 = vadd.f32 1.0, %v4469_v42 }
 0x1cc   :  { %v6221_v16 = vpop.f32.mrf.mxu2  ;;  %v1273_v50 = vpop.f32.mrf.mxu1  ;;  %4476 = vrcp.f32 %v6226_v21  ;;  %vm1414_vm9 = vweird.f32 %v6226_v21 }
 0x1cd   :  { %v4471_v44 = vpop.eup %4470 }
 0x1ce   :  { %v1262_v5 = vpop.f32.mrf.mxu0  ;;  %v6228_v34 = vadd.f32 1.0, %v4471_v44 }
 0x1cf   :  { %v4473_v33 = vpop.eup %4472 }
 0x1d0   :  { %v4475_v29 = vpop.eup %4474  ;;  %v6231_v38 = vadd.f32 1.0, %v4473_v33  ;;  %4478 = vrcp.f32 %v6228_v34  ;;  %vm1376_vm11 = vweird.f32 %v6228_v34 }
 0x1d1   :  { %v6234_v56 = vadd.f32 1.0, %v4475_v29  ;;  %v1274_v29 = vadd.f32 %v1273_v50, %v1260_v36 }
 0x1d2   :  { %v1299_v11 = vpop.f32.mrf.mxu3  ;;  %v6236_v58 = vpop.eup %4476  ;;  %4480 = vrcp.f32 %v6231_v38  ;;  %vm1429_vm0 = vweird.f32 %v6231_v38 }
 0x1d3   :  { %4482 = vrcp.f32 %v6234_v56  ;;  %vm1415_vm8 = vweird.f32 %v6236_v58  ;;  %vm1391_vm4 = vweird.f32 %v6234_v56 }
 0x1d4   :  { %v1288_v46 = vpop.f32.mrf.mxu2  ;;  %v1275_v17 = vpop.f32.mrf.mxu1  ;;  %vm6275_vm10 = vmor %vm1414_vm9, %vm1415_vm8 }
 0x1d6   :  { %v6242_v25 = vpop.eup %4478 }
 0x1d7   :  { %v1372_v5 = vmul.f32 %v6242_v25, %v6228_v34  ;;  %vm1377_vm12 = vweird.f32 %v6242_v25 }
 0x1d8   :  { %v6244_v45 = vpop.eup %4480  ;;  %vm6293_vm15 = vmor %vm1376_vm11, %vm1377_vm12 }
 0x1d9   :  { %v6251_v17 = vpop.eup %4482  ;;  %v1425_v44 = vmul.f32 %v6244_v45, %v6231_v38  ;;  %v1373_v3 = vsub.f32 1.0, %v1372_v5  ;;  %vm1430_vm13 = vweird.f32 %v6244_v45 }
 0x1da   :  { %v1301_v0 = vpop.f32.mrf.mxu3  ;;  %v1387_v37 = vmul.f32 %v6251_v17, %v6234_v56  ;;  %vm6302_vm1 = vmor %vm1429_vm0, %vm1430_vm13  ;;  %vm1392_vm3 = vweird.f32 %v6251_v17 }
 0x1db   :  { %v1410_v0 = vmul.f32 %v6236_v58, %v6226_v21  ;;  %v1374_v50 = vmul.f32 %v6242_v25, %v1373_v3  ;;  %v4213_v3 = vld [vmem:[%s7921_s0 + $0x68] sm:$0xff]  ;;  %vm1393_vm6 = vmor %vm1391_vm4, %vm1392_vm3 }
 0x1dd   :  { %v1411_v18 = vsub.f32 1.0, %v1410_v0  ;;  %v4212_v0 = vld [vmem:[%s7921_s0 + $0x60] sm:$0xff] }
 0x1df   :  { %v1412_v24 = vmul.f32 %v6236_v58, %v1411_v18 }
 0x1e1   :  { %v1413_v5 = vadd.f32 %v6236_v58, %v1412_v24  ;;  %v1380_v24 = vand.u32 2147483647, %v6228_v34 }
 0x1e3   :  { %vm1381_vm2 = vcmp.eq.f32.partialorder %v1380_v24, 8.507059e+37 }
 0x1e6   :  { %v1312_v13 = vpop.f32.mrf.mxu0 }
 0x1ec   :  { %v1325_v12 = vpop.f32.mrf.mxu1  ;;  %v1338_v46 = vpop.f32.mrf.mxu2 }
 0x1ed   :  { %v1326_v42 = vadd.f32 %v1325_v12, %v1312_v13  ;;  %v1426_v13 = vsub.f32 1.0, %v1425_v44  ;;  %v4215_v12 = vld [vmem:[%s7921_s0 + $0x78] sm:$0xff]  ;;  %v1300_v44 = vadd.f32 %v1299_v11, %v6221_v16  ;;  %v1382_v11 = vand.u32 2147483648, %v6228_v34 }
 0x1ee   :  { %v1314_v33 = vpop.f32.mrf.mxu0 }
 0x1ef   :  { %v1361_v8 = vadd.f32 %v4214_v7, %v1326_v42  ;;  %v1359_v33 = vadd.f32 %v4212_v0, %v1274_v29  ;;  %v1388_v42 = vsub.f32 1.0, %v1387_v37  ;;  %v1427_v29 = vmul.f32 %v6244_v45, %v1426_v13 }
 0x1f0   :  { %v1375_v37 = vadd.f32 %v6242_v25, %v1374_v50  ;;  %v1360_v13 = vadd.f32 %v4213_v3, %v1300_v44  ;;  %v1435_v50 = vand.u32 2147483648, %v6231_v38  ;;  %v1383_v34 = vor.u32 1.1754944e-38, %v1382_v11 }
 0x1f1   :  { %v4220_v47 = vmul.f32 -1.442695, %v1361_v8  ;;  %v1420_v8 = vand.u32 2147483648, %v6226_v21 }
 0x1f2   :  { %v1351_v10 = vpop.f32.mrf.mxu3 }
 0x1f3   :  { %4484 = vpow2.f32 %v4220_v47  ;;  %v1352_v36 = vadd.f32 %v1351_v10, %v1338_v46  ;;  %v1418_v47 = vand.u32 2147483647, %v6226_v21  ;;  %v1417_v21 = vsel %vm6275_vm10, %v6236_v58, %v1413_v5 }
 0x1f4   :  { %v1327_v18 = vpop.f32.mrf.mxu1  ;;  %v1340_v7 = vpop.f32.mrf.mxu2  ;;  %4486 = vtanh.f32 %v1359_v33  ;;  %v1421_v0 = vor.u32 1.1754944e-38, %v1420_v8  ;;  %v1379_v5 = vsel %vm6293_vm15, %v6242_v25, %v1375_v37  ;;  %v1397_v10 = vand.u32 2147483648, %v6234_v56 }
 0x1f5   :  { %v1362_v32 = vadd.f32 %v4215_v12, %v1352_v36  ;;  %v1389_v12 = vmul.f32 %v6251_v17, %v1388_v42  ;;  %vm1419_vm14 = vcmp.eq.f32.partialorder %v1418_v47, 8.507059e+37  ;;  %v1433_v7 = vand.u32 2147483647, %v6231_v38 }
 0x1f6   :  { %v1422_v58 = vsel %vm1419_vm14, %v1421_v0, %v1417_v21  ;;  %v1436_v47 = vor.u32 1.1754944e-38, %v1435_v50  ;;  %v1384_v3 = vsel %vm1381_vm2, %v1383_v34, %v1379_v5  ;;  %v1398_v0 = vor.u32 1.1754944e-38, %v1397_v10 }
 0x1f7   :  { %v4221_v16 = vmul.f32 -1.442695, %v1362_v32  ;;  %v1428_v32 = vadd.f32 %v6244_v45, %v1427_v29  ;;  %v1479_v44 = vmul.f32 %v1422_v58, %v6058_v28  ;;  %v1390_v29 = vadd.f32 %v6251_v17, %v1389_v12 }
 0x1f8   :  { %vm1434_vm5 = vcmp.eq.f32.partialorder %v1433_v7, 8.507059e+37 }
 0x1f9   :  { %v4485_v46 = vpop.eup %4484  ;;  %4488 = vpow2.f32 %v4221_v16  ;;  %v1432_v25 = vsel %vm6302_vm1, %v6244_v45, %v1428_v32  ;;  %v1395_v16 = vand.u32 2147483647, %v6234_v56 }
 0x1fa   :  { %v1447_v33 = vadd.f32 1.0, %v4485_v46  ;;  %v1353_v36 = vpop.f32.mrf.mxu3  ;;  %v4487_v42 = vpop.eup %4486  ;;  %v1437_v37 = vsel %vm1434_vm5, %v1436_v47, %v1432_v25  ;;  %v1394_v46 = vsel %vm1393_vm6, %v6251_v17, %v1390_v29 }
 0x1fb   :  { %v1481_v24 = vmul.f32 %v4487_v42, %v1384_v3  ;;  %vm1396_vm7 = vcmp.eq.f32.partialorder %v1395_v16, 8.507059e+37  ;;  %v1480_v12 = vmul.f32 %v1437_v37, %v6061_v19 }
 0x1fc   :  { %4490 = vrcp.f32 %v1447_v33  ;;  %v1399_v32 = vsel %vm1396_vm7, %v1398_v0, %v1394_v46  ;;  %v1460_v50 = vand.u32 2147483648, %v1447_v33  ;;  %v1458_v58 = vand.u32 2147483647, %v1447_v33  ;;  %v8453_v0 = vld [vmem:[#allocation92_spill] sm:$0xff] }
 0x1fd   :  { %4492 = vtanh.f32 %v1360_v13  ;;  %v6315_v21 = vadd.f32 %v1481_v24, %v1479_v44  ;;  %vm1454_vm9 = vweird.f32 %v1447_v33 }
 0x1fe   :  { %v1461_v8 = vor.u32 1.1754944e-38, %v1460_v50  ;;  %vm1459_vm11 = vcmp.eq.f32.partialorder %v1458_v58, 8.507059e+37  ;;  %v8459_v50 = vld [vmem:[#allocation100_spill] sm:$0xff]  ;;  %v8461_v58 = vld [vmem:[#allocation93_spill] sm:$0xff] }
 0x1ff   :  { %v4489_v38 = vpop.eup %4488 }
 0x200   :  { %v1448_v28 = vadd.f32 1.0, %v4489_v38 }
 0x202   :  { %v4491_v11 = vpop.eup %4490  ;;  %4494 = vrcp.f32 %v1448_v28  ;;  %v1475_v25 = vand.u32 2147483648, %v1448_v28  ;;  %v1473_v3 = vand.u32 2147483647, %v1448_v28  ;;  %vm1469_vm13 = vweird.f32 %v1448_v28 }
 0x203   :  { %v4493_v45 = vpop.eup %4492  ;;  %v1450_v13 = vmul.f32 %v4491_v11, %v1447_v33  ;;  %4496 = vtanh.f32 %v6315_v21  ;;  %vm1455_vm8 = vweird.f32 %v4491_v11 }
 0x204   :  { %v1482_v56 = vmul.f32 %v4493_v45, %v1399_v32  ;;  %vm1456_vm10 = vmor %vm1454_vm9, %vm1455_vm8  ;;  %v1476_v33 = vor.u32 1.1754944e-38, %v1475_v25  ;;  %vm1474_vm15 = vcmp.eq.f32.partialorder %v1473_v3, 8.507059e+37  ;;  %v8456_v32 = vld [vmem:[#allocation94_spill] sm:$0xff]  ;;  %v8470_v25 = vld [vmem:[#allocation103_spill] sm:$0xff] }
 0x205   :  { %v1451_v36 = vsub.f32 1.0, %v1450_v13  ;;  %v8454_v13 = vld [vmem:[#allocation87_spill] sm:$0xff]  ;;  %v8473_v3 = vld [vmem:[#allocation109_spill] sm:$0xff] }
 0x206   :  { %v6320_v7 = vadd.f32 %v1482_v56, %v1480_v12  ;;  %v8455_v12 = vld [vmem:[#allocation89_spill] sm:$0xff]  ;;  %v8458_v56 = vld [vmem:[#allocation98_spill] sm:$0xff] }
 0x207   :  { %v1452_v18 = vmul.f32 %v4491_v11, %v1451_v36  ;;  %v8457_v36 = vld [vmem:[#allocation96_spill] sm:$0xff] }
 0x208   :  { %v4495_v5 = vpop.eup %4494  ;;  %4498 = vtanh.f32 %v6320_v7 }
 0x209   :  { %v1453_v17 = vadd.f32 %v4491_v11, %v1452_v18  ;;  %v1465_v42 = vmul.f32 %v4495_v5, %v1448_v28  ;;  %v4497_v44 = vpop.eup %4496  ;;  %vm1470_vm12 = vweird.f32 %v4495_v5  ;;  %v8452_v28 = vld [vmem:[#allocation90_spill] sm:$0xff]  ;;  %v8460_v18 = vld [vmem:[#allocation91_spill] sm:$0xff] }
 0x20a   :  { %vm1471_vm14 = vmor %vm1469_vm13, %vm1470_vm12 }
 0x20b   :  { %v1457_v34 = vsel %vm1456_vm10, %v4491_v11, %v1453_v17  ;;  %v1466_v19 = vsub.f32 1.0, %v1465_v42  ;;  %v8463_v17 = vld [vmem:[#allocation104_spill] sm:$0xff]  ;;  %v8464_v42 = vld [vmem:[#allocation95_spill] sm:$0xff] }
 0x20c   :  { %v1462_v29 = vsel %vm1459_vm11, %v1461_v8, %v1457_v34  ;;  %v8465_v8 = vld [vmem:[#allocation97_spill] sm:$0xff]  ;;  %v8466_v34 = vld [vmem:[#allocation99_spill] sm:$0xff] }
 0x20d   :  { %v1487_v38 = vmul.f32 %v4497_v44, %v1462_v29  ;;  %v1467_v47 = vmul.f32 %v4495_v5, %v1466_v19  ;;  %v8467_v19 = vld [vmem:[#allocation101_spill] sm:$0xff]  ;;  %v8468_v44 = vld [vmem:[#allocation106_spill] sm:$0xff]  ;;  %v8469_v29 = vld [vmem:[#allocation108_spill] sm:$0xff] }
 0x20e   :  { %v4499_v37 = vpop.eup %4498 }
 0x20f   :  { %v6323_v10 = vpack.c.bf16 %v1487_v38, %v1487_v38  ;;  %v1468_v24 = vadd.f32 %v4495_v5, %v1467_v47  ;;  %v8471_v38 = vld [vmem:[#allocation105_spill] sm:$0xff]  ;;  %v8472_v47 = vld [vmem:[#allocation110_spill] sm:$0xff] }
 0x211   :  { %v1472_v16 = vsel %vm1471_vm14, %v4495_v5, %v1468_v24  ;;  %1508 = vmatmul.bf16.vlgmr.msra.gmra.mxu0 %v6323_v10  ;;  %1534 = vmatmul.bf16.vlgmr.msra.gmra.mxu2 %v6323_v10  ;;  %v8462_v5 = vld [vmem:[#allocation102_spill] sm:$0xff] }
 0x212   :  { %v1477_v11 = vsel %vm1474_vm15, %v1476_v33, %v1472_v16  ;;  %1604 = vmatpush.bf16.msra.mxu0 %v8351_v15  ;;  %1630 = vmatpush.bf16.msra.mxu2 %v8352_v55  ;;  %v8474_v24 = vld [vmem:[#allocation114_spill] sm:$0xff]  ;;  %v8475_v33 = vld [vmem:[#allocation124_spill] sm:$0xff]  ;;  %v8476_v16 = vld [vmem:[#allocation119_spill] sm:$0xff] }
 0x213   :  { %v1488_v46 = vmul.f32 %v4499_v37, %v1477_v11  ;;  %v8477_v37 = vld [vmem:[#allocation121_spill] sm:$0xff]  ;;  %v8478_v11 = vld [vmem:[#allocation126_spill] sm:$0xff] }
 0x215   :  { %v6329_v45 = vpack.c.bf16 %v1488_v46, %v1488_v46  ;;  %v8479_v46 = vld [vmem:[#allocation128_spill] sm:$0xff] }
 0x216   :  { %1605 = vmatpush.bf16.msra.mxu0 %v8353_v63  ;;  %1631 = vmatpush.bf16.msra.mxu2 %v8354_v6 }
 0x217   :  { %1521 = vmatmul.bf16.vlgmr.msra.gmra.mxu1 %v6329_v45  ;;  %1547 = vmatmul.bf16.vlgmr.msra.gmra.mxu3 %v6329_v45 }
 0x218   :  { %1617 = vmatpush.bf16.msra.mxu1 %v8355_v60  ;;  %1643 = vmatpush.bf16.msra.mxu3 %v8356_v23 }
 0x21a   :  { %1606 = vmatpush.bf16.msra.mxu0 %v8357_v54  ;;  %1632 = vmatpush.bf16.msra.mxu2 %v8358_v61 }
 0x21c   :  { %1618 = vmatpush.bf16.msra.mxu1 %v8359_v51  ;;  %1644 = vmatpush.bf16.msra.mxu3 %v8360_v49 }
 0x21e   :  { %1607 = vmatpush.bf16.msra.mxu0 %v8361_v1  ;;  %1633 = vmatpush.bf16.msra.mxu2 %v8362_v52 }
 0x220   :  { %1619 = vmatpush.bf16.msra.mxu1 %v8363_v39  ;;  %1645 = vmatpush.bf16.msra.mxu3 %v8364_v43 }
 0x221   :  { %1560 = vmatmul.bf16.vlgmr.msrb.gmra.mxu0 %v6323_v10  ;;  %1586 = vmatmul.bf16.vlgmr.msrb.gmra.mxu2 %v6323_v10 }
 0x222   :  { %1608 = vmatpush.bf16.msra.mxu0 %v8365_v31  ;;  %1634 = vmatpush.bf16.msra.mxu2 %v8366_v35 }
 0x224   :  { %1620 = vmatpush.bf16.msra.mxu1 %v8367_v57  ;;  %1646 = vmatpush.bf16.msra.mxu3 %v8368_v9 }
 0x226   :  { %1609 = vmatpush.bf16.msra.mxu0 %v8369_v41  ;;  %1635 = vmatpush.bf16.msra.mxu2 %v8370_v20 }
 0x227   :  { %1573 = vmatmul.bf16.vlgmr.msrb.gmra.mxu1 %v6329_v45  ;;  %1599 = vmatmul.bf16.vlgmr.msrb.gmra.mxu3 %v6329_v45 }
 0x228   :  { %1621 = vmatpush.bf16.msra.mxu1 %v8371_v30  ;;  %1647 = vmatpush.bf16.msra.mxu3 %v8372_v48 }
 0x22a   :  { %1610 = vmatpush.bf16.msra.mxu0 %v8452_v28  ;;  %1636 = vmatpush.bf16.msra.mxu2 %v8453_v0 }
 0x22c   :  { %1622 = vmatpush.bf16.msra.mxu1 %v8454_v13  ;;  %1648 = vmatpush.bf16.msra.mxu3 %v8455_v12 }
 0x22e   :  { %1611 = vmatpush.bf16.msra.mxu0 %v8456_v32  ;;  %1637 = vmatpush.bf16.msra.mxu2 %v8457_v36 }
 0x230   :  { %1623 = vmatpush.bf16.msra.mxu1 %v8460_v18  ;;  %1649 = vmatpush.bf16.msra.mxu3 %v8461_v58 }
 0x231   :  { %1612 = vmatmul.bf16.vlgmr.msra.gmra.mxu0 %v6323_v10  ;;  %1638 = vmatmul.bf16.vlgmr.msra.gmra.mxu2 %v6323_v10 }
 0x232   :  { %1656 = vmatpush.bf16.msrb.mxu0 %v8458_v56  ;;  %1682 = vmatpush.bf16.msrb.mxu2 %v8459_v50 }
 0x234   :  { %1624 = vmatpush.bf16.msra.mxu1 %v8464_v42  ;;  %1650 = vmatpush.bf16.msra.mxu3 %v8465_v8 }
 0x236   :  { %1657 = vmatpush.bf16.msrb.mxu0 %v8462_v5  ;;  %1683 = vmatpush.bf16.msrb.mxu2 %v8463_v17 }
 0x237   :  { %1625 = vmatmul.bf16.vlgmr.msra.gmra.mxu1 %v6329_v45  ;;  %1651 = vmatmul.bf16.vlgmr.msra.gmra.mxu3 %v6329_v45 }
 0x238   :  { %1669 = vmatpush.bf16.msrb.mxu1 %v8466_v34  ;;  %1695 = vmatpush.bf16.msrb.mxu3 %v8467_v19 }
 0x23a   :  { %1658 = vmatpush.bf16.msrb.mxu0 %v8468_v44  ;;  %1684 = vmatpush.bf16.msrb.mxu2 %v8469_v29 }
 0x23c   :  { %1670 = vmatpush.bf16.msrb.mxu1 %v8470_v25  ;;  %1696 = vmatpush.bf16.msrb.mxu3 %v8471_v38 }
 0x23e   :  { %1659 = vmatpush.bf16.msrb.mxu0 %v8472_v47  ;;  %1685 = vmatpush.bf16.msrb.mxu2 %v8389_v27 }
 0x240   :  { %1671 = vmatpush.bf16.msrb.mxu1 %v8390_v22  ;;  %1697 = vmatpush.bf16.msrb.mxu3 %v8473_v3 }
 0x242   :  { %1660 = vmatpush.bf16.msrb.mxu0 %v8474_v24  ;;  %1686 = vmatpush.bf16.msrb.mxu2 %v8393_v26 }
 0x244   :  { %1672 = vmatpush.bf16.msrb.mxu1 %v8394_v62  ;;  %1698 = vmatpush.bf16.msrb.mxu3 %v8395_v59  ;;  %v8480_v59 = vld [vmem:[#allocation2_spill] sm:$0xff] }
 0x246   :  { %1661 = vmatpush.bf16.msrb.mxu0 %v5795_v53  ;;  %1687 = vmatpush.bf16.msrb.mxu2 %v8396_v14  ;;  %v8481_v53 = vld [vmem:[#allocation4_spill] sm:$0xff]  ;;  %v8482_v14 = vld [vmem:[#allocation123_spill] sm:$0xff] }
 0x248   :  { %1673 = vmatpush.bf16.msrb.mxu1 %v8397_v4  ;;  %1699 = vmatpush.bf16.msrb.mxu3 %v8398_v2  ;;  %v8483_v4 = vld [vmem:[#allocation125_spill] sm:$0xff] }
 0x24a   :  { %1662 = vmatpush.bf16.msrb.mxu0 %v5831_v40  ;;  %1688 = vmatpush.bf16.msrb.mxu2 %v8475_v33  ;;  %v8484_v33 = vld [vmem:[#allocation6_spill] sm:$0xff] }
 0x24c   :  { %1674 = vmatpush.bf16.msrb.mxu1 %v8476_v16  ;;  %1700 = vmatpush.bf16.msrb.mxu3 %v8477_v37  ;;  %v8485_v16 = vld [vmem:[#allocation8_spill] sm:$0xff]  ;;  %v8486_v37 = vld [vmem:[#allocation127_spill] sm:$0xff] }
 0x24e   :  { %1663 = vmatpush.bf16.msrb.mxu0 %v8478_v11  ;;  %1689 = vmatpush.bf16.msrb.mxu2 %v8479_v46  ;;  %v8487_v11 = vld [vmem:[#allocation129_spill] sm:$0xff]  ;;  %v8488_v46 = vld [vmem:[#allocation3_spill] sm:$0xff] }
 0x250   :  { %1675 = vmatpush.bf16.msrb.mxu1 %v8482_v14  ;;  %1701 = vmatpush.bf16.msrb.mxu3 %v8483_v4  ;;  %v8490_v4 = vld [vmem:[#allocation10_spill] sm:$0xff]  ;;  %v8491_v14 = vld [vmem:[#allocation12_spill] sm:$0xff] }
 0x251   :  { %1664 = vmatmul.bf16.vlgmr.msrb.gmra.mxu0 %v6323_v10  ;;  %1690 = vmatmul.bf16.vlgmr.msrb.gmra.mxu2 %v6323_v10  ;;  %v8492_v10 = vld [vmem:[#allocation7_spill] sm:$0xff] }
 0x252   :  { %1853 = vmatpush.bf16.msra.mxu0 %v8480_v59  ;;  %1879 = vmatpush.bf16.msra.mxu2 %v8481_v53  ;;  %v8489_v59 = vld [vmem:[#allocation5_spill] sm:$0xff]  ;;  %v8499_v53 = vld [vmem:[#allocation20_spill] sm:$0xff] }
 0x254   :  { %1676 = vmatpush.bf16.msrb.mxu1 %v8486_v37  ;;  %1702 = vmatpush.bf16.msrb.mxu3 %v8487_v11  ;;  %v8495_v37 = vld [vmem:[#allocation16_spill] sm:$0xff]  ;;  %v8496_v11 = vld [vmem:[#allocation11_spill] sm:$0xff] }
 0x256   :  { %1854 = vmatpush.bf16.msra.mxu0 %v8484_v33  ;;  %1880 = vmatpush.bf16.msra.mxu2 %v8485_v16  ;;  %v8493_v33 = vld [vmem:[#allocation9_spill] sm:$0xff]  ;;  %v8494_v16 = vld [vmem:[#allocation14_spill] sm:$0xff] }
 0x257   :  { %1677 = vmatmul.bf16.vlgmr.msrb.gmra.mxu1 %v6329_v45  ;;  %1703 = vmatmul.bf16.vlgmr.msrb.gmra.mxu3 %v6329_v45  ;;  %v8500_v45 = vld [vmem:[#allocation15_spill] sm:$0xff] }
 0x258   :  { %1866 = vmatpush.bf16.msra.mxu1 %v8488_v46  ;;  %1892 = vmatpush.bf16.msra.mxu3 %v8489_v59  ;;  %v8497_v46 = vld [vmem:[#allocation13_spill] sm:$0xff]  ;;  %v8498_v59 = vld [vmem:[#allocation18_spill] sm:$0xff] }
 0x25a   :  { %1855 = vmatpush.bf16.msra.mxu0 %v8490_v4  ;;  %1881 = vmatpush.bf16.msra.mxu2 %v8491_v14  ;;  %v8501_v4 = vld [vmem:[#allocation17_spill] sm:$0xff]  ;;  %v8502_v14 = vld [vmem:[#allocation22_spill] sm:$0xff] }
 0x25c   :  { %1867 = vmatpush.bf16.msra.mxu1 %v8492_v10  ;;  %1893 = vmatpush.bf16.msra.mxu3 %v8493_v33  ;;  %v8503_v10 = vld [vmem:[#allocation24_spill] sm:$0xff]  ;;  %v8504_v33 = vld [vmem:[#allocation19_spill] sm:$0xff] }
 0x25e   :  { %1856 = vmatpush.bf16.msra.mxu0 %v8494_v16  ;;  %1882 = vmatpush.bf16.msra.mxu2 %v8495_v37  ;;  %v8505_v16 = vld [vmem:[#allocation21_spill] sm:$0xff]  ;;  %v8506_v37 = vld [vmem:[#allocation26_spill] sm:$0xff] }
 0x260   :  { %1868 = vmatpush.bf16.msra.mxu1 %v8496_v11  ;;  %1894 = vmatpush.bf16.msra.mxu3 %v8497_v46  ;;  %v8507_v11 = vld [vmem:[#allocation28_spill] sm:$0xff]  ;;  %v8508_v46 = vld [vmem:[#allocation23_spill] sm:$0xff] }
 0x262   :  { %1857 = vmatpush.bf16.msra.mxu0 %v8498_v59  ;;  %1883 = vmatpush.bf16.msra.mxu2 %v8499_v53  ;;  %v8509_v59 = vld [vmem:[#allocation25_spill] sm:$0xff]  ;;  %v8510_v53 = vld [vmem:[#allocation30_spill] sm:$0xff] }
 0x264   :  { %1869 = vmatpush.bf16.msra.mxu1 %v8500_v45  ;;  %1895 = vmatpush.bf16.msra.mxu3 %v8501_v4  ;;  %v8511_v45 = vld [vmem:[#allocation32_spill] sm:$0xff]  ;;  %v8512_v4 = vld [vmem:[#allocation34_spill] sm:$0xff] }
 0x266   :  { %1858 = vmatpush.bf16.msra.mxu0 %v8502_v14  ;;  %1884 = vmatpush.bf16.msra.mxu2 %v8503_v10  ;;  %v8513_v14 = vld [vmem:[#allocation36_spill] sm:$0xff]  ;;  %v8514_v10 = vld [vmem:[#allocation27_spill] sm:$0xff] }
 0x268   :  { %1870 = vmatpush.bf16.msra.mxu1 %v8504_v33  ;;  %1896 = vmatpush.bf16.msra.mxu3 %v8505_v16  ;;  %v8515_v33 = vld [vmem:[#allocation29_spill] sm:$0xff]  ;;  %v8516_v16 = vld [vmem:[#allocation38_spill] sm:$0xff] }
 0x26a   :  { %1859 = vmatpush.bf16.msra.mxu0 %v8506_v37  ;;  %1885 = vmatpush.bf16.msra.mxu2 %v8507_v11  ;;  %v8517_v37 = vld [vmem:[#allocation40_spill] sm:$0xff]  ;;  %v8518_v11 = vld [vmem:[#allocation31_spill] sm:$0xff] }
 0x26c   :  { %1871 = vmatpush.bf16.msra.mxu1 %v8508_v46  ;;  %1897 = vmatpush.bf16.msra.mxu3 %v8509_v59  ;;  %v8519_v46 = vld [vmem:[#allocation33_spill] sm:$0xff]  ;;  %v8520_v59 = vld [vmem:[#allocation35_spill] sm:$0xff] }
 0x26e   :  { %1860 = vmatpush.bf16.msra.mxu0 %v8510_v53  ;;  %1886 = vmatpush.bf16.msra.mxu2 %v8511_v45  ;;  %v8521_v53 = vld [vmem:[#allocation37_spill] sm:$0xff]  ;;  %v8522_v45 = vld [vmem:[#allocation42_spill] sm:$0xff] }
 0x270   :  { %1872 = vmatpush.bf16.msra.mxu1 %v8514_v10  ;;  %1898 = vmatpush.bf16.msra.mxu3 %v8515_v33  ;;  %v8525_v10 = vld [vmem:[#allocation41_spill] sm:$0xff]  ;;  %v8526_v33 = vld [vmem:[#allocation46_spill] sm:$0xff] }
 0x272   :  { %1905 = vmatpush.bf16.msrb.mxu0 %v8512_v4  ;;  %1931 = vmatpush.bf16.msrb.mxu2 %v8513_v14  ;;  %v8523_v4 = vld [vmem:[#allocation44_spill] sm:$0xff]  ;;  %v8524_v14 = vld [vmem:[#allocation39_spill] sm:$0xff] }
 0x274   :  { %1873 = vmatpush.bf16.msra.mxu1 %v8518_v11  ;;  %1899 = vmatpush.bf16.msra.mxu3 %v8519_v46  ;;  %v8529_v11 = vld [vmem:[#allocation45_spill] sm:$0xff]  ;;  %v8530_v46 = vld [vmem:[#allocation50_spill] sm:$0xff] }
 0x276   :  { %1906 = vmatpush.bf16.msrb.mxu0 %v8516_v16  ;;  %1932 = vmatpush.bf16.msrb.mxu2 %v8517_v37  ;;  %v8527_v16 = vld [vmem:[#allocation48_spill] sm:$0xff]  ;;  %v8528_v37 = vld [vmem:[#allocation43_spill] sm:$0xff] }
 0x278   :  { %1918 = vmatpush.bf16.msrb.mxu1 %v8520_v59  ;;  %1944 = vmatpush.bf16.msrb.mxu3 %v8521_v53  ;;  %v8531_v59 = vld [vmem:[#allocation52_spill] sm:$0xff]  ;;  %v8532_v53 = vld [vmem:[#allocation47_spill] sm:$0xff] }
 0x27a   :  { %1907 = vmatpush.bf16.msrb.mxu0 %v8522_v45  ;;  %1933 = vmatpush.bf16.msrb.mxu2 %v8523_v4  ;;  %v8533_v45 = vld [vmem:[#allocation49_spill] sm:$0xff]  ;;  %v8534_v4 = vld [vmem:[#allocation54_spill] sm:$0xff] }
 0x27c   :  { %1919 = vmatpush.bf16.msrb.mxu1 %v8524_v14  ;;  %1945 = vmatpush.bf16.msrb.mxu3 %v8525_v10  ;;  %v8535_v14 = vld [vmem:[#allocation56_spill] sm:$0xff]  ;;  %v8536_v10 = vld [vmem:[#allocation51_spill] sm:$0xff] }
 0x27e   :  { %1908 = vmatpush.bf16.msrb.mxu0 %v8526_v33  ;;  %1934 = vmatpush.bf16.msrb.mxu2 %v8527_v16  ;;  %v8537_v33 = vld [vmem:[#allocation53_spill] sm:$0xff]  ;;  %v8538_v16 = vld [vmem:[#allocation58_spill] sm:$0xff] }
 0x280   :  { %1920 = vmatpush.bf16.msrb.mxu1 %v8528_v37  ;;  %1946 = vmatpush.bf16.msrb.mxu3 %v8529_v11  ;;  %v8539_v37 = vld [vmem:[#allocation60_spill] sm:$0xff]  ;;  %v8540_v11 = vld [vmem:[#allocation55_spill] sm:$0xff] }
 0x282   :  { %1909 = vmatpush.bf16.msrb.mxu0 %v8530_v46  ;;  %1935 = vmatpush.bf16.msrb.mxu2 %v8531_v59  ;;  %v8541_v46 = vld [vmem:[#allocation57_spill] sm:$0xff]  ;;  %v8542_v59 = vld [vmem:[#allocation62_spill] sm:$0xff] }
 0x284   :  { %1921 = vmatpush.bf16.msrb.mxu1 %v8532_v53  ;;  %1947 = vmatpush.bf16.msrb.mxu3 %v8533_v45  ;;  %v8543_v53 = vld [vmem:[#allocation64_spill] sm:$0xff]  ;;  %v8544_v45 = vld [vmem:[#allocation59_spill] sm:$0xff] }
 0x286   :  { %1910 = vmatpush.bf16.msrb.mxu0 %v8534_v4  ;;  %1936 = vmatpush.bf16.msrb.mxu2 %v8535_v14  ;;  %v8545_v4 = vld [vmem:[#allocation61_spill] sm:$0xff]  ;;  %v8546_v14 = vld [vmem:[#allocation63_spill] sm:$0xff] }
 0x288   :  { %1922 = vmatpush.bf16.msrb.mxu1 %v8536_v10  ;;  %1948 = vmatpush.bf16.msrb.mxu3 %v8537_v33  ;;  %v8547_v10 = vld [vmem:[#allocation65_spill] sm:$0xff] }
 0x28a   :  { %1911 = vmatpush.bf16.msrb.mxu0 %v8538_v16  ;;  %1937 = vmatpush.bf16.msrb.mxu2 %v8539_v37 }
 0x28c   :  { %1923 = vmatpush.bf16.msrb.mxu1 %v8540_v11  ;;  %1949 = vmatpush.bf16.msrb.mxu3 %v8541_v46 }
 0x28e   :  { %1912 = vmatpush.bf16.msrb.mxu0 %v8542_v59  ;;  %1938 = vmatpush.bf16.msrb.mxu2 %v8543_v53  ;;  %v1509_v33 = vpop.f32.mrf.mxu0 }
 0x290   :  { %1924 = vmatpush.bf16.msrb.mxu1 %v8544_v45  ;;  %1950 = vmatpush.bf16.msrb.mxu3 %v8545_v4 }
 0x294   :  { %1925 = vmatpush.bf16.msrb.mxu1 %v8546_v14  ;;  %1951 = vmatpush.bf16.msrb.mxu3 %v8547_v10  ;;  %v1522_v16 = vpop.f32.mrf.mxu1  ;;  %v1535_v40 = vpop.f32.mrf.mxu2  ;;  %v4224_v14 = vld [vmem:[%s7921_s0 + $0x90] sm:$0xff] }
 0x295   :  { %v1523_v27 = vadd.f32 %v1522_v16, %v1509_v33 }
 0x296   :  { %v1511_v37 = vpop.f32.mrf.mxu0 }
 0x29a   :  { %v1548_v2 = vpop.f32.mrf.mxu3 }
 0x29c   :  { %v1524_v11 = vpop.f32.mrf.mxu1  ;;  %v1537_v62 = vpop.f32.mrf.mxu2 }
 0x29d   :  { %v4222_v62 = vld [vmem:[%s7921_s0 + $0x80] sm:$0xff] }
 0x29e   :  { %v1561_v46 = vpop.f32.mrf.mxu0 }
 0x2a2   :  { %v1550_v26 = vpop.f32.mrf.mxu3 }
 0x2a3   :  { %v4225_v26 = vld [vmem:[%s7921_s0 + $0x98] sm:$0xff] }
 0x2a4   :  { %v1574_v59 = vpop.f32.mrf.mxu1  ;;  %v1587_v24 = vpop.f32.mrf.mxu2 }
 0x2a5   :  { %v1575_v45 = vadd.f32 %v1574_v59, %v1561_v46  ;;  %v1708_v59 = vadd.f32 %v4222_v62, %v1523_v27  ;;  %v1549_v46 = vadd.f32 %v1548_v2, %v1535_v40 }
 0x2a6   :  { %v1563_v53 = vpop.f32.mrf.mxu0 }
 0x2a7   :  { %v1710_v47 = vadd.f32 %v4224_v14, %v1575_v45 }
 0x2a9   :  { %v4232_v11 = vmul.f32 -1.442695, %v1710_v47 }
 0x2aa   :  { %v1600_v3 = vpop.f32.mrf.mxu3 }
 0x2ab   :  { %v1601_v37 = vadd.f32 %v1600_v3, %v1587_v24  ;;  %4500 = vpow2.f32 %v4232_v11 }
 0x2ac   :  { %v1576_v4 = vpop.f32.mrf.mxu1  ;;  %v1589_v10 = vpop.f32.mrf.mxu2 }
 0x2ad   :  { %v4223_v4 = vld [vmem:[%s7921_s0 + $0x88] sm:$0xff]  ;;  %v1711_v14 = vadd.f32 %v4225_v26, %v1601_v37  ;;  %v4230_v10 = vmul.f32 -1.442695, %v1708_v59 }
 0x2ae   :  { %v1613_v22 = vpop.f32.mrf.mxu0  ;;  %v1709_v3 = vadd.f32 %v4223_v4, %v1549_v46 }
 0x2af   :  { %v4233_v24 = vmul.f32 -1.442695, %v1711_v14  ;;  %4502 = vpow2.f32 %v4230_v10 }
 0x2b0   :  { %v4231_v25 = vmul.f32 -1.442695, %v1709_v3  ;;  %v4228_v3 = vld [vmem:[%s7921_s0 + $0xb0] sm:$0xff] }
 0x2b1   :  { %v4501_v27 = vpop.eup %4500  ;;  %4504 = vpow2.f32 %v4233_v24 }
 0x2b2   :  { %v1602_v53 = vpop.f32.mrf.mxu3  ;;  %4506 = vpow2.f32 %v4231_v25  ;;  %v6485_v2 = vadd.f32 1.0, %v4501_v27 }
 0x2b4   :  { %v6480_v38 = vpop.f32.mrf.mxu2  ;;  %v1626_v33 = vpop.f32.mrf.mxu1  ;;  %4508 = vrcp.f32 %v6485_v2  ;;  %vm1767_vm1 = vweird.f32 %v6485_v2 }
 0x2b5   :  { %v4503_v47 = vpop.eup %4502 }
 0x2b6   :  { %v1615_v16 = vpop.f32.mrf.mxu0  ;;  %v6487_v37 = vadd.f32 1.0, %v4503_v47 }
 0x2b7   :  { %v4505_v62 = vpop.eup %4504 }
 0x2b8   :  { %v4507_v26 = vpop.eup %4506  ;;  %v6490_v59 = vadd.f32 1.0, %v4505_v62  ;;  %4510 = vrcp.f32 %v6487_v37  ;;  %vm1729_vm3 = vweird.f32 %v6487_v37 }
 0x2b9   :  { %v6493_v11 = vadd.f32 1.0, %v4507_v26  ;;  %v1627_v26 = vadd.f32 %v1626_v33, %v1613_v22 }
 0x2ba   :  { %v1652_v45 = vpop.f32.mrf.mxu3  ;;  %v6495_v46 = vpop.eup %4508  ;;  %4512 = vrcp.f32 %v6490_v59  ;;  %vm1782_vm8 = vweird.f32 %v6490_v59 }
 0x2bb   :  { %4514 = vrcp.f32 %v6493_v11  ;;  %vm1768_vm0 = vweird.f32 %v6495_v46  ;;  %vm1744_vm12 = vweird.f32 %v6493_v11 }
 0x2bc   :  { %v1641_v53 = vpop.f32.mrf.mxu2  ;;  %v1628_v40 = vpop.f32.mrf.mxu1  ;;  %vm6534_vm2 = vmor %vm1767_vm1, %vm1768_vm0 }
 0x2be   :  { %v6501_v4 = vpop.eup %4510 }
 0x2bf   :  { %v1725_v16 = vmul.f32 %v6501_v4, %v6487_v37  ;;  %vm1730_vm4 = vweird.f32 %v6501_v4 }
 0x2c0   :  { %v6503_v14 = vpop.eup %4512  ;;  %vm6552_vm7 = vmor %vm1729_vm3, %vm1730_vm4 }
 0x2c1   :  { %v6510_v40 = vpop.eup %4514  ;;  %v1778_v47 = vmul.f32 %v6503_v14, %v6490_v59  ;;  %v1726_v19 = vsub.f32 1.0, %v1725_v16  ;;  %vm1783_vm5 = vweird.f32 %v6503_v14 }
 0x2c2   :  { %v1654_v29 = vpop.f32.mrf.mxu3  ;;  %v1740_v8 = vmul.f32 %v6510_v40, %v6493_v11  ;;  %vm6561_vm9 = vmor %vm1782_vm8, %vm1783_vm5  ;;  %vm1745_vm11 = vweird.f32 %v6510_v40 }
 0x2c3   :  { %v1763_v29 = vmul.f32 %v6495_v46, %v6485_v2  ;;  %v1727_v33 = vmul.f32 %v6501_v4, %v1726_v19  ;;  %vm1746_vm14 = vmor %vm1744_vm12, %vm1745_vm11 }
 0x2c5   :  { %v1764_v10 = vsub.f32 1.0, %v1763_v29  ;;  %v4226_v29 = vld [vmem:[%s7921_s0 + $0xa0] sm:$0xff] }
 0x2c7   :  { %v1765_v34 = vmul.f32 %v6495_v46, %v1764_v10 }
 0x2c9   :  { %v1766_v16 = vadd.f32 %v6495_v46, %v1765_v34  ;;  %v1750_v34 = vand.u32 2147483648, %v6493_v11 }
 0x2ce   :  { %v1665_v25 = vpop.f32.mrf.mxu0 }
 0x2d4   :  { %v1678_v24 = vpop.f32.mrf.mxu1  ;;  %v1691_v53 = vpop.f32.mrf.mxu2 }
 0x2d5   :  { %v1679_v27 = vadd.f32 %v1678_v24, %v1665_v25  ;;  %v1779_v25 = vsub.f32 1.0, %v1778_v47  ;;  %v4229_v24 = vld [vmem:[%s7921_s0 + $0xb8] sm:$0xff]  ;;  %v1653_v47 = vadd.f32 %v1652_v45, %v6480_v38  ;;  %v1728_v38 = vadd.f32 %v6501_v4, %v1727_v33 }
 0x2d6   :  { %v1667_v62 = vpop.f32.mrf.mxu0  ;;  %v1735_v45 = vand.u32 2147483648, %v6487_v37  ;;  %v1788_v33 = vand.u32 2147483648, %v6490_v59 }
 0x2d7   :  { %v1714_v44 = vadd.f32 %v4228_v3, %v1679_v27  ;;  %v1712_v62 = vadd.f32 %v4226_v29, %v1627_v26  ;;  %v1741_v27 = vsub.f32 1.0, %v1740_v8  ;;  %v1780_v26 = vmul.f32 %v6503_v14, %v1779_v25 }
 0x2d8   :  { %v1733_v8 = vand.u32 2147483647, %v6487_v37  ;;  %v1736_v37 = vor.u32 1.1754944e-38, %v1735_v45 }
 0x2d9   :  { %v4234_v42 = vmul.f32 -1.442695, %v1714_v44  ;;  %v1773_v44 = vand.u32 2147483648, %v6485_v2 }
 0x2da   :  { %v1704_v17 = vpop.f32.mrf.mxu3  ;;  %vm1734_vm10 = vcmp.eq.f32.partialorder %v1733_v8, 8.507059e+37 }
 0x2db   :  { %4516 = vpow2.f32 %v4234_v42  ;;  %v1705_v22 = vadd.f32 %v1704_v17, %v1691_v53  ;;  %v1771_v17 = vand.u32 2147483647, %v6485_v2  ;;  %v4227_v42 = vld [vmem:[%s7921_s0 + $0xa8] sm:$0xff]  ;;  %v1770_v2 = vsel %vm6534_vm2, %v6495_v46, %v1766_v16 }
 0x2dc   :  { %v1680_v10 = vpop.f32.mrf.mxu1  ;;  %v1693_v3 = vpop.f32.mrf.mxu2  ;;  %4518 = vtanh.f32 %v1712_v62  ;;  %v1774_v29 = vor.u32 1.1754944e-38, %v1773_v44  ;;  %v1713_v25 = vadd.f32 %v4227_v42, %v1653_v47  ;;  %v1732_v16 = vsel %vm6552_vm7, %v6501_v4, %v1728_v38 }
 0x2dd   :  { %v1715_v5 = vadd.f32 %v4229_v24, %v1705_v22  ;;  %v1742_v24 = vmul.f32 %v6510_v40, %v1741_v27  ;;  %vm1772_vm6 = vcmp.eq.f32.partialorder %v1771_v17, 8.507059e+37  ;;  %v1786_v3 = vand.u32 2147483647, %v6490_v59 }
 0x2de   :  { %v1775_v46 = vsel %vm1772_vm6, %v1774_v29, %v1770_v2  ;;  %v1789_v17 = vor.u32 1.1754944e-38, %v1788_v33  ;;  %v1737_v42 = vsel %vm1734_vm10, %v1736_v37, %v1732_v16  ;;  %v1751_v29 = vor.u32 1.1754944e-38, %v1750_v34 }
 0x2df   :  { %v4235_v19 = vmul.f32 -1.442695, %v1715_v5  ;;  %v1781_v5 = vadd.f32 %v6503_v14, %v1780_v26  ;;  %v1832_v47 = vmul.f32 %v1775_v46, %v6315_v21  ;;  %v1743_v26 = vadd.f32 %v6510_v40, %v1742_v24 }
 0x2e0   :  { %vm1787_vm13 = vcmp.eq.f32.partialorder %v1786_v3, 8.507059e+37 }
 0x2e1   :  { %v4517_v53 = vpop.eup %4516  ;;  %4520 = vpow2.f32 %v4235_v19  ;;  %v1785_v4 = vsel %vm6561_vm9, %v6503_v14, %v1781_v5  ;;  %v1748_v19 = vand.u32 2147483647, %v6493_v11 }
 0x2e2   :  { %v1800_v62 = vadd.f32 1.0, %v4517_v53  ;;  %v1706_v22 = vpop.f32.mrf.mxu3  ;;  %v4519_v27 = vpop.eup %4518  ;;  %v1790_v38 = vsel %vm1787_vm13, %v1789_v17, %v1785_v4  ;;  %v1747_v53 = vsel %vm1746_vm14, %v6510_v40, %v1743_v26 }
 0x2e3   :  { %v1834_v8 = vmul.f32 %v4519_v27, %v1737_v42  ;;  %vm1749_vm15 = vcmp.eq.f32.partialorder %v1748_v19, 8.507059e+37  ;;  %v1833_v24 = vmul.f32 %v1790_v38, %v6320_v7 }
 0x2e4   :  { %4522 = vrcp.f32 %v1800_v62  ;;  %v1752_v5 = vsel %vm1749_vm15, %v1751_v29, %v1747_v53  ;;  %v1813_v33 = vand.u32 2147483648, %v1800_v62  ;;  %v1811_v46 = vand.u32 2147483647, %v1800_v62  ;;  %v8555_v29 = vld [vmem:[#allocation104_spill] sm:$0xff] }
 0x2e5   :  { %4524 = vtanh.f32 %v1713_v25  ;;  %v6574_v2 = vadd.f32 %v1834_v8, %v1832_v47  ;;  %vm1807_vm1 = vweird.f32 %v1800_v62 }
 0x2e6   :  { %v1814_v44 = vor.u32 1.1754944e-38, %v1813_v33  ;;  %vm1812_vm3 = vcmp.eq.f32.partialorder %v1811_v46, 8.507059e+37  ;;  %v8561_v33 = vld [vmem:[#allocation108_spill] sm:$0xff]  ;;  %v8563_v46 = vld [vmem:[#allocation105_spill] sm:$0xff] }
 0x2e7   :  { %v4521_v59 = vpop.eup %4520 }
 0x2e8   :  { %v1801_v21 = vadd.f32 1.0, %v4521_v59 }
 0x2ea   :  { %v4523_v45 = vpop.eup %4522  ;;  %4526 = vrcp.f32 %v1801_v21  ;;  %v1828_v4 = vand.u32 2147483648, %v1801_v21  ;;  %v1826_v42 = vand.u32 2147483647, %v1801_v21  ;;  %vm1822_vm5 = vweird.f32 %v1801_v21 }
 0x2eb   :  { %v4525_v14 = vpop.eup %4524  ;;  %v1803_v25 = vmul.f32 %v4523_v45, %v1800_v62  ;;  %4528 = vtanh.f32 %v6574_v2  ;;  %vm1808_vm0 = vweird.f32 %v4523_v45 }
 0x2ec   :  { %v1835_v11 = vmul.f32 %v4525_v14, %v1752_v5  ;;  %vm1809_vm2 = vmor %vm1807_vm1, %vm1808_vm0  ;;  %v1829_v62 = vor.u32 1.1754944e-38, %v1828_v4  ;;  %vm1827_vm7 = vcmp.eq.f32.partialorder %v1826_v42, 8.507059e+37  ;;  %v8558_v5 = vld [vmem:[#allocation99_spill] sm:$0xff]  ;;  %v8572_v4 = vld [vmem:[#allocation118_spill] sm:$0xff] }
 0x2ed   :  { %v1804_v22 = vsub.f32 1.0, %v1803_v25  ;;  %v8556_v25 = vld [vmem:[#allocation95_spill] sm:$0xff]  ;;  %v8575_v42 = vld [vmem:[#allocation117_spill] sm:$0xff] }
 0x2ee   :  { %v6579_v3 = vadd.f32 %v1835_v11, %v1833_v24  ;;  %v8557_v24 = vld [vmem:[#allocation97_spill] sm:$0xff]  ;;  %v8560_v11 = vld [vmem:[#allocation106_spill] sm:$0xff] }
 0x2ef   :  { %v1805_v10 = vmul.f32 %v4523_v45, %v1804_v22  ;;  %v8559_v22 = vld [vmem:[#allocation101_spill] sm:$0xff] }
 0x2f0   :  { %v4527_v16 = vpop.eup %4526  ;;  %4530 = vtanh.f32 %v6579_v3 }
 0x2f1   :  { %v1806_v40 = vadd.f32 %v4523_v45, %v1805_v10  ;;  %v1818_v27 = vmul.f32 %v4527_v16, %v1801_v21  ;;  %v4529_v47 = vpop.eup %4528  ;;  %vm1823_vm4 = vweird.f32 %v4527_v16  ;;  %v8554_v21 = vld [vmem:[#allocation102_spill] sm:$0xff]  ;;  %v8562_v10 = vld [vmem:[#allocation103_spill] sm:$0xff] }
 0x2f2   :  { %vm1824_vm6 = vmor %vm1822_vm5, %vm1823_vm4 }
 0x2f3   :  { %v1810_v37 = vsel %vm1809_vm2, %v4523_v45, %v1806_v40  ;;  %v1819_v7 = vsub.f32 1.0, %v1818_v27  ;;  %v8565_v40 = vld [vmem:[#allocation112_spill] sm:$0xff]  ;;  %v8566_v27 = vld [vmem:[#allocation107_spill] sm:$0xff] }
 0x2f4   :  { %v1815_v26 = vsel %vm1812_vm3, %v1814_v44, %v1810_v37  ;;  %v8567_v44 = vld [vmem:[#allocation109_spill] sm:$0xff]  ;;  %v8568_v37 = vld [vmem:[#allocation114_spill] sm:$0xff] }
 0x2f5   :  { %v1840_v59 = vmul.f32 %v4529_v47, %v1815_v26  ;;  %v1820_v17 = vmul.f32 %v4527_v16, %v1819_v7  ;;  %v8569_v7 = vld [vmem:[#allocation116_spill] sm:$0xff]  ;;  %v8570_v47 = vld [vmem:[#allocation111_spill] sm:$0xff]  ;;  %v8571_v26 = vld [vmem:[#allocation113_spill] sm:$0xff] }
 0x2f6   :  { %v4531_v38 = vpop.eup %4530 }
 0x2f7   :  { %v6582_v34 = vpack.c.bf16 %v1840_v59, %v1840_v59  ;;  %v1821_v8 = vadd.f32 %v4527_v16, %v1820_v17  ;;  %v8573_v59 = vld [vmem:[#allocation120_spill] sm:$0xff]  ;;  %v8574_v17 = vld [vmem:[#allocation115_spill] sm:$0xff] }
 0x2f9   :  { %v1825_v19 = vsel %vm1824_vm6, %v4527_v16, %v1821_v8  ;;  %1861 = vmatmul.bf16.vlgmr.msra.gmra.mxu0 %v6582_v34  ;;  %1887 = vmatmul.bf16.vlgmr.msra.gmra.mxu2 %v6582_v34  ;;  %v8564_v16 = vld [vmem:[#allocation110_spill] sm:$0xff] }
 0x2fa   :  { %v1830_v45 = vsel %vm1827_vm7, %v1829_v62, %v1825_v19  ;;  %1957 = vmatpush.bf16.msra.mxu0 %v8351_v15  ;;  %1983 = vmatpush.bf16.msra.mxu2 %v8352_v55  ;;  %v8576_v8 = vld [vmem:[#allocation122_spill] sm:$0xff]  ;;  %v8577_v62 = vld [vmem:[#allocation124_spill] sm:$0xff]  ;;  %v8578_v19 = vld [vmem:[#allocation119_spill] sm:$0xff] }
 0x2fb   :  { %v1841_v53 = vmul.f32 %v4531_v38, %v1830_v45  ;;  %v8579_v38 = vld [vmem:[#allocation121_spill] sm:$0xff]  ;;  %v8580_v45 = vld [vmem:[#allocation126_spill] sm:$0xff] }
 0x2fd   :  { %v6588_v14 = vpack.c.bf16 %v1841_v53, %v1841_v53  ;;  %v8581_v53 = vld [vmem:[#allocation128_spill] sm:$0xff] }
 0x2fe   :  { %1958 = vmatpush.bf16.msra.mxu0 %v8353_v63  ;;  %1984 = vmatpush.bf16.msra.mxu2 %v8354_v6 }
 0x2ff   :  { %1874 = vmatmul.bf16.vlgmr.msra.gmra.mxu1 %v6588_v14  ;;  %1900 = vmatmul.bf16.vlgmr.msra.gmra.mxu3 %v6588_v14 }
 0x300   :  { %1970 = vmatpush.bf16.msra.mxu1 %v8355_v60  ;;  %1996 = vmatpush.bf16.msra.mxu3 %v8356_v23 }
 0x302   :  { %1959 = vmatpush.bf16.msra.mxu0 %v8357_v54  ;;  %1985 = vmatpush.bf16.msra.mxu2 %v8358_v61 }
 0x304   :  { %1971 = vmatpush.bf16.msra.mxu1 %v8359_v51  ;;  %1997 = vmatpush.bf16.msra.mxu3 %v8360_v49 }
 0x306   :  { %1960 = vmatpush.bf16.msra.mxu0 %v8361_v1  ;;  %1986 = vmatpush.bf16.msra.mxu2 %v8362_v52 }
 0x308   :  { %1972 = vmatpush.bf16.msra.mxu1 %v8363_v39  ;;  %1998 = vmatpush.bf16.msra.mxu3 %v8364_v43 }
 0x309   :  { %1913 = vmatmul.bf16.vlgmr.msrb.gmra.mxu0 %v6582_v34  ;;  %1939 = vmatmul.bf16.vlgmr.msrb.gmra.mxu2 %v6582_v34 }
 0x30a   :  { %1961 = vmatpush.bf16.msra.mxu0 %v8365_v31  ;;  %1987 = vmatpush.bf16.msra.mxu2 %v8366_v35 }
 0x30c   :  { %1973 = vmatpush.bf16.msra.mxu1 %v8367_v57  ;;  %1999 = vmatpush.bf16.msra.mxu3 %v8368_v9 }
 0x30e   :  { %1962 = vmatpush.bf16.msra.mxu0 %v8369_v41  ;;  %1988 = vmatpush.bf16.msra.mxu2 %v8370_v20 }
 0x30f   :  { %1926 = vmatmul.bf16.vlgmr.msrb.gmra.mxu1 %v6588_v14  ;;  %1952 = vmatmul.bf16.vlgmr.msrb.gmra.mxu3 %v6588_v14 }
 0x310   :  { %1974 = vmatpush.bf16.msra.mxu1 %v8371_v30  ;;  %2000 = vmatpush.bf16.msra.mxu3 %v8372_v48 }
 0x312   :  { %1963 = vmatpush.bf16.msra.mxu0 %v8452_v28  ;;  %1989 = vmatpush.bf16.msra.mxu2 %v8453_v0 }
 0x314   :  { %1975 = vmatpush.bf16.msra.mxu1 %v8454_v13  ;;  %2001 = vmatpush.bf16.msra.mxu3 %v8455_v12 }
 0x316   :  { %1964 = vmatpush.bf16.msra.mxu0 %v8456_v32  ;;  %1990 = vmatpush.bf16.msra.mxu2 %v8457_v36 }
 0x318   :  { %1976 = vmatpush.bf16.msra.mxu1 %v8460_v18  ;;  %2002 = vmatpush.bf16.msra.mxu3 %v8461_v58 }
 0x319   :  { %1965 = vmatmul.bf16.vlgmr.msra.gmra.mxu0 %v6582_v34  ;;  %1991 = vmatmul.bf16.vlgmr.msra.gmra.mxu2 %v6582_v34 }
 0x31a   :  { %2009 = vmatpush.bf16.msrb.mxu0 %v8458_v56  ;;  %2035 = vmatpush.bf16.msrb.mxu2 %v8459_v50 }
 0x31c   :  { %1977 = vmatpush.bf16.msra.mxu1 %v8556_v25  ;;  %2003 = vmatpush.bf16.msra.mxu3 %v8557_v24 }
 0x31e   :  { %2010 = vmatpush.bf16.msrb.mxu0 %v8554_v21  ;;  %2036 = vmatpush.bf16.msrb.mxu2 %v8555_v29 }
 0x31f   :  { %1978 = vmatmul.bf16.vlgmr.msra.gmra.mxu1 %v6588_v14  ;;  %2004 = vmatmul.bf16.vlgmr.msra.gmra.mxu3 %v6588_v14 }
 0x320   :  { %2022 = vmatpush.bf16.msrb.mxu1 %v8558_v5  ;;  %2048 = vmatpush.bf16.msrb.mxu3 %v8559_v22 }
 0x322   :  { %2011 = vmatpush.bf16.msrb.mxu0 %v8560_v11  ;;  %2037 = vmatpush.bf16.msrb.mxu2 %v8561_v33 }
 0x324   :  { %2023 = vmatpush.bf16.msrb.mxu1 %v8562_v10  ;;  %2049 = vmatpush.bf16.msrb.mxu3 %v8563_v46 }
 0x326   :  { %2012 = vmatpush.bf16.msrb.mxu0 %v8564_v16  ;;  %2038 = vmatpush.bf16.msrb.mxu2 %v8565_v40 }
 0x328   :  { %2024 = vmatpush.bf16.msrb.mxu1 %v8566_v27  ;;  %2050 = vmatpush.bf16.msrb.mxu3 %v8567_v44 }
 0x32a   :  { %2013 = vmatpush.bf16.msrb.mxu0 %v8568_v37  ;;  %2039 = vmatpush.bf16.msrb.mxu2 %v8569_v7 }
 0x32c   :  { %2025 = vmatpush.bf16.msrb.mxu1 %v8570_v47  ;;  %2051 = vmatpush.bf16.msrb.mxu3 %v8571_v26  ;;  %v8582_v26 = vld [vmem:[#allocation2_spill] sm:$0xff] }
 0x32e   :  { %2014 = vmatpush.bf16.msrb.mxu0 %v8572_v4  ;;  %2040 = vmatpush.bf16.msrb.mxu2 %v8573_v59  ;;  %v8583_v4 = vld [vmem:[#allocation4_spill] sm:$0xff]  ;;  %v8584_v59 = vld [vmem:[#allocation123_spill] sm:$0xff] }
 0x330   :  { %2026 = vmatpush.bf16.msrb.mxu1 %v8574_v17  ;;  %2052 = vmatpush.bf16.msrb.mxu3 %v8575_v42  ;;  %v8585_v17 = vld [vmem:[#allocation125_spill] sm:$0xff] }
 0x332   :  { %2015 = vmatpush.bf16.msrb.mxu0 %v8576_v8  ;;  %2041 = vmatpush.bf16.msrb.mxu2 %v8577_v62  ;;  %v8586_v62 = vld [vmem:[#allocation6_spill] sm:$0xff] }
 0x334   :  { %2027 = vmatpush.bf16.msrb.mxu1 %v8578_v19  ;;  %2053 = vmatpush.bf16.msrb.mxu3 %v8579_v38  ;;  %v8587_v19 = vld [vmem:[#allocation8_spill] sm:$0xff]  ;;  %v8588_v38 = vld [vmem:[#allocation127_spill] sm:$0xff] }
 0x336   :  { %2016 = vmatpush.bf16.msrb.mxu0 %v8580_v45  ;;  %2042 = vmatpush.bf16.msrb.mxu2 %v8581_v53  ;;  %v8589_v45 = vld [vmem:[#allocation129_spill] sm:$0xff]  ;;  %v8590_v53 = vld [vmem:[#allocation3_spill] sm:$0xff] }
 0x338   :  { %2028 = vmatpush.bf16.msrb.mxu1 %v8584_v59  ;;  %2054 = vmatpush.bf16.msrb.mxu3 %v8585_v17  ;;  %v8592_v17 = vld [vmem:[#allocation10_spill] sm:$0xff]  ;;  %v8593_v59 = vld [vmem:[#allocation12_spill] sm:$0xff] }
 0x339   :  { %2017 = vmatmul.bf16.vlgmr.msrb.gmra.mxu0 %v6582_v34  ;;  %2043 = vmatmul.bf16.vlgmr.msrb.gmra.mxu2 %v6582_v34  ;;  %v8594_v34 = vld [vmem:[#allocation7_spill] sm:$0xff] }
 0x33a   :  { %2206 = vmatpush.bf16.msra.mxu0 %v8582_v26  ;;  %2232 = vmatpush.bf16.msra.mxu2 %v8583_v4  ;;  %v8591_v26 = vld [vmem:[#allocation5_spill] sm:$0xff]  ;;  %v8601_v4 = vld [vmem:[#allocation20_spill] sm:$0xff] }
 0x33c   :  { %2029 = vmatpush.bf16.msrb.mxu1 %v8588_v38  ;;  %2055 = vmatpush.bf16.msrb.mxu3 %v8589_v45  ;;  %v8597_v38 = vld [vmem:[#allocation16_spill] sm:$0xff]  ;;  %v8598_v45 = vld [vmem:[#allocation11_spill] sm:$0xff] }
 0x33e   :  { %2207 = vmatpush.bf16.msra.mxu0 %v8586_v62  ;;  %2233 = vmatpush.bf16.msra.mxu2 %v8587_v19  ;;  %v8595_v62 = vld [vmem:[#allocation9_spill] sm:$0xff]  ;;  %v8596_v19 = vld [vmem:[#allocation14_spill] sm:$0xff] }
 0x33f   :  { %2030 = vmatmul.bf16.vlgmr.msrb.gmra.mxu1 %v6588_v14  ;;  %2056 = vmatmul.bf16.vlgmr.msrb.gmra.mxu3 %v6588_v14  ;;  %v8602_v14 = vld [vmem:[#allocation15_spill] sm:$0xff] }
 0x340   :  { %2219 = vmatpush.bf16.msra.mxu1 %v8590_v53  ;;  %2245 = vmatpush.bf16.msra.mxu3 %v8591_v26  ;;  %v8599_v53 = vld [vmem:[#allocation13_spill] sm:$0xff]  ;;  %v8600_v26 = vld [vmem:[#allocation18_spill] sm:$0xff] }
 0x342   :  { %2208 = vmatpush.bf16.msra.mxu0 %v8592_v17  ;;  %2234 = vmatpush.bf16.msra.mxu2 %v8593_v59  ;;  %v8603_v17 = vld [vmem:[#allocation17_spill] sm:$0xff]  ;;  %v8604_v59 = vld [vmem:[#allocation22_spill] sm:$0xff] }
 0x344   :  { %2220 = vmatpush.bf16.msra.mxu1 %v8594_v34  ;;  %2246 = vmatpush.bf16.msra.mxu3 %v8595_v62  ;;  %v8605_v34 = vld [vmem:[#allocation24_spill] sm:$0xff]  ;;  %v8606_v62 = vld [vmem:[#allocation19_spill] sm:$0xff] }
 0x346   :  { %2209 = vmatpush.bf16.msra.mxu0 %v8596_v19  ;;  %2235 = vmatpush.bf16.msra.mxu2 %v8597_v38  ;;  %v8607_v19 = vld [vmem:[#allocation21_spill] sm:$0xff]  ;;  %v8608_v38 = vld [vmem:[#allocation26_spill] sm:$0xff] }
 0x348   :  { %2221 = vmatpush.bf16.msra.mxu1 %v8598_v45  ;;  %2247 = vmatpush.bf16.msra.mxu3 %v8599_v53  ;;  %v8609_v45 = vld [vmem:[#allocation28_spill] sm:$0xff]  ;;  %v8610_v53 = vld [vmem:[#allocation23_spill] sm:$0xff] }
 0x34a   :  { %2210 = vmatpush.bf16.msra.mxu0 %v8600_v26  ;;  %2236 = vmatpush.bf16.msra.mxu2 %v8601_v4  ;;  %v8611_v26 = vld [vmem:[#allocation25_spill] sm:$0xff]  ;;  %v8612_v4 = vld [vmem:[#allocation30_spill] sm:$0xff] }
 0x34c   :  { %2222 = vmatpush.bf16.msra.mxu1 %v8602_v14  ;;  %2248 = vmatpush.bf16.msra.mxu3 %v8603_v17  ;;  %v8613_v14 = vld [vmem:[#allocation32_spill] sm:$0xff]  ;;  %v8614_v17 = vld [vmem:[#allocation34_spill] sm:$0xff] }
 0x34e   :  { %2211 = vmatpush.bf16.msra.mxu0 %v8604_v59  ;;  %2237 = vmatpush.bf16.msra.mxu2 %v8605_v34  ;;  %v8615_v59 = vld [vmem:[#allocation36_spill] sm:$0xff]  ;;  %v8616_v34 = vld [vmem:[#allocation27_spill] sm:$0xff] }
 0x350   :  { %2223 = vmatpush.bf16.msra.mxu1 %v8606_v62  ;;  %2249 = vmatpush.bf16.msra.mxu3 %v8607_v19  ;;  %v8617_v62 = vld [vmem:[#allocation29_spill] sm:$0xff]  ;;  %v8618_v19 = vld [vmem:[#allocation38_spill] sm:$0xff] }
 0x352   :  { %2212 = vmatpush.bf16.msra.mxu0 %v8608_v38  ;;  %2238 = vmatpush.bf16.msra.mxu2 %v8609_v45  ;;  %v8619_v38 = vld [vmem:[#allocation40_spill] sm:$0xff]  ;;  %v8620_v45 = vld [vmem:[#allocation31_spill] sm:$0xff] }
 0x354   :  { %2224 = vmatpush.bf16.msra.mxu1 %v8610_v53  ;;  %2250 = vmatpush.bf16.msra.mxu3 %v8611_v26  ;;  %v8621_v53 = vld [vmem:[#allocation33_spill] sm:$0xff]  ;;  %v8622_v26 = vld [vmem:[#allocation35_spill] sm:$0xff] }
 0x356   :  { %2213 = vmatpush.bf16.msra.mxu0 %v8612_v4  ;;  %2239 = vmatpush.bf16.msra.mxu2 %v8613_v14  ;;  %v8623_v4 = vld [vmem:[#allocation37_spill] sm:$0xff]  ;;  %v8624_v14 = vld [vmem:[#allocation42_spill] sm:$0xff] }
 0x358   :  { %2225 = vmatpush.bf16.msra.mxu1 %v8616_v34  ;;  %2251 = vmatpush.bf16.msra.mxu3 %v8617_v62  ;;  %v8627_v34 = vld [vmem:[#allocation41_spill] sm:$0xff]  ;;  %v8628_v62 = vld [vmem:[#allocation46_spill] sm:$0xff] }
 0x35a   :  { %2258 = vmatpush.bf16.msrb.mxu0 %v8614_v17  ;;  %2284 = vmatpush.bf16.msrb.mxu2 %v8615_v59  ;;  %v8625_v17 = vld [vmem:[#allocation44_spill] sm:$0xff]  ;;  %v8626_v59 = vld [vmem:[#allocation39_spill] sm:$0xff] }
 0x35c   :  { %2226 = vmatpush.bf16.msra.mxu1 %v8620_v45  ;;  %2252 = vmatpush.bf16.msra.mxu3 %v8621_v53  ;;  %v8631_v45 = vld [vmem:[#allocation45_spill] sm:$0xff]  ;;  %v8632_v53 = vld [vmem:[#allocation50_spill] sm:$0xff] }
 0x35e   :  { %2259 = vmatpush.bf16.msrb.mxu0 %v8618_v19  ;;  %2285 = vmatpush.bf16.msrb.mxu2 %v8619_v38  ;;  %v8629_v19 = vld [vmem:[#allocation48_spill] sm:$0xff]  ;;  %v8630_v38 = vld [vmem:[#allocation43_spill] sm:$0xff] }
 0x360   :  { %2271 = vmatpush.bf16.msrb.mxu1 %v8622_v26  ;;  %2297 = vmatpush.bf16.msrb.mxu3 %v8623_v4  ;;  %v8633_v26 = vld [vmem:[#allocation52_spill] sm:$0xff]  ;;  %v8634_v4 = vld [vmem:[#allocation47_spill] sm:$0xff] }
 0x362   :  { %2260 = vmatpush.bf16.msrb.mxu0 %v8624_v14  ;;  %2286 = vmatpush.bf16.msrb.mxu2 %v8625_v17  ;;  %v8635_v14 = vld [vmem:[#allocation49_spill] sm:$0xff]  ;;  %v8636_v17 = vld [vmem:[#allocation54_spill] sm:$0xff] }
 0x364   :  { %2272 = vmatpush.bf16.msrb.mxu1 %v8626_v59  ;;  %2298 = vmatpush.bf16.msrb.mxu3 %v8627_v34  ;;  %v8637_v59 = vld [vmem:[#allocation56_spill] sm:$0xff]  ;;  %v8638_v34 = vld [vmem:[#allocation51_spill] sm:$0xff] }
 0x366   :  { %2261 = vmatpush.bf16.msrb.mxu0 %v8628_v62  ;;  %2287 = vmatpush.bf16.msrb.mxu2 %v8629_v19  ;;  %v8639_v62 = vld [vmem:[#allocation53_spill] sm:$0xff]  ;;  %v8640_v19 = vld [vmem:[#allocation58_spill] sm:$0xff] }
 0x368   :  { %2273 = vmatpush.bf16.msrb.mxu1 %v8630_v38  ;;  %2299 = vmatpush.bf16.msrb.mxu3 %v8631_v45  ;;  %v8641_v38 = vld [vmem:[#allocation60_spill] sm:$0xff]  ;;  %v8642_v45 = vld [vmem:[#allocation55_spill] sm:$0xff] }
 0x36a   :  { %2262 = vmatpush.bf16.msrb.mxu0 %v8632_v53  ;;  %2288 = vmatpush.bf16.msrb.mxu2 %v8633_v26  ;;  %v8643_v53 = vld [vmem:[#allocation57_spill] sm:$0xff]  ;;  %v8644_v26 = vld [vmem:[#allocation62_spill] sm:$0xff] }
 0x36c   :  { %2274 = vmatpush.bf16.msrb.mxu1 %v8634_v4  ;;  %2300 = vmatpush.bf16.msrb.mxu3 %v8635_v14  ;;  %v8645_v4 = vld [vmem:[#allocation64_spill] sm:$0xff]  ;;  %v8646_v14 = vld [vmem:[#allocation59_spill] sm:$0xff] }
 0x36e   :  { %2263 = vmatpush.bf16.msrb.mxu0 %v8636_v17  ;;  %2289 = vmatpush.bf16.msrb.mxu2 %v8637_v59  ;;  %v8647_v17 = vld [vmem:[#allocation61_spill] sm:$0xff]  ;;  %v8648_v59 = vld [vmem:[#allocation63_spill] sm:$0xff] }
 0x370   :  { %2275 = vmatpush.bf16.msrb.mxu1 %v8638_v34  ;;  %2301 = vmatpush.bf16.msrb.mxu3 %v8639_v62  ;;  %v8649_v34 = vld [vmem:[#allocation65_spill] sm:$0xff] }
 0x372   :  { %2264 = vmatpush.bf16.msrb.mxu0 %v8640_v19  ;;  %2290 = vmatpush.bf16.msrb.mxu2 %v8641_v38 }
 0x374   :  { %2276 = vmatpush.bf16.msrb.mxu1 %v8642_v45  ;;  %2302 = vmatpush.bf16.msrb.mxu3 %v8643_v53 }
 0x376   :  { %2265 = vmatpush.bf16.msrb.mxu0 %v8644_v26  ;;  %2291 = vmatpush.bf16.msrb.mxu2 %v8645_v4  ;;  %v1862_v62 = vpop.f32.mrf.mxu0 }
 0x378   :  { %2277 = vmatpush.bf16.msrb.mxu1 %v8646_v14  ;;  %2303 = vmatpush.bf16.msrb.mxu3 %v8647_v17 }
 0x37c   :  { %2278 = vmatpush.bf16.msrb.mxu1 %v8648_v59  ;;  %2304 = vmatpush.bf16.msrb.mxu3 %v8649_v34  ;;  %v1875_v19 = vpop.f32.mrf.mxu1  ;;  %v1888_v8 = vpop.f32.mrf.mxu2  ;;  %v4238_v59 = vld [vmem:[%s7921_s0 + $0xd0] sm:$0xff] }
 0x37d   :  { %v1876_v40 = vadd.f32 %v1875_v19, %v1862_v62 }
 0x37e   :  { %v1864_v38 = vpop.f32.mrf.mxu0 }
 0x382   :  { %v1901_v42 = vpop.f32.mrf.mxu3 }
 0x384   :  { %v1877_v45 = vpop.f32.mrf.mxu1  ;;  %v1890_v47 = vpop.f32.mrf.mxu2 }
 0x385   :  { %v4236_v47 = vld [vmem:[%s7921_s0 + $0xc0] sm:$0xff] }
 0x386   :  { %v1914_v53 = vpop.f32.mrf.mxu0 }
 0x38a   :  { %v1903_v7 = vpop.f32.mrf.mxu3 }
 0x38b   :  { %v4239_v7 = vld [vmem:[%s7921_s0 + $0xd8] sm:$0xff] }
 0x38c   :  { %v1927_v26 = vpop.f32.mrf.mxu1  ;;  %v1940_v37 = vpop.f32.mrf.mxu2 }
 0x38d   :  { %v1928_v14 = vadd.f32 %v1927_v26, %v1914_v53  ;;  %v2061_v26 = vadd.f32 %v4236_v47, %v1876_v40  ;;  %v1902_v53 = vadd.f32 %v1901_v42, %v1888_v8 }
 0x38e   :  { %v1916_v4 = vpop.f32.mrf.mxu0 }
 0x38f   :  { %v2063_v16 = vadd.f32 %v4238_v59, %v1928_v14 }
 0x391   :  { %v4246_v45 = vmul.f32 -1.442695, %v2063_v16 }
 0x392   :  { %v1953_v44 = vpop.f32.mrf.mxu3 }
 0x393   :  { %v1954_v38 = vadd.f32 %v1953_v44, %v1940_v37  ;;  %4532 = vpow2.f32 %v4246_v45 }
 0x394   :  { %v1929_v17 = vpop.f32.mrf.mxu1  ;;  %v1942_v34 = vpop.f32.mrf.mxu2 }
 0x395   :  { %v4237_v17 = vld [vmem:[%s7921_s0 + $0xc8] sm:$0xff]  ;;  %v2064_v59 = vadd.f32 %v4239_v7, %v1954_v38  ;;  %v4244_v34 = vmul.f32 -1.442695, %v2061_v26 }
 0x396   :  { %v1966_v27 = vpop.f32.mrf.mxu0  ;;  %v2062_v44 = vadd.f32 %v4237_v17, %v1902_v53 }
 0x397   :  { %v4247_v37 = vmul.f32 -1.442695, %v2064_v59  ;;  %4534 = vpow2.f32 %v4244_v34 }
 0x398   :  { %v4245_v10 = vmul.f32 -1.442695, %v2062_v44  ;;  %v4242_v44 = vld [vmem:[%s7921_s0 + $0xf0] sm:$0xff] }
 0x399   :  { %v4533_v40 = vpop.eup %4532  ;;  %4536 = vpow2.f32 %v4247_v37 }
 0x39a   :  { %v1955_v4 = vpop.f32.mrf.mxu3  ;;  %4538 = vpow2.f32 %v4245_v10  ;;  %v6744_v42 = vadd.f32 1.0, %v4533_v40 }
 0x39c   :  { %v6739_v46 = vpop.f32.mrf.mxu2  ;;  %v1979_v62 = vpop.f32.mrf.mxu1  ;;  %4540 = vrcp.f32 %v6744_v42  ;;  %vm2120_vm9 = vweird.f32 %v6744_v42 }
 0x39d   :  { %v4535_v8 = vpop.eup %4534 }
 0x39e   :  { %v1968_v19 = vpop.f32.mrf.mxu0  ;;  %v6746_v38 = vadd.f32 1.0, %v4535_v8 }
 0x39f   :  { %v4537_v47 = vpop.eup %4536 }
 0x3a0   :  { %v4539_v7 = vpop.eup %4538  ;;  %v6749_v26 = vadd.f32 1.0, %v4537_v47  ;;  %4542 = vrcp.f32 %v6746_v38  ;;  %vm2082_vm11 = vweird.f32 %v6746_v38 }
 0x3a1   :  { %v6752_v45 = vadd.f32 1.0, %v4539_v7  ;;  %v1980_v7 = vadd.f32 %v1979_v62, %v1966_v27 }
 0x3a2   :  { %v2005_v14 = vpop.f32.mrf.mxu3  ;;  %v6754_v53 = vpop.eup %4540  ;;  %4544 = vrcp.f32 %v6749_v26  ;;  %vm2135_vm0 = vweird.f32 %v6749_v26 }
 0x3a3   :  { %4546 = vrcp.f32 %v6752_v45  ;;  %vm2121_vm8 = vweird.f32 %v6754_v53  ;;  %vm2097_vm4 = vweird.f32 %v6752_v45 }
 0x3a4   :  { %v1994_v4 = vpop.f32.mrf.mxu2  ;;  %v1981_v16 = vpop.f32.mrf.mxu1  ;;  %vm6793_vm10 = vmor %vm2120_vm9, %vm2121_vm8 }
 0x3a6   :  { %v6760_v17 = vpop.eup %4542 }
 0x3a7   :  { %v2078_v19 = vmul.f32 %v6760_v17, %v6746_v38  ;;  %vm2083_vm12 = vweird.f32 %v6760_v17 }
 0x3a8   :  { %v6762_v59 = vpop.eup %4544  ;;  %vm6811_vm15 = vmor %vm2082_vm11, %vm2083_vm12 }
 0x3a9   :  { %v6769_v16 = vpop.eup %4546  ;;  %v2131_v8 = vmul.f32 %v6762_v59, %v6749_v26  ;;  %v2079_v22 = vsub.f32 1.0, %v2078_v19  ;;  %vm2136_vm13 = vweird.f32 %v6762_v59 }
 0x3aa   :  { %v2007_v33 = vpop.f32.mrf.mxu3  ;;  %v2093_v24 = vmul.f32 %v6769_v16, %v6752_v45  ;;  %vm6820_vm1 = vmor %vm2135_vm0, %vm2136_vm13  ;;  %vm2098_vm3 = vweird.f32 %v6769_v16 }
 0x3ab   :  { %v2116_v33 = vmul.f32 %v6754_v53, %v6744_v42  ;;  %v2080_v62 = vmul.f32 %v6760_v17, %v2079_v22  ;;  %vm2099_vm6 = vmor %vm2097_vm4, %vm2098_vm3 }
 0x3ad   :  { %v2117_v34 = vsub.f32 1.0, %v2116_v33  ;;  %v4240_v33 = vld [vmem:[%s7921_s0 + $0xe0] sm:$0xff] }
 0x3af   :  { %v2118_v5 = vmul.f32 %v6754_v53, %v2117_v34 }
 0x3b1   :  { %v2119_v19 = vadd.f32 %v6754_v53, %v2118_v5  ;;  %v2103_v5 = vand.u32 2147483648, %v6752_v45 }
 0x3b6   :  { %v2018_v10 = vpop.f32.mrf.mxu0 }
 0x3bc   :  { %v2031_v37 = vpop.f32.mrf.mxu1  ;;  %v2044_v4 = vpop.f32.mrf.mxu2 }
 0x3bd   :  { %v2032_v40 = vadd.f32 %v2031_v37, %v2018_v10  ;;  %v2132_v10 = vsub.f32 1.0, %v2131_v8  ;;  %v4243_v37 = vld [vmem:[%s7921_s0 + $0xf8] sm:$0xff]  ;;  %v2006_v8 = vadd.f32 %v2005_v14, %v6739_v46  ;;  %v2081_v46 = vadd.f32 %v6760_v17, %v2080_v62 }
 0x3be   :  { %v2020_v47 = vpop.f32.mrf.mxu0  ;;  %v2088_v14 = vand.u32 2147483648, %v6746_v38  ;;  %v2141_v62 = vand.u32 2147483648, %v6749_v26 }
 0x3bf   :  { %v2067_v11 = vadd.f32 %v4242_v44, %v2032_v40  ;;  %v2065_v47 = vadd.f32 %v4240_v33, %v1980_v7  ;;  %v2094_v40 = vsub.f32 1.0, %v2093_v24  ;;  %v2133_v7 = vmul.f32 %v6762_v59, %v2132_v10 }
 0x3c0   :  { %v2086_v24 = vand.u32 2147483647, %v6746_v38  ;;  %v2089_v38 = vor.u32 1.1754944e-38, %v2088_v14 }
 0x3c1   :  { %v4248_v25 = vmul.f32 -1.442695, %v2067_v11  ;;  %v2126_v11 = vand.u32 2147483648, %v6744_v42 }
 0x3c2   :  { %v2057_v29 = vpop.f32.mrf.mxu3  ;;  %vm2087_vm2 = vcmp.eq.f32.partialorder %v2086_v24, 8.507059e+37 }
 0x3c3   :  { %4548 = vpow2.f32 %v4248_v25  ;;  %v2058_v27 = vadd.f32 %v2057_v29, %v2044_v4  ;;  %v2124_v29 = vand.u32 2147483647, %v6744_v42  ;;  %v4241_v25 = vld [vmem:[%s7921_s0 + $0xe8] sm:$0xff]  ;;  %v2123_v42 = vsel %vm6793_vm10, %v6754_v53, %v2119_v19 }
 0x3c4   :  { %v2033_v34 = vpop.f32.mrf.mxu1  ;;  %v2046_v44 = vpop.f32.mrf.mxu2  ;;  %4550 = vtanh.f32 %v2065_v47  ;;  %v2127_v33 = vor.u32 1.1754944e-38, %v2126_v11  ;;  %v2066_v10 = vadd.f32 %v4241_v25, %v2006_v8  ;;  %v2085_v19 = vsel %vm6811_vm15, %v6760_v17, %v2081_v46 }
 0x3c5   :  { %v2068_v21 = vadd.f32 %v4243_v37, %v2058_v27  ;;  %v2095_v37 = vmul.f32 %v6769_v16, %v2094_v40  ;;  %vm2125_vm14 = vcmp.eq.f32.partialorder %v2124_v29, 8.507059e+37  ;;  %v2139_v44 = vand.u32 2147483647, %v6749_v26 }
 0x3c6   :  { %v2128_v53 = vsel %vm2125_vm14, %v2127_v33, %v2123_v42  ;;  %v2142_v29 = vor.u32 1.1754944e-38, %v2141_v62  ;;  %v2090_v25 = vsel %vm2087_vm2, %v2089_v38, %v2085_v19  ;;  %v2104_v33 = vor.u32 1.1754944e-38, %v2103_v5 }
 0x3c7   :  { %v4249_v22 = vmul.f32 -1.442695, %v2068_v21  ;;  %v2134_v21 = vadd.f32 %v6762_v59, %v2133_v7  ;;  %v2185_v8 = vmul.f32 %v2128_v53, %v6574_v2  ;;  %v2096_v7 = vadd.f32 %v6769_v16, %v2095_v37 }
 0x3c8   :  { %vm2140_vm5 = vcmp.eq.f32.partialorder %v2139_v44, 8.507059e+37 }
 0x3c9   :  { %v4549_v4 = vpop.eup %4548  ;;  %4552 = vpow2.f32 %v4249_v22  ;;  %v2138_v17 = vsel %vm6820_vm1, %v6762_v59, %v2134_v21  ;;  %v2101_v22 = vand.u32 2147483647, %v6752_v45 }
 0x3ca   :  { %v2153_v47 = vadd.f32 1.0, %v4549_v4  ;;  %v2059_v27 = vpop.f32.mrf.mxu3  ;;  %v4551_v40 = vpop.eup %4550  ;;  %v2143_v46 = vsel %vm2140_vm5, %v2142_v29, %v2138_v17  ;;  %v2100_v4 = vsel %vm2099_vm6, %v6769_v16, %v2096_v7 }
 0x3cb   :  { %v2187_v24 = vmul.f32 %v4551_v40, %v2090_v25  ;;  %vm2102_vm7 = vcmp.eq.f32.partialorder %v2101_v22, 8.507059e+37  ;;  %v2186_v37 = vmul.f32 %v2143_v46, %v6579_v3 }
 0x3cc   :  { %4554 = vrcp.f32 %v2153_v47  ;;  %v2105_v21 = vsel %vm2102_vm7, %v2104_v33, %v2100_v4  ;;  %v2166_v62 = vand.u32 2147483648, %v2153_v47  ;;  %v2164_v53 = vand.u32 2147483647, %v2153_v47  ;;  %v8657_v33 = vld [vmem:[#allocation104_spill] sm:$0xff] }
 0x3cd   :  { %4556 = vtanh.f32 %v2066_v10  ;;  %v6833_v42 = vadd.f32 %v2187_v24, %v2185_v8  ;;  %vm2160_vm9 = vweird.f32 %v2153_v47 }
 0x3ce   :  { %v2167_v11 = vor.u32 1.1754944e-38, %v2166_v62  ;;  %vm2165_vm11 = vcmp.eq.f32.partialorder %v2164_v53, 8.507059e+37  ;;  %v8663_v62 = vld [vmem:[#allocation108_spill] sm:$0xff]  ;;  %v8665_v53 = vld [vmem:[#allocation105_spill] sm:$0xff] }
 0x3cf   :  { %v4553_v26 = vpop.eup %4552 }
 0x3d0   :  { %v2154_v2 = vadd.f32 1.0, %v4553_v26 }
 0x3d2   :  { %v4555_v14 = vpop.eup %4554  ;;  %4558 = vrcp.f32 %v2154_v2  ;;  %v2181_v17 = vand.u32 2147483648, %v2154_v2  ;;  %v2179_v25 = vand.u32 2147483647, %v2154_v2  ;;  %vm2175_vm13 = vweird.f32 %v2154_v2 }
 0x3d3   :  { %v4557_v59 = vpop.eup %4556  ;;  %v2156_v10 = vmul.f32 %v4555_v14, %v2153_v47  ;;  %4560 = vtanh.f32 %v6833_v42  ;;  %vm2161_vm8 = vweird.f32 %v4555_v14 }
 0x3d4   :  { %v2188_v45 = vmul.f32 %v4557_v59, %v2105_v21  ;;  %vm2162_vm10 = vmor %vm2160_vm9, %vm2161_vm8  ;;  %v2182_v47 = vor.u32 1.1754944e-38, %v2181_v17  ;;  %vm2180_vm15 = vcmp.eq.f32.partialorder %v2179_v25, 8.507059e+37  ;;  %v8660_v21 = vld [vmem:[#allocation99_spill] sm:$0xff]  ;;  %v8674_v17 = vld [vmem:[#allocation118_spill] sm:$0xff] }
 0x3d5   :  { %v2157_v27 = vsub.f32 1.0, %v2156_v10  ;;  %v8658_v10 = vld [vmem:[#allocation95_spill] sm:$0xff]  ;;  %v8677_v25 = vld [vmem:[#allocation117_spill] sm:$0xff] }
 0x3d6   :  { %v6838_v44 = vadd.f32 %v2188_v45, %v2186_v37  ;;  %v8659_v37 = vld [vmem:[#allocation97_spill] sm:$0xff]  ;;  %v8662_v45 = vld [vmem:[#allocation106_spill] sm:$0xff] }
 0x3d7   :  { %v2158_v34 = vmul.f32 %v4555_v14, %v2157_v27  ;;  %v8661_v27 = vld [vmem:[#allocation101_spill] sm:$0xff] }
 0x3d8   :  { %v4559_v19 = vpop.eup %4558  ;;  %4562 = vtanh.f32 %v6838_v44 }
 0x3d9   :  { %v2159_v16 = vadd.f32 %v4555_v14, %v2158_v34  ;;  %v2171_v40 = vmul.f32 %v4559_v19, %v2154_v2  ;;  %v4561_v8 = vpop.eup %4560  ;;  %vm2176_vm12 = vweird.f32 %v4559_v19  ;;  %v8656_v2 = vld [vmem:[#allocation102_spill] sm:$0xff]  ;;  %v8664_v34 = vld [vmem:[#allocation103_spill] sm:$0xff] }
 0x3da   :  { %vm2177_vm14 = vmor %vm2175_vm13, %vm2176_vm12 }
 0x3db   :  { %v2163_v38 = vsel %vm2162_vm10, %v4555_v14, %v2159_v16  ;;  %v2172_v3 = vsub.f32 1.0, %v2171_v40  ;;  %v8667_v16 = vld [vmem:[#allocation112_spill] sm:$0xff]  ;;  %v8668_v40 = vld [vmem:[#allocation107_spill] sm:$0xff] }
 0x3dc   :  { %v2168_v7 = vsel %vm2165_vm11, %v2167_v11, %v2163_v38  ;;  %v8669_v11 = vld [vmem:[#allocation109_spill] sm:$0xff]  ;;  %v8670_v38 = vld [vmem:[#allocation114_spill] sm:$0xff] }
 0x3dd   :  { %v2193_v26 = vmul.f32 %v4561_v8, %v2168_v7  ;;  %v2173_v29 = vmul.f32 %v4559_v19, %v2172_v3  ;;  %v8671_v3 = vld [vmem:[#allocation116_spill] sm:$0xff]  ;;  %v8672_v8 = vld [vmem:[#allocation111_spill] sm:$0xff]  ;;  %v8673_v7 = vld [vmem:[#allocation113_spill] sm:$0xff] }
 0x3de   :  { %v4563_v46 = vpop.eup %4562 }
 0x3df   :  { %v6841_v5 = vpack.c.bf16 %v2193_v26, %v2193_v26  ;;  %v2174_v24 = vadd.f32 %v4559_v19, %v2173_v29  ;;  %v8675_v26 = vld [vmem:[#allocation120_spill] sm:$0xff]  ;;  %v8676_v29 = vld [vmem:[#allocation115_spill] sm:$0xff] }
 0x3e1   :  { %v2178_v22 = vsel %vm2177_vm14, %v4559_v19, %v2174_v24  ;;  %2214 = vmatmul.bf16.vlgmr.msra.gmra.mxu0 %v6841_v5  ;;  %2240 = vmatmul.bf16.vlgmr.msra.gmra.mxu2 %v6841_v5  ;;  %v8666_v19 = vld [vmem:[#allocation110_spill] sm:$0xff] }
 0x3e2   :  { %v2183_v14 = vsel %vm2180_vm15, %v2182_v47, %v2178_v22  ;;  %2310 = vmatpush.bf16.msra.mxu0 %v8351_v15  ;;  %2336 = vmatpush.bf16.msra.mxu2 %v8352_v55  ;;  %v8678_v24 = vld [vmem:[#allocation122_spill] sm:$0xff]  ;;  %v8679_v47 = vld [vmem:[#allocation124_spill] sm:$0xff]  ;;  %v8680_v22 = vld [vmem:[#allocation119_spill] sm:$0xff] }
 0x3e3   :  { %v2194_v4 = vmul.f32 %v4563_v46, %v2183_v14  ;;  %v8681_v46 = vld [vmem:[#allocation121_spill] sm:$0xff]  ;;  %v8682_v14 = vld [vmem:[#allocation126_spill] sm:$0xff] }
 0x3e5   :  { %v6847_v59 = vpack.c.bf16 %v2194_v4, %v2194_v4  ;;  %v8683_v4 = vld [vmem:[#allocation128_spill] sm:$0xff] }
 0x3e6   :  { %2311 = vmatpush.bf16.msra.mxu0 %v8353_v63  ;;  %2337 = vmatpush.bf16.msra.mxu2 %v8354_v6 }
 0x3e7   :  { %2227 = vmatmul.bf16.vlgmr.msra.gmra.mxu1 %v6847_v59  ;;  %2253 = vmatmul.bf16.vlgmr.msra.gmra.mxu3 %v6847_v59 }
 0x3e8   :  { %2323 = vmatpush.bf16.msra.mxu1 %v8355_v60  ;;  %2349 = vmatpush.bf16.msra.mxu3 %v8356_v23 }
 0x3ea   :  { %2312 = vmatpush.bf16.msra.mxu0 %v8357_v54  ;;  %2338 = vmatpush.bf16.msra.mxu2 %v8358_v61 }
 0x3ec   :  { %2324 = vmatpush.bf16.msra.mxu1 %v8359_v51  ;;  %2350 = vmatpush.bf16.msra.mxu3 %v8360_v49 }
 0x3ee   :  { %2313 = vmatpush.bf16.msra.mxu0 %v8361_v1  ;;  %2339 = vmatpush.bf16.msra.mxu2 %v8362_v52 }
 0x3f0   :  { %2325 = vmatpush.bf16.msra.mxu1 %v8363_v39  ;;  %2351 = vmatpush.bf16.msra.mxu3 %v8364_v43 }
 0x3f1   :  { %2266 = vmatmul.bf16.vlgmr.msrb.gmra.mxu0 %v6841_v5  ;;  %2292 = vmatmul.bf16.vlgmr.msrb.gmra.mxu2 %v6841_v5 }
 0x3f2   :  { %2314 = vmatpush.bf16.msra.mxu0 %v8365_v31  ;;  %2340 = vmatpush.bf16.msra.mxu2 %v8366_v35 }
 0x3f4   :  { %2326 = vmatpush.bf16.msra.mxu1 %v8367_v57  ;;  %2352 = vmatpush.bf16.msra.mxu3 %v8368_v9 }
 0x3f6   :  { %2315 = vmatpush.bf16.msra.mxu0 %v8369_v41  ;;  %2341 = vmatpush.bf16.msra.mxu2 %v8370_v20 }
 0x3f7   :  { %2279 = vmatmul.bf16.vlgmr.msrb.gmra.mxu1 %v6847_v59  ;;  %2305 = vmatmul.bf16.vlgmr.msrb.gmra.mxu3 %v6847_v59 }
 0x3f8   :  { %2327 = vmatpush.bf16.msra.mxu1 %v8371_v30  ;;  %2353 = vmatpush.bf16.msra.mxu3 %v8372_v48 }
 0x3fa   :  { %2316 = vmatpush.bf16.msra.mxu0 %v8452_v28  ;;  %2342 = vmatpush.bf16.msra.mxu2 %v8453_v0 }
 0x3fc   :  { %2328 = vmatpush.bf16.msra.mxu1 %v8454_v13  ;;  %2354 = vmatpush.bf16.msra.mxu3 %v8455_v12 }
 0x3fe   :  { %2317 = vmatpush.bf16.msra.mxu0 %v8456_v32  ;;  %2343 = vmatpush.bf16.msra.mxu2 %v8457_v36 }
 0x400   :  { %2329 = vmatpush.bf16.msra.mxu1 %v8460_v18  ;;  %2355 = vmatpush.bf16.msra.mxu3 %v8461_v58 }
 0x401   :  { %2318 = vmatmul.bf16.vlgmr.msra.gmra.mxu0 %v6841_v5  ;;  %2344 = vmatmul.bf16.vlgmr.msra.gmra.mxu2 %v6841_v5 }
 0x402   :  { %2362 = vmatpush.bf16.msrb.mxu0 %v8458_v56  ;;  %2388 = vmatpush.bf16.msrb.mxu2 %v8459_v50 }
 0x404   :  { %2330 = vmatpush.bf16.msra.mxu1 %v8658_v10  ;;  %2356 = vmatpush.bf16.msra.mxu3 %v8659_v37 }
 0x406   :  { %2363 = vmatpush.bf16.msrb.mxu0 %v8656_v2  ;;  %2389 = vmatpush.bf16.msrb.mxu2 %v8657_v33 }
 0x407   :  { %2331 = vmatmul.bf16.vlgmr.msra.gmra.mxu1 %v6847_v59  ;;  %2357 = vmatmul.bf16.vlgmr.msra.gmra.mxu3 %v6847_v59 }
 0x408   :  { %2375 = vmatpush.bf16.msrb.mxu1 %v8660_v21  ;;  %2401 = vmatpush.bf16.msrb.mxu3 %v8661_v27 }
 0x40a   :  { %2364 = vmatpush.bf16.msrb.mxu0 %v8662_v45  ;;  %2390 = vmatpush.bf16.msrb.mxu2 %v8663_v62 }
 0x40c   :  { %2376 = vmatpush.bf16.msrb.mxu1 %v8664_v34  ;;  %2402 = vmatpush.bf16.msrb.mxu3 %v8665_v53 }
 0x40e   :  { %2365 = vmatpush.bf16.msrb.mxu0 %v8666_v19  ;;  %2391 = vmatpush.bf16.msrb.mxu2 %v8667_v16 }
 0x410   :  { %2377 = vmatpush.bf16.msrb.mxu1 %v8668_v40  ;;  %2403 = vmatpush.bf16.msrb.mxu3 %v8669_v11 }
 0x412   :  { %2366 = vmatpush.bf16.msrb.mxu0 %v8670_v38  ;;  %2392 = vmatpush.bf16.msrb.mxu2 %v8671_v3 }
 0x414   :  { %2378 = vmatpush.bf16.msrb.mxu1 %v8672_v8  ;;  %2404 = vmatpush.bf16.msrb.mxu3 %v8673_v7  ;;  %v8684_v7 = vld [vmem:[#allocation2_spill] sm:$0xff] }
 0x416   :  { %2367 = vmatpush.bf16.msrb.mxu0 %v8674_v17  ;;  %2393 = vmatpush.bf16.msrb.mxu2 %v8675_v26  ;;  %v8685_v17 = vld [vmem:[#allocation4_spill] sm:$0xff]  ;;  %v8686_v26 = vld [vmem:[#allocation123_spill] sm:$0xff] }
 0x418   :  { %2379 = vmatpush.bf16.msrb.mxu1 %v8676_v29  ;;  %2405 = vmatpush.bf16.msrb.mxu3 %v8677_v25  ;;  %v8687_v29 = vld [vmem:[#allocation125_spill] sm:$0xff] }
 0x41a   :  { %2368 = vmatpush.bf16.msrb.mxu0 %v8678_v24  ;;  %2394 = vmatpush.bf16.msrb.mxu2 %v8679_v47  ;;  %v8688_v47 = vld [vmem:[#allocation6_spill] sm:$0xff] }
 0x41c   :  { %2380 = vmatpush.bf16.msrb.mxu1 %v8680_v22  ;;  %2406 = vmatpush.bf16.msrb.mxu3 %v8681_v46  ;;  %v8689_v22 = vld [vmem:[#allocation8_spill] sm:$0xff]  ;;  %v8690_v46 = vld [vmem:[#allocation127_spill] sm:$0xff] }
 0x41e   :  { %2369 = vmatpush.bf16.msrb.mxu0 %v8682_v14  ;;  %2395 = vmatpush.bf16.msrb.mxu2 %v8683_v4  ;;  %v8691_v14 = vld [vmem:[#allocation129_spill] sm:$0xff]  ;;  %v8692_v4 = vld [vmem:[#allocation3_spill] sm:$0xff] }
 0x420   :  { %2381 = vmatpush.bf16.msrb.mxu1 %v8686_v26  ;;  %2407 = vmatpush.bf16.msrb.mxu3 %v8687_v29  ;;  %v8694_v29 = vld [vmem:[#allocation10_spill] sm:$0xff]  ;;  %v8695_v26 = vld [vmem:[#allocation12_spill] sm:$0xff] }
 0x421   :  { %2370 = vmatmul.bf16.vlgmr.msrb.gmra.mxu0 %v6841_v5  ;;  %2396 = vmatmul.bf16.vlgmr.msrb.gmra.mxu2 %v6841_v5  ;;  %v8696_v5 = vld [vmem:[#allocation7_spill] sm:$0xff] }
 0x422   :  { %2559 = vmatpush.bf16.msra.mxu0 %v8684_v7  ;;  %2585 = vmatpush.bf16.msra.mxu2 %v8685_v17  ;;  %v8693_v7 = vld [vmem:[#allocation5_spill] sm:$0xff]  ;;  %v8703_v17 = vld [vmem:[#allocation20_spill] sm:$0xff] }
 0x424   :  { %2382 = vmatpush.bf16.msrb.mxu1 %v8690_v46  ;;  %2408 = vmatpush.bf16.msrb.mxu3 %v8691_v14  ;;  %v8699_v46 = vld [vmem:[#allocation16_spill] sm:$0xff]  ;;  %v8700_v14 = vld [vmem:[#allocation11_spill] sm:$0xff] }
 0x426   :  { %2560 = vmatpush.bf16.msra.mxu0 %v8688_v47  ;;  %2586 = vmatpush.bf16.msra.mxu2 %v8689_v22  ;;  %v8697_v47 = vld [vmem:[#allocation9_spill] sm:$0xff]  ;;  %v8698_v22 = vld [vmem:[#allocation14_spill] sm:$0xff] }
 0x427   :  { %2383 = vmatmul.bf16.vlgmr.msrb.gmra.mxu1 %v6847_v59  ;;  %2409 = vmatmul.bf16.vlgmr.msrb.gmra.mxu3 %v6847_v59  ;;  %v8704_v59 = vld [vmem:[#allocation15_spill] sm:$0xff] }
 0x428   :  { %2572 = vmatpush.bf16.msra.mxu1 %v8692_v4  ;;  %2598 = vmatpush.bf16.msra.mxu3 %v8693_v7  ;;  %v8701_v4 = vld [vmem:[#allocation13_spill] sm:$0xff]  ;;  %v8702_v7 = vld [vmem:[#allocation18_spill] sm:$0xff] }
 0x42a   :  { %2561 = vmatpush.bf16.msra.mxu0 %v8694_v29  ;;  %2587 = vmatpush.bf16.msra.mxu2 %v8695_v26  ;;  %v8705_v29 = vld [vmem:[#allocation17_spill] sm:$0xff]  ;;  %v8706_v26 = vld [vmem:[#allocation22_spill] sm:$0xff] }
 0x42c   :  { %2573 = vmatpush.bf16.msra.mxu1 %v8696_v5  ;;  %2599 = vmatpush.bf16.msra.mxu3 %v8697_v47  ;;  %v8707_v5 = vld [vmem:[#allocation24_spill] sm:$0xff]  ;;  %v8708_v47 = vld [vmem:[#allocation19_spill] sm:$0xff] }
 0x42e   :  { %2562 = vmatpush.bf16.msra.mxu0 %v8698_v22  ;;  %2588 = vmatpush.bf16.msra.mxu2 %v8699_v46  ;;  %v8709_v22 = vld [vmem:[#allocation21_spill] sm:$0xff]  ;;  %v8710_v46 = vld [vmem:[#allocation26_spill] sm:$0xff] }
 0x430   :  { %2574 = vmatpush.bf16.msra.mxu1 %v8700_v14  ;;  %2600 = vmatpush.bf16.msra.mxu3 %v8701_v4  ;;  %v8711_v14 = vld [vmem:[#allocation28_spill] sm:$0xff]  ;;  %v8712_v4 = vld [vmem:[#allocation23_spill] sm:$0xff] }
 0x432   :  { %2563 = vmatpush.bf16.msra.mxu0 %v8702_v7  ;;  %2589 = vmatpush.bf16.msra.mxu2 %v8703_v17  ;;  %v8713_v7 = vld [vmem:[#allocation25_spill] sm:$0xff]  ;;  %v8714_v17 = vld [vmem:[#allocation30_spill] sm:$0xff] }
 0x434   :  { %2575 = vmatpush.bf16.msra.mxu1 %v8704_v59  ;;  %2601 = vmatpush.bf16.msra.mxu3 %v8705_v29  ;;  %v8715_v59 = vld [vmem:[#allocation32_spill] sm:$0xff]  ;;  %v8716_v29 = vld [vmem:[#allocation34_spill] sm:$0xff] }
 0x436   :  { %2564 = vmatpush.bf16.msra.mxu0 %v8706_v26  ;;  %2590 = vmatpush.bf16.msra.mxu2 %v8707_v5  ;;  %v8717_v26 = vld [vmem:[#allocation36_spill] sm:$0xff]  ;;  %v8718_v5 = vld [vmem:[#allocation27_spill] sm:$0xff] }
 0x438   :  { %2576 = vmatpush.bf16.msra.mxu1 %v8708_v47  ;;  %2602 = vmatpush.bf16.msra.mxu3 %v8709_v22  ;;  %v8719_v47 = vld [vmem:[#allocation29_spill] sm:$0xff]  ;;  %v8720_v22 = vld [vmem:[#allocation38_spill] sm:$0xff] }
 0x43a   :  { %2565 = vmatpush.bf16.msra.mxu0 %v8710_v46  ;;  %2591 = vmatpush.bf16.msra.mxu2 %v8711_v14  ;;  %v8721_v46 = vld [vmem:[#allocation40_spill] sm:$0xff]  ;;  %v8722_v14 = vld [vmem:[#allocation31_spill] sm:$0xff] }
 0x43c   :  { %2577 = vmatpush.bf16.msra.mxu1 %v8712_v4  ;;  %2603 = vmatpush.bf16.msra.mxu3 %v8713_v7  ;;  %v8723_v4 = vld [vmem:[#allocation33_spill] sm:$0xff]  ;;  %v8724_v7 = vld [vmem:[#allocation35_spill] sm:$0xff] }
 0x43e   :  { %2566 = vmatpush.bf16.msra.mxu0 %v8714_v17  ;;  %2592 = vmatpush.bf16.msra.mxu2 %v8715_v59  ;;  %v8725_v17 = vld [vmem:[#allocation37_spill] sm:$0xff]  ;;  %v8726_v59 = vld [vmem:[#allocation42_spill] sm:$0xff] }
 0x440   :  { %2578 = vmatpush.bf16.msra.mxu1 %v8718_v5  ;;  %2604 = vmatpush.bf16.msra.mxu3 %v8719_v47  ;;  %v8729_v5 = vld [vmem:[#allocation41_spill] sm:$0xff]  ;;  %v8730_v47 = vld [vmem:[#allocation46_spill] sm:$0xff] }
 0x442   :  { %2611 = vmatpush.bf16.msrb.mxu0 %v8716_v29  ;;  %2637 = vmatpush.bf16.msrb.mxu2 %v8717_v26  ;;  %v8727_v29 = vld [vmem:[#allocation44_spill] sm:$0xff]  ;;  %v8728_v26 = vld [vmem:[#allocation39_spill] sm:$0xff] }
 0x444   :  { %2579 = vmatpush.bf16.msra.mxu1 %v8722_v14  ;;  %2605 = vmatpush.bf16.msra.mxu3 %v8723_v4  ;;  %v8733_v14 = vld [vmem:[#allocation45_spill] sm:$0xff]  ;;  %v8734_v4 = vld [vmem:[#allocation50_spill] sm:$0xff] }
 0x446   :  { %2612 = vmatpush.bf16.msrb.mxu0 %v8720_v22  ;;  %2638 = vmatpush.bf16.msrb.mxu2 %v8721_v46  ;;  %v8731_v22 = vld [vmem:[#allocation48_spill] sm:$0xff]  ;;  %v8732_v46 = vld [vmem:[#allocation43_spill] sm:$0xff] }
 0x448   :  { %2624 = vmatpush.bf16.msrb.mxu1 %v8724_v7  ;;  %2650 = vmatpush.bf16.msrb.mxu3 %v8725_v17  ;;  %v8735_v7 = vld [vmem:[#allocation52_spill] sm:$0xff]  ;;  %v8736_v17 = vld [vmem:[#allocation47_spill] sm:$0xff] }
 0x44a   :  { %2613 = vmatpush.bf16.msrb.mxu0 %v8726_v59  ;;  %2639 = vmatpush.bf16.msrb.mxu2 %v8727_v29  ;;  %v8737_v59 = vld [vmem:[#allocation49_spill] sm:$0xff]  ;;  %v8738_v29 = vld [vmem:[#allocation54_spill] sm:$0xff] }
 0x44c   :  { %2625 = vmatpush.bf16.msrb.mxu1 %v8728_v26  ;;  %2651 = vmatpush.bf16.msrb.mxu3 %v8729_v5  ;;  %v8739_v26 = vld [vmem:[#allocation56_spill] sm:$0xff]  ;;  %v8740_v5 = vld [vmem:[#allocation51_spill] sm:$0xff] }
 0x44e   :  { %2614 = vmatpush.bf16.msrb.mxu0 %v8730_v47  ;;  %2640 = vmatpush.bf16.msrb.mxu2 %v8731_v22  ;;  %v8741_v47 = vld [vmem:[#allocation53_spill] sm:$0xff]  ;;  %v8742_v22 = vld [vmem:[#allocation58_spill] sm:$0xff] }
 0x450   :  { %2626 = vmatpush.bf16.msrb.mxu1 %v8732_v46  ;;  %2652 = vmatpush.bf16.msrb.mxu3 %v8733_v14  ;;  %v8743_v46 = vld [vmem:[#allocation60_spill] sm:$0xff]  ;;  %v8744_v14 = vld [vmem:[#allocation55_spill] sm:$0xff] }
 0x452   :  { %2615 = vmatpush.bf16.msrb.mxu0 %v8734_v4  ;;  %2641 = vmatpush.bf16.msrb.mxu2 %v8735_v7  ;;  %v8745_v4 = vld [vmem:[#allocation57_spill] sm:$0xff]  ;;  %v8746_v7 = vld [vmem:[#allocation62_spill] sm:$0xff] }
 0x454   :  { %2627 = vmatpush.bf16.msrb.mxu1 %v8736_v17  ;;  %2653 = vmatpush.bf16.msrb.mxu3 %v8737_v59  ;;  %v8747_v17 = vld [vmem:[#allocation64_spill] sm:$0xff]  ;;  %v8748_v59 = vld [vmem:[#allocation59_spill] sm:$0xff] }
 0x456   :  { %2616 = vmatpush.bf16.msrb.mxu0 %v8738_v29  ;;  %2642 = vmatpush.bf16.msrb.mxu2 %v8739_v26  ;;  %v8749_v29 = vld [vmem:[#allocation61_spill] sm:$0xff]  ;;  %v8750_v26 = vld [vmem:[#allocation63_spill] sm:$0xff] }
 0x458   :  { %2628 = vmatpush.bf16.msrb.mxu1 %v8740_v5  ;;  %2654 = vmatpush.bf16.msrb.mxu3 %v8741_v47  ;;  %v8751_v5 = vld [vmem:[#allocation65_spill] sm:$0xff] }
 0x45a   :  { %2617 = vmatpush.bf16.msrb.mxu0 %v8742_v22  ;;  %2643 = vmatpush.bf16.msrb.mxu2 %v8743_v46 }
 0x45c   :  { %2629 = vmatpush.bf16.msrb.mxu1 %v8744_v14  ;;  %2655 = vmatpush.bf16.msrb.mxu3 %v8745_v4 }
 0x45e   :  { %2618 = vmatpush.bf16.msrb.mxu0 %v8746_v7  ;;  %2644 = vmatpush.bf16.msrb.mxu2 %v8747_v17  ;;  %v2215_v47 = vpop.f32.mrf.mxu0 }
 0x460   :  { %2630 = vmatpush.bf16.msrb.mxu1 %v8748_v59  ;;  %2656 = vmatpush.bf16.msrb.mxu3 %v8749_v29 }
 0x464   :  { %2631 = vmatpush.bf16.msrb.mxu1 %v8750_v26  ;;  %2657 = vmatpush.bf16.msrb.mxu3 %v8751_v5  ;;  %v2228_v22 = vpop.f32.mrf.mxu1  ;;  %v2241_v24 = vpop.f32.mrf.mxu2  ;;  %v4252_v26 = vld [vmem:[%s7921_s0 + $0x110] sm:$0xff] }
 0x465   :  { %v2229_v16 = vadd.f32 %v2228_v22, %v2215_v47 }
 0x466   :  { %v2217_v46 = vpop.f32.mrf.mxu0 }
 0x46a   :  { %v2254_v25 = vpop.f32.mrf.mxu3 }
 0x46c   :  { %v2230_v14 = vpop.f32.mrf.mxu1  ;;  %v2243_v8 = vpop.f32.mrf.mxu2 }
 0x46d   :  { %v4250_v8 = vld [vmem:[%s7921_s0 + $0x100] sm:$0xff] }
 0x46e   :  { %v2267_v4 = vpop.f32.mrf.mxu0 }
 0x472   :  { %v2256_v3 = vpop.f32.mrf.mxu3 }
 0x473   :  { %v4253_v3 = vld [vmem:[%s7921_s0 + $0x118] sm:$0xff] }
 0x474   :  { %v2280_v7 = vpop.f32.mrf.mxu1  ;;  %v2293_v38 = vpop.f32.mrf.mxu2 }
 0x475   :  { %v2281_v59 = vadd.f32 %v2280_v7, %v2267_v4  ;;  %v2414_v7 = vadd.f32 %v4250_v8, %v2229_v16  ;;  %v2255_v4 = vadd.f32 %v2254_v25, %v2241_v24 }
 0x476   :  { %v2269_v17 = vpop.f32.mrf.mxu0 }
 0x477   :  { %v2416_v19 = vadd.f32 %v4252_v26, %v2281_v59 }
 0x479   :  { %v4260_v14 = vmul.f32 -1.442695, %v2416_v19 }
 0x47a   :  { %v2306_v11 = vpop.f32.mrf.mxu3 }
 0x47b   :  { %v2307_v46 = vadd.f32 %v2306_v11, %v2293_v38  ;;  %4564 = vpow2.f32 %v4260_v14 }
 0x47c   :  { %v2282_v29 = vpop.f32.mrf.mxu1  ;;  %v2295_v5 = vpop.f32.mrf.mxu2 }
 0x47d   :  { %v4251_v29 = vld [vmem:[%s7921_s0 + $0x108] sm:$0xff]  ;;  %v2417_v26 = vadd.f32 %v4253_v3, %v2307_v46  ;;  %v4258_v5 = vmul.f32 -1.442695, %v2414_v7 }
 0x47e   :  { %v2319_v40 = vpop.f32.mrf.mxu0  ;;  %v2415_v11 = vadd.f32 %v4251_v29, %v2255_v4 }
 0x47f   :  { %v4261_v38 = vmul.f32 -1.442695, %v2417_v26  ;;  %4566 = vpow2.f32 %v4258_v5 }
 0x480   :  { %v4259_v34 = vmul.f32 -1.442695, %v2415_v11  ;;  %v4256_v11 = vld [vmem:[%s7921_s0 + $0x130] sm:$0xff] }
 0x481   :  { %v4565_v16 = vpop.eup %4564  ;;  %4568 = vpow2.f32 %v4261_v38 }
 0x482   :  { %v2308_v17 = vpop.f32.mrf.mxu3  ;;  %4570 = vpow2.f32 %v4259_v34  ;;  %v7003_v25 = vadd.f32 1.0, %v4565_v16 }
 0x484   :  { %v6998_v53 = vpop.f32.mrf.mxu2  ;;  %v2332_v47 = vpop.f32.mrf.mxu1  ;;  %4572 = vrcp.f32 %v7003_v25  ;;  %vm2473_vm1 = vweird.f32 %v7003_v25 }
 0x485   :  { %v4567_v24 = vpop.eup %4566 }
 0x486   :  { %v2321_v22 = vpop.f32.mrf.mxu0  ;;  %v7005_v46 = vadd.f32 1.0, %v4567_v24 }
 0x487   :  { %v4569_v8 = vpop.eup %4568 }
 0x488   :  { %v4571_v3 = vpop.eup %4570  ;;  %v7008_v7 = vadd.f32 1.0, %v4569_v8  ;;  %4574 = vrcp.f32 %v7005_v46  ;;  %vm2435_vm3 = vweird.f32 %v7005_v46 }
 0x489   :  { %v7011_v14 = vadd.f32 1.0, %v4571_v3  ;;  %v2333_v3 = vadd.f32 %v2332_v47, %v2319_v40 }
 0x48a   :  { %v2358_v59 = vpop.f32.mrf.mxu3  ;;  %v7013_v4 = vpop.eup %4572  ;;  %4576 = vrcp.f32 %v7008_v7  ;;  %vm2488_vm8 = vweird.f32 %v7008_v7 }
 0x48b   :  { %4578 = vrcp.f32 %v7011_v14  ;;  %vm2474_vm0 = vweird.f32 %v7013_v4  ;;  %vm2450_vm12 = vweird.f32 %v7011_v14 }
 0x48c   :  { %v2347_v17 = vpop.f32.mrf.mxu2  ;;  %v2334_v19 = vpop.f32.mrf.mxu1  ;;  %vm7052_vm2 = vmor %vm2473_vm1, %vm2474_vm0 }
 0x48e   :  { %v7019_v29 = vpop.eup %4574 }
 0x48f   :  { %v2431_v22 = vmul.f32 %v7019_v29, %v7005_v46  ;;  %vm2436_vm4 = vweird.f32 %v7019_v29 }
 0x490   :  { %v7021_v26 = vpop.eup %4576  ;;  %vm7070_vm7 = vmor %vm2435_vm3, %vm2436_vm4 }
 0x491   :  { %v7028_v19 = vpop.eup %4578  ;;  %v2484_v24 = vmul.f32 %v7021_v26, %v7008_v7  ;;  %v2432_v27 = vsub.f32 1.0, %v2431_v22  ;;  %vm2489_vm5 = vweird.f32 %v7021_v26 }
 0x492   :  { %v2360_v62 = vpop.f32.mrf.mxu3  ;;  %v2446_v37 = vmul.f32 %v7028_v19, %v7011_v14  ;;  %vm7079_vm9 = vmor %vm2488_vm8, %vm2489_vm5  ;;  %vm2451_vm11 = vweird.f32 %v7028_v19 }
 0x493   :  { %v2469_v62 = vmul.f32 %v7013_v4, %v7003_v25  ;;  %v2433_v47 = vmul.f32 %v7019_v29, %v2432_v27  ;;  %vm2452_vm14 = vmor %vm2450_vm12, %vm2451_vm11 }
 0x495   :  { %v2470_v5 = vsub.f32 1.0, %v2469_v62  ;;  %v4254_v62 = vld [vmem:[%s7921_s0 + $0x120] sm:$0xff] }
 0x497   :  { %v2471_v21 = vmul.f32 %v7013_v4, %v2470_v5 }
 0x499   :  { %v2472_v22 = vadd.f32 %v7013_v4, %v2471_v21  ;;  %v2456_v21 = vand.u32 2147483648, %v7011_v14 }
 0x49e   :  { %v2371_v34 = vpop.f32.mrf.mxu0 }
 0x4a4   :  { %v2384_v38 = vpop.f32.mrf.mxu1  ;;  %v2397_v17 = vpop.f32.mrf.mxu2 }
 0x4a5   :  { %v2385_v16 = vadd.f32 %v2384_v38, %v2371_v34  ;;  %v2485_v34 = vsub.f32 1.0, %v2484_v24  ;;  %v4257_v38 = vld [vmem:[%s7921_s0 + $0x138] sm:$0xff]  ;;  %v2359_v24 = vadd.f32 %v2358_v59, %v6998_v53  ;;  %v2434_v53 = vadd.f32 %v7019_v29, %v2433_v47 }
 0x4a6   :  { %v2373_v8 = vpop.f32.mrf.mxu0  ;;  %v2441_v59 = vand.u32 2147483648, %v7005_v46  ;;  %v2494_v47 = vand.u32 2147483648, %v7008_v7 }
 0x4a7   :  { %v2420_v45 = vadd.f32 %v4256_v11, %v2385_v16  ;;  %v2418_v8 = vadd.f32 %v4254_v62, %v2333_v3  ;;  %v2447_v16 = vsub.f32 1.0, %v2446_v37  ;;  %v2486_v3 = vmul.f32 %v7021_v26, %v2485_v34 }
 0x4a8   :  { %v2439_v37 = vand.u32 2147483647, %v7005_v46  ;;  %v2442_v46 = vor.u32 1.1754944e-38, %v2441_v59 }
 0x4a9   :  { %v4262_v10 = vmul.f32 -1.442695, %v2420_v45  ;;  %v2479_v45 = vand.u32 2147483648, %v7003_v25 }
 0x4aa   :  { %v2410_v33 = vpop.f32.mrf.mxu3  ;;  %vm2440_vm10 = vcmp.eq.f32.partialorder %v2439_v37, 8.507059e+37 }
 0x4ab   :  { %4580 = vpow2.f32 %v4262_v10  ;;  %v2411_v40 = vadd.f32 %v2410_v33, %v2397_v17  ;;  %v2477_v33 = vand.u32 2147483647, %v7003_v25  ;;  %v4255_v10 = vld [vmem:[%s7921_s0 + $0x128] sm:$0xff]  ;;  %v2476_v25 = vsel %vm7052_vm2, %v7013_v4, %v2472_v22 }
 0x4ac   :  { %v2386_v5 = vpop.f32.mrf.mxu1  ;;  %v2399_v11 = vpop.f32.mrf.mxu2  ;;  %4582 = vtanh.f32 %v2418_v8  ;;  %v2480_v62 = vor.u32 1.1754944e-38, %v2479_v45  ;;  %v2419_v34 = vadd.f32 %v4255_v10, %v2359_v24  ;;  %v2438_v22 = vsel %vm7070_vm7, %v7019_v29, %v2434_v53 }
 0x4ad   :  { %v2421_v2 = vadd.f32 %v4257_v38, %v2411_v40  ;;  %v2448_v38 = vmul.f32 %v7028_v19, %v2447_v16  ;;  %vm2478_vm6 = vcmp.eq.f32.partialorder %v2477_v33, 8.507059e+37  ;;  %v2492_v11 = vand.u32 2147483647, %v7008_v7 }
 0x4ae   :  { %v2481_v4 = vsel %vm2478_vm6, %v2480_v62, %v2476_v25  ;;  %v2495_v33 = vor.u32 1.1754944e-38, %v2494_v47  ;;  %v2443_v10 = vsel %vm2440_vm10, %v2442_v46, %v2438_v22  ;;  %v2457_v62 = vor.u32 1.1754944e-38, %v2456_v21 }
 0x4af   :  { %v4263_v27 = vmul.f32 -1.442695, %v2421_v2  ;;  %v2487_v2 = vadd.f32 %v7021_v26, %v2486_v3  ;;  %v2538_v24 = vmul.f32 %v2481_v4, %v6833_v42  ;;  %v2449_v3 = vadd.f32 %v7028_v19, %v2448_v38 }
 0x4b0   :  { %vm2493_vm13 = vcmp.eq.f32.partialorder %v2492_v11, 8.507059e+37 }
 0x4b1   :  { %v4581_v17 = vpop.eup %4580  ;;  %4584 = vpow2.f32 %v4263_v27  ;;  %v2491_v29 = vsel %vm7079_vm9, %v7021_v26, %v2487_v2  ;;  %v2454_v27 = vand.u32 2147483647, %v7011_v14 }
 0x4b2   :  { %v2506_v8 = vadd.f32 1.0, %v4581_v17  ;;  %v2412_v40 = vpop.f32.mrf.mxu3  ;;  %v4583_v16 = vpop.eup %4582  ;;  %v2496_v53 = vsel %vm2493_vm13, %v2495_v33, %v2491_v29  ;;  %v2453_v17 = vsel %vm2452_vm14, %v7028_v19, %v2449_v3 }
 0x4b3   :  { %v2540_v37 = vmul.f32 %v4583_v16, %v2443_v10  ;;  %vm2455_vm15 = vcmp.eq.f32.partialorder %v2454_v27, 8.507059e+37  ;;  %v2539_v38 = vmul.f32 %v2496_v53, %v6838_v44 }
 0x4b4   :  { %4586 = vrcp.f32 %v2506_v8  ;;  %v2458_v2 = vsel %vm2455_vm15, %v2457_v62, %v2453_v17  ;;  %v2519_v47 = vand.u32 2147483648, %v2506_v8  ;;  %v2517_v4 = vand.u32 2147483647, %v2506_v8  ;;  %v8759_v62 = vld [vmem:[#allocation104_spill] sm:$0xff] }
 0x4b5   :  { %4588 = vtanh.f32 %v2419_v34  ;;  %v7092_v25 = vadd.f32 %v2540_v37, %v2538_v24  ;;  %vm2513_vm1 = vweird.f32 %v2506_v8 }
 0x4b6   :  { %v2520_v45 = vor.u32 1.1754944e-38, %v2519_v47  ;;  %vm2518_vm3 = vcmp.eq.f32.partialorder %v2517_v4, 8.507059e+37  ;;  %v8765_v47 = vld [vmem:[#allocation108_spill] sm:$0xff]  ;;  %v8767_v4 = vld [vmem:[#allocation105_spill] sm:$0xff] }
 0x4b7   :  { %v4585_v7 = vpop.eup %4584 }
 0x4b8   :  { %v2507_v42 = vadd.f32 1.0, %v4585_v7 }
 0x4ba   :  { %v4587_v59 = vpop.eup %4586  ;;  %4590 = vrcp.f32 %v2507_v42  ;;  %v2534_v29 = vand.u32 2147483648, %v2507_v42  ;;  %v2532_v10 = vand.u32 2147483647, %v2507_v42  ;;  %vm2528_vm5 = vweird.f32 %v2507_v42 }
 0x4bb   :  { %v4589_v26 = vpop.eup %4588  ;;  %v2509_v34 = vmul.f32 %v4587_v59, %v2506_v8  ;;  %4592 = vtanh.f32 %v7092_v25  ;;  %vm2514_vm0 = vweird.f32 %v4587_v59 }
 0x4bc   :  { %v2541_v14 = vmul.f32 %v4589_v26, %v2458_v2  ;;  %vm2515_vm2 = vmor %vm2513_vm1, %vm2514_vm0  ;;  %v2535_v8 = vor.u32 1.1754944e-38, %v2534_v29  ;;  %vm2533_vm7 = vcmp.eq.f32.partialorder %v2532_v10, 8.507059e+37  ;;  %v8762_v2 = vld [vmem:[#allocation99_spill] sm:$0xff]  ;;  %v8776_v29 = vld [vmem:[#allocation118_spill] sm:$0xff] }
 0x4bd   :  { %v2510_v40 = vsub.f32 1.0, %v2509_v34  ;;  %v8760_v34 = vld [vmem:[#allocation95_spill] sm:$0xff]  ;;  %v8779_v10 = vld [vmem:[#allocation117_spill] sm:$0xff] }
 0x4be   :  { %v7097_v11 = vadd.f32 %v2541_v14, %v2539_v38  ;;  %v8761_v38 = vld [vmem:[#allocation97_spill] sm:$0xff]  ;;  %v8764_v14 = vld [vmem:[#allocation106_spill] sm:$0xff] }
 0x4bf   :  { %v2511_v5 = vmul.f32 %v4587_v59, %v2510_v40  ;;  %v8763_v40 = vld [vmem:[#allocation101_spill] sm:$0xff] }
 0x4c0   :  { %v4591_v22 = vpop.eup %4590  ;;  %4594 = vtanh.f32 %v7097_v11 }
 0x4c1   :  { %v2512_v19 = vadd.f32 %v4587_v59, %v2511_v5  ;;  %v2524_v16 = vmul.f32 %v4591_v22, %v2507_v42  ;;  %v4593_v24 = vpop.eup %4592  ;;  %vm2529_vm4 = vweird.f32 %v4591_v22  ;;  %v8758_v42 = vld [vmem:[#allocation102_spill] sm:$0xff]  ;;  %v8766_v5 = vld [vmem:[#allocation103_spill] sm:$0xff] }
 0x4c2   :  { %vm2530_vm6 = vmor %vm2528_vm5, %vm2529_vm4 }
 0x4c3   :  { %v2516_v46 = vsel %vm2515_vm2, %v4587_v59, %v2512_v19  ;;  %v2525_v44 = vsub.f32 1.0, %v2524_v16  ;;  %v8769_v19 = vld [vmem:[#allocation112_spill] sm:$0xff]  ;;  %v8770_v16 = vld [vmem:[#allocation107_spill] sm:$0xff] }
 0x4c4   :  { %v2521_v3 = vsel %vm2518_vm3, %v2520_v45, %v2516_v46  ;;  %v8771_v45 = vld [vmem:[#allocation109_spill] sm:$0xff]  ;;  %v8772_v46 = vld [vmem:[#allocation114_spill] sm:$0xff] }
 0x4c5   :  { %v2546_v7 = vmul.f32 %v4593_v24, %v2521_v3  ;;  %v2526_v33 = vmul.f32 %v4591_v22, %v2525_v44  ;;  %v8773_v44 = vld [vmem:[#allocation116_spill] sm:$0xff]  ;;  %v8774_v24 = vld [vmem:[#allocation111_spill] sm:$0xff]  ;;  %v8775_v3 = vld [vmem:[#allocation113_spill] sm:$0xff] }
 0x4c6   :  { %v4595_v53 = vpop.eup %4594 }
 0x4c7   :  { %v7100_v21 = vpack.c.bf16 %v2546_v7, %v2546_v7  ;;  %v2527_v37 = vadd.f32 %v4591_v22, %v2526_v33  ;;  %v8777_v7 = vld [vmem:[#allocation120_spill] sm:$0xff]  ;;  %v8778_v33 = vld [vmem:[#allocation115_spill] sm:$0xff] }
 0x4c9   :  { %v2531_v27 = vsel %vm2530_vm6, %v4591_v22, %v2527_v37  ;;  %2567 = vmatmul.bf16.vlgmr.msra.gmra.mxu0 %v7100_v21  ;;  %2593 = vmatmul.bf16.vlgmr.msra.gmra.mxu2 %v7100_v21  ;;  %v8768_v22 = vld [vmem:[#allocation110_spill] sm:$0xff] }
 0x4ca   :  { %v2536_v59 = vsel %vm2533_vm7, %v2535_v8, %v2531_v27  ;;  %2663 = vmatpush.bf16.msra.mxu0 %v8351_v15  ;;  %2689 = vmatpush.bf16.msra.mxu2 %v8352_v55  ;;  %v8780_v37 = vld [vmem:[#allocation122_spill] sm:$0xff]  ;;  %v8781_v8 = vld [vmem:[#allocation124_spill] sm:$0xff]  ;;  %v8782_v27 = vld [vmem:[#allocation119_spill] sm:$0xff] }
 0x4cb   :  { %v2547_v17 = vmul.f32 %v4595_v53, %v2536_v59  ;;  %v8783_v53 = vld [vmem:[#allocation121_spill] sm:$0xff]  ;;  %v8784_v59 = vld [vmem:[#allocation126_spill] sm:$0xff] }
 0x4cd   :  { %v7106_v26 = vpack.c.bf16 %v2547_v17, %v2547_v17  ;;  %v8785_v17 = vld [vmem:[#allocation128_spill] sm:$0xff] }
 0x4ce   :  { %2664 = vmatpush.bf16.msra.mxu0 %v8353_v63  ;;  %2690 = vmatpush.bf16.msra.mxu2 %v8354_v6 }
 0x4cf   :  { %2580 = vmatmul.bf16.vlgmr.msra.gmra.mxu1 %v7106_v26  ;;  %2606 = vmatmul.bf16.vlgmr.msra.gmra.mxu3 %v7106_v26 }
 0x4d0   :  { %2676 = vmatpush.bf16.msra.mxu1 %v8355_v60  ;;  %2702 = vmatpush.bf16.msra.mxu3 %v8356_v23 }
 0x4d2   :  { %2665 = vmatpush.bf16.msra.mxu0 %v8357_v54  ;;  %2691 = vmatpush.bf16.msra.mxu2 %v8358_v61 }
 0x4d4   :  { %2677 = vmatpush.bf16.msra.mxu1 %v8359_v51  ;;  %2703 = vmatpush.bf16.msra.mxu3 %v8360_v49 }
 0x4d6   :  { %2666 = vmatpush.bf16.msra.mxu0 %v8361_v1  ;;  %2692 = vmatpush.bf16.msra.mxu2 %v8362_v52 }
 0x4d8   :  { %2678 = vmatpush.bf16.msra.mxu1 %v8363_v39  ;;  %2704 = vmatpush.bf16.msra.mxu3 %v8364_v43 }
 0x4d9   :  { %2619 = vmatmul.bf16.vlgmr.msrb.gmra.mxu0 %v7100_v21  ;;  %2645 = vmatmul.bf16.vlgmr.msrb.gmra.mxu2 %v7100_v21 }
 0x4da   :  { %2667 = vmatpush.bf16.msra.mxu0 %v8365_v31  ;;  %2693 = vmatpush.bf16.msra.mxu2 %v8366_v35 }
 0x4dc   :  { %2679 = vmatpush.bf16.msra.mxu1 %v8367_v57  ;;  %2705 = vmatpush.bf16.msra.mxu3 %v8368_v9 }
 0x4de   :  { %2668 = vmatpush.bf16.msra.mxu0 %v8369_v41  ;;  %2694 = vmatpush.bf16.msra.mxu2 %v8370_v20 }
 0x4df   :  { %2632 = vmatmul.bf16.vlgmr.msrb.gmra.mxu1 %v7106_v26  ;;  %2658 = vmatmul.bf16.vlgmr.msrb.gmra.mxu3 %v7106_v26 }
 0x4e0   :  { %2680 = vmatpush.bf16.msra.mxu1 %v8371_v30  ;;  %2706 = vmatpush.bf16.msra.mxu3 %v8372_v48 }
 0x4e2   :  { %2669 = vmatpush.bf16.msra.mxu0 %v8452_v28  ;;  %2695 = vmatpush.bf16.msra.mxu2 %v8453_v0 }
 0x4e4   :  { %2681 = vmatpush.bf16.msra.mxu1 %v8454_v13  ;;  %2707 = vmatpush.bf16.msra.mxu3 %v8455_v12 }
 0x4e6   :  { %2670 = vmatpush.bf16.msra.mxu0 %v8456_v32  ;;  %2696 = vmatpush.bf16.msra.mxu2 %v8457_v36 }
 0x4e8   :  { %2682 = vmatpush.bf16.msra.mxu1 %v8460_v18  ;;  %2708 = vmatpush.bf16.msra.mxu3 %v8461_v58 }
 0x4e9   :  { %2671 = vmatmul.bf16.vlgmr.msra.gmra.mxu0 %v7100_v21  ;;  %2697 = vmatmul.bf16.vlgmr.msra.gmra.mxu2 %v7100_v21 }
 0x4ea   :  { %2715 = vmatpush.bf16.msrb.mxu0 %v8458_v56  ;;  %2741 = vmatpush.bf16.msrb.mxu2 %v8459_v50 }
 0x4ec   :  { %2683 = vmatpush.bf16.msra.mxu1 %v8760_v34  ;;  %2709 = vmatpush.bf16.msra.mxu3 %v8761_v38 }
 0x4ee   :  { %2716 = vmatpush.bf16.msrb.mxu0 %v8758_v42  ;;  %2742 = vmatpush.bf16.msrb.mxu2 %v8759_v62 }
 0x4ef   :  { %2684 = vmatmul.bf16.vlgmr.msra.gmra.mxu1 %v7106_v26  ;;  %2710 = vmatmul.bf16.vlgmr.msra.gmra.mxu3 %v7106_v26 }
 0x4f0   :  { %2728 = vmatpush.bf16.msrb.mxu1 %v8762_v2  ;;  %2754 = vmatpush.bf16.msrb.mxu3 %v8763_v40 }
 0x4f2   :  { %2717 = vmatpush.bf16.msrb.mxu0 %v8764_v14  ;;  %2743 = vmatpush.bf16.msrb.mxu2 %v8765_v47 }
 0x4f4   :  { %2729 = vmatpush.bf16.msrb.mxu1 %v8766_v5  ;;  %2755 = vmatpush.bf16.msrb.mxu3 %v8767_v4 }
 0x4f6   :  { %2718 = vmatpush.bf16.msrb.mxu0 %v8768_v22  ;;  %2744 = vmatpush.bf16.msrb.mxu2 %v8769_v19 }
 0x4f8   :  { %2730 = vmatpush.bf16.msrb.mxu1 %v8770_v16  ;;  %2756 = vmatpush.bf16.msrb.mxu3 %v8771_v45 }
 0x4fa   :  { %2719 = vmatpush.bf16.msrb.mxu0 %v8772_v46  ;;  %2745 = vmatpush.bf16.msrb.mxu2 %v8773_v44 }
 0x4fc   :  { %2731 = vmatpush.bf16.msrb.mxu1 %v8774_v24  ;;  %2757 = vmatpush.bf16.msrb.mxu3 %v8775_v3  ;;  %v8786_v3 = vld [vmem:[#allocation2_spill] sm:$0xff] }
 0x4fe   :  { %2720 = vmatpush.bf16.msrb.mxu0 %v8776_v29  ;;  %2746 = vmatpush.bf16.msrb.mxu2 %v8777_v7  ;;  %v8787_v29 = vld [vmem:[#allocation4_spill] sm:$0xff]  ;;  %v8788_v7 = vld [vmem:[#allocation123_spill] sm:$0xff] }
 0x500   :  { %2732 = vmatpush.bf16.msrb.mxu1 %v8778_v33  ;;  %2758 = vmatpush.bf16.msrb.mxu3 %v8779_v10  ;;  %v8789_v33 = vld [vmem:[#allocation125_spill] sm:$0xff] }
 0x502   :  { %2721 = vmatpush.bf16.msrb.mxu0 %v8780_v37  ;;  %2747 = vmatpush.bf16.msrb.mxu2 %v8781_v8  ;;  %v8790_v8 = vld [vmem:[#allocation6_spill] sm:$0xff] }
 0x504   :  { %2733 = vmatpush.bf16.msrb.mxu1 %v8782_v27  ;;  %2759 = vmatpush.bf16.msrb.mxu3 %v8783_v53  ;;  %v8791_v27 = vld [vmem:[#allocation8_spill] sm:$0xff]  ;;  %v8792_v53 = vld [vmem:[#allocation127_spill] sm:$0xff] }
 0x506   :  { %2722 = vmatpush.bf16.msrb.mxu0 %v8784_v59  ;;  %2748 = vmatpush.bf16.msrb.mxu2 %v8785_v17  ;;  %v8793_v59 = vld [vmem:[#allocation129_spill] sm:$0xff]  ;;  %v8794_v17 = vld [vmem:[#allocation3_spill] sm:$0xff] }
 0x508   :  { %2734 = vmatpush.bf16.msrb.mxu1 %v8788_v7  ;;  %2760 = vmatpush.bf16.msrb.mxu3 %v8789_v33  ;;  %v8796_v33 = vld [vmem:[#allocation10_spill] sm:$0xff]  ;;  %v8797_v7 = vld [vmem:[#allocation12_spill] sm:$0xff] }
 0x509   :  { %2723 = vmatmul.bf16.vlgmr.msrb.gmra.mxu0 %v7100_v21  ;;  %2749 = vmatmul.bf16.vlgmr.msrb.gmra.mxu2 %v7100_v21  ;;  %v8798_v21 = vld [vmem:[#allocation7_spill] sm:$0xff] }
 0x50a   :  { %2912 = vmatpush.bf16.msra.mxu0 %v8786_v3  ;;  %2938 = vmatpush.bf16.msra.mxu2 %v8787_v29  ;;  %v8795_v3 = vld [vmem:[#allocation5_spill] sm:$0xff]  ;;  %v8805_v29 = vld [vmem:[#allocation20_spill] sm:$0xff] }
 0x50c   :  { %2735 = vmatpush.bf16.msrb.mxu1 %v8792_v53  ;;  %2761 = vmatpush.bf16.msrb.mxu3 %v8793_v59  ;;  %v8801_v53 = vld [vmem:[#allocation16_spill] sm:$0xff]  ;;  %v8802_v59 = vld [vmem:[#allocation11_spill] sm:$0xff] }
 0x50e   :  { %2913 = vmatpush.bf16.msra.mxu0 %v8790_v8  ;;  %2939 = vmatpush.bf16.msra.mxu2 %v8791_v27  ;;  %v8799_v8 = vld [vmem:[#allocation9_spill] sm:$0xff]  ;;  %v8800_v27 = vld [vmem:[#allocation14_spill] sm:$0xff] }
 0x50f   :  { %2736 = vmatmul.bf16.vlgmr.msrb.gmra.mxu1 %v7106_v26  ;;  %2762 = vmatmul.bf16.vlgmr.msrb.gmra.mxu3 %v7106_v26  ;;  %v8806_v26 = vld [vmem:[#allocation15_spill] sm:$0xff] }
 0x510   :  { %2925 = vmatpush.bf16.msra.mxu1 %v8794_v17  ;;  %2951 = vmatpush.bf16.msra.mxu3 %v8795_v3  ;;  %v8803_v17 = vld [vmem:[#allocation13_spill] sm:$0xff]  ;;  %v8804_v3 = vld [vmem:[#allocation18_spill] sm:$0xff] }
 0x512   :  { %2914 = vmatpush.bf16.msra.mxu0 %v8796_v33  ;;  %2940 = vmatpush.bf16.msra.mxu2 %v8797_v7  ;;  %v8807_v33 = vld [vmem:[#allocation17_spill] sm:$0xff]  ;;  %v8808_v7 = vld [vmem:[#allocation22_spill] sm:$0xff] }
 0x514   :  { %2926 = vmatpush.bf16.msra.mxu1 %v8798_v21  ;;  %2952 = vmatpush.bf16.msra.mxu3 %v8799_v8  ;;  %v8809_v21 = vld [vmem:[#allocation24_spill] sm:$0xff]  ;;  %v8810_v8 = vld [vmem:[#allocation19_spill] sm:$0xff] }
 0x516   :  { %2915 = vmatpush.bf16.msra.mxu0 %v8800_v27  ;;  %2941 = vmatpush.bf16.msra.mxu2 %v8801_v53  ;;  %v8811_v27 = vld [vmem:[#allocation21_spill] sm:$0xff]  ;;  %v8812_v53 = vld [vmem:[#allocation26_spill] sm:$0xff] }
 0x518   :  { %2927 = vmatpush.bf16.msra.mxu1 %v8802_v59  ;;  %2953 = vmatpush.bf16.msra.mxu3 %v8803_v17  ;;  %v8813_v59 = vld [vmem:[#allocation28_spill] sm:$0xff]  ;;  %v8814_v17 = vld [vmem:[#allocation23_spill] sm:$0xff] }
 0x51a   :  { %2916 = vmatpush.bf16.msra.mxu0 %v8804_v3  ;;  %2942 = vmatpush.bf16.msra.mxu2 %v8805_v29  ;;  %v8815_v3 = vld [vmem:[#allocation25_spill] sm:$0xff]  ;;  %v8816_v29 = vld [vmem:[#allocation30_spill] sm:$0xff] }
 0x51c   :  { %2928 = vmatpush.bf16.msra.mxu1 %v8806_v26  ;;  %2954 = vmatpush.bf16.msra.mxu3 %v8807_v33  ;;  %v8817_v26 = vld [vmem:[#allocation32_spill] sm:$0xff]  ;;  %v8818_v33 = vld [vmem:[#allocation34_spill] sm:$0xff] }
 0x51e   :  { %2917 = vmatpush.bf16.msra.mxu0 %v8808_v7  ;;  %2943 = vmatpush.bf16.msra.mxu2 %v8809_v21  ;;  %v8819_v7 = vld [vmem:[#allocation36_spill] sm:$0xff]  ;;  %v8820_v21 = vld [vmem:[#allocation27_spill] sm:$0xff] }
 0x520   :  { %2929 = vmatpush.bf16.msra.mxu1 %v8810_v8  ;;  %2955 = vmatpush.bf16.msra.mxu3 %v8811_v27  ;;  %v8821_v8 = vld [vmem:[#allocation29_spill] sm:$0xff]  ;;  %v8822_v27 = vld [vmem:[#allocation38_spill] sm:$0xff] }
 0x522   :  { %2918 = vmatpush.bf16.msra.mxu0 %v8812_v53  ;;  %2944 = vmatpush.bf16.msra.mxu2 %v8813_v59  ;;  %v8823_v53 = vld [vmem:[#allocation40_spill] sm:$0xff]  ;;  %v8824_v59 = vld [vmem:[#allocation31_spill] sm:$0xff] }
 0x524   :  { %2930 = vmatpush.bf16.msra.mxu1 %v8814_v17  ;;  %2956 = vmatpush.bf16.msra.mxu3 %v8815_v3  ;;  %v8825_v17 = vld [vmem:[#allocation33_spill] sm:$0xff]  ;;  %v8826_v3 = vld [vmem:[#allocation35_spill] sm:$0xff] }
 0x526   :  { %2919 = vmatpush.bf16.msra.mxu0 %v8816_v29  ;;  %2945 = vmatpush.bf16.msra.mxu2 %v8817_v26  ;;  %v8827_v29 = vld [vmem:[#allocation37_spill] sm:$0xff]  ;;  %v8828_v26 = vld [vmem:[#allocation42_spill] sm:$0xff] }
 0x528   :  { %2931 = vmatpush.bf16.msra.mxu1 %v8820_v21  ;;  %2957 = vmatpush.bf16.msra.mxu3 %v8821_v8  ;;  %v8831_v21 = vld [vmem:[#allocation41_spill] sm:$0xff]  ;;  %v8832_v8 = vld [vmem:[#allocation46_spill] sm:$0xff] }
 0x52a   :  { %2964 = vmatpush.bf16.msrb.mxu0 %v8818_v33  ;;  %2990 = vmatpush.bf16.msrb.mxu2 %v8819_v7  ;;  %v8829_v33 = vld [vmem:[#allocation44_spill] sm:$0xff]  ;;  %v8830_v7 = vld [vmem:[#allocation39_spill] sm:$0xff] }
 0x52c   :  { %2932 = vmatpush.bf16.msra.mxu1 %v8824_v59  ;;  %2958 = vmatpush.bf16.msra.mxu3 %v8825_v17  ;;  %v8835_v59 = vld [vmem:[#allocation45_spill] sm:$0xff]  ;;  %v8836_v17 = vld [vmem:[#allocation50_spill] sm:$0xff] }
 0x52e   :  { %2965 = vmatpush.bf16.msrb.mxu0 %v8822_v27  ;;  %2991 = vmatpush.bf16.msrb.mxu2 %v8823_v53  ;;  %v8833_v27 = vld [vmem:[#allocation48_spill] sm:$0xff]  ;;  %v8834_v53 = vld [vmem:[#allocation43_spill] sm:$0xff] }
 0x530   :  { %2977 = vmatpush.bf16.msrb.mxu1 %v8826_v3  ;;  %3003 = vmatpush.bf16.msrb.mxu3 %v8827_v29  ;;  %v8837_v3 = vld [vmem:[#allocation52_spill] sm:$0xff]  ;;  %v8838_v29 = vld [vmem:[#allocation47_spill] sm:$0xff] }
 0x532   :  { %2966 = vmatpush.bf16.msrb.mxu0 %v8828_v26  ;;  %2992 = vmatpush.bf16.msrb.mxu2 %v8829_v33  ;;  %v8839_v26 = vld [vmem:[#allocation49_spill] sm:$0xff]  ;;  %v8840_v33 = vld [vmem:[#allocation54_spill] sm:$0xff] }
 0x534   :  { %2978 = vmatpush.bf16.msrb.mxu1 %v8830_v7  ;;  %3004 = vmatpush.bf16.msrb.mxu3 %v8831_v21  ;;  %v8841_v7 = vld [vmem:[#allocation56_spill] sm:$0xff]  ;;  %v8842_v21 = vld [vmem:[#allocation51_spill] sm:$0xff] }
 0x536   :  { %2967 = vmatpush.bf16.msrb.mxu0 %v8832_v8  ;;  %2993 = vmatpush.bf16.msrb.mxu2 %v8833_v27  ;;  %v8843_v8 = vld [vmem:[#allocation53_spill] sm:$0xff]  ;;  %v8844_v27 = vld [vmem:[#allocation58_spill] sm:$0xff] }
 0x538   :  { %2979 = vmatpush.bf16.msrb.mxu1 %v8834_v53  ;;  %3005 = vmatpush.bf16.msrb.mxu3 %v8835_v59  ;;  %v8845_v53 = vld [vmem:[#allocation60_spill] sm:$0xff]  ;;  %v8846_v59 = vld [vmem:[#allocation55_spill] sm:$0xff] }
 0x53a   :  { %2968 = vmatpush.bf16.msrb.mxu0 %v8836_v17  ;;  %2994 = vmatpush.bf16.msrb.mxu2 %v8837_v3  ;;  %v8847_v17 = vld [vmem:[#allocation57_spill] sm:$0xff]  ;;  %v8848_v3 = vld [vmem:[#allocation62_spill] sm:$0xff] }
 0x53c   :  { %2980 = vmatpush.bf16.msrb.mxu1 %v8838_v29  ;;  %3006 = vmatpush.bf16.msrb.mxu3 %v8839_v26  ;;  %v8849_v29 = vld [vmem:[#allocation64_spill] sm:$0xff]  ;;  %v8850_v26 = vld [vmem:[#allocation59_spill] sm:$0xff] }
 0x53e   :  { %2969 = vmatpush.bf16.msrb.mxu0 %v8840_v33  ;;  %2995 = vmatpush.bf16.msrb.mxu2 %v8841_v7  ;;  %v8851_v33 = vld [vmem:[#allocation61_spill] sm:$0xff]  ;;  %v8852_v7 = vld [vmem:[#allocation63_spill] sm:$0xff] }
 0x540   :  { %2981 = vmatpush.bf16.msrb.mxu1 %v8842_v21  ;;  %3007 = vmatpush.bf16.msrb.mxu3 %v8843_v8  ;;  %v8853_v21 = vld [vmem:[#allocation65_spill] sm:$0xff] }
 0x542   :  { %2970 = vmatpush.bf16.msrb.mxu0 %v8844_v27  ;;  %2996 = vmatpush.bf16.msrb.mxu2 %v8845_v53 }
 0x544   :  { %2982 = vmatpush.bf16.msrb.mxu1 %v8846_v59  ;;  %3008 = vmatpush.bf16.msrb.mxu3 %v8847_v17 }
 0x546   :  { %2971 = vmatpush.bf16.msrb.mxu0 %v8848_v3  ;;  %2997 = vmatpush.bf16.msrb.mxu2 %v8849_v29  ;;  %v2568_v8 = vpop.f32.mrf.mxu0 }
 0x548   :  { %2983 = vmatpush.bf16.msrb.mxu1 %v8850_v26  ;;  %3009 = vmatpush.bf16.msrb.mxu3 %v8851_v33 }
 0x54c   :  { %2984 = vmatpush.bf16.msrb.mxu1 %v8852_v7  ;;  %3010 = vmatpush.bf16.msrb.mxu3 %v8853_v21  ;;  %v2581_v27 = vpop.f32.mrf.mxu1  ;;  %v2594_v37 = vpop.f32.mrf.mxu2  ;;  %v4266_v7 = vld [vmem:[%s7921_s0 + $0x150] sm:$0xff] }
 0x54d   :  { %v2582_v19 = vadd.f32 %v2581_v27, %v2568_v8 }
 0x54e   :  { %v2570_v53 = vpop.f32.mrf.mxu0 }
 0x552   :  { %v2607_v10 = vpop.f32.mrf.mxu3 }
 0x554   :  { %v2583_v59 = vpop.f32.mrf.mxu1  ;;  %v2596_v24 = vpop.f32.mrf.mxu2 }
 0x555   :  { %v4264_v24 = vld [vmem:[%s7921_s0 + $0x140] sm:$0xff] }
 0x556   :  { %v2620_v17 = vpop.f32.mrf.mxu0 }
 0x55a   :  { %v2609_v44 = vpop.f32.mrf.mxu3 }
 0x55b   :  { %v4267_v44 = vld [vmem:[%s7921_s0 + $0x158] sm:$0xff] }
 0x55c   :  { %v2633_v3 = vpop.f32.mrf.mxu1  ;;  %v2646_v46 = vpop.f32.mrf.mxu2 }
 0x55d   :  { %v2634_v26 = vadd.f32 %v2633_v3, %v2620_v17  ;;  %v2767_v3 = vadd.f32 %v4264_v24, %v2582_v19  ;;  %v2608_v17 = vadd.f32 %v2607_v10, %v2594_v37 }
 0x55e   :  { %v2622_v29 = vpop.f32.mrf.mxu0 }
 0x55f   :  { %v2769_v22 = vadd.f32 %v4266_v7, %v2634_v26 }
 0x561   :  { %v4274_v59 = vmul.f32 -1.442695, %v2769_v22 }
 0x562   :  { %v2659_v45 = vpop.f32.mrf.mxu3 }
 0x563   :  { %v2660_v53 = vadd.f32 %v2659_v45, %v2646_v46  ;;  %4596 = vpow2.f32 %v4274_v59 }
 0x564   :  { %v2635_v33 = vpop.f32.mrf.mxu1  ;;  %v2648_v21 = vpop.f32.mrf.mxu2 }
 0x565   :  { %v4265_v33 = vld [vmem:[%s7921_s0 + $0x148] sm:$0xff]  ;;  %v2770_v7 = vadd.f32 %v4267_v44, %v2660_v53  ;;  %v4272_v21 = vmul.f32 -1.442695, %v2767_v3 }
 0x566   :  { %v2672_v16 = vpop.f32.mrf.mxu0  ;;  %v2768_v45 = vadd.f32 %v4265_v33, %v2608_v17 }
 0x567   :  { %v4275_v46 = vmul.f32 -1.442695, %v2770_v7  ;;  %4598 = vpow2.f32 %v4272_v21 }
 0x568   :  { %v4273_v5 = vmul.f32 -1.442695, %v2768_v45  ;;  %v4270_v45 = vld [vmem:[%s7921_s0 + $0x170] sm:$0xff] }
 0x569   :  { %v4597_v19 = vpop.eup %4596  ;;  %4600 = vpow2.f32 %v4275_v46 }
 0x56a   :  { %v2661_v29 = vpop.f32.mrf.mxu3  ;;  %4602 = vpow2.f32 %v4273_v5  ;;  %v7262_v10 = vadd.f32 1.0, %v4597_v19 }
 0x56c   :  { %v7257_v4 = vpop.f32.mrf.mxu2  ;;  %v2685_v8 = vpop.f32.mrf.mxu1  ;;  %4604 = vrcp.f32 %v7262_v10  ;;  %vm2826_vm9 = vweird.f32 %v7262_v10 }
 0x56d   :  { %v4599_v37 = vpop.eup %4598 }
 0x56e   :  { %v2674_v27 = vpop.f32.mrf.mxu0  ;;  %v7264_v53 = vadd.f32 1.0, %v4599_v37 }
 0x56f   :  { %v4601_v24 = vpop.eup %4600 }
 0x570   :  { %v4603_v44 = vpop.eup %4602  ;;  %v7267_v3 = vadd.f32 1.0, %v4601_v24  ;;  %4606 = vrcp.f32 %v7264_v53  ;;  %vm2788_vm11 = vweird.f32 %v7264_v53 }
 0x571   :  { %v7270_v59 = vadd.f32 1.0, %v4603_v44  ;;  %v2686_v44 = vadd.f32 %v2685_v8, %v2672_v16 }
 0x572   :  { %v2711_v26 = vpop.f32.mrf.mxu3  ;;  %v7272_v17 = vpop.eup %4604  ;;  %4608 = vrcp.f32 %v7267_v3  ;;  %vm2841_vm0 = vweird.f32 %v7267_v3 }
 0x573   :  { %4610 = vrcp.f32 %v7270_v59  ;;  %vm2827_vm8 = vweird.f32 %v7272_v17  ;;  %vm2803_vm4 = vweird.f32 %v7270_v59 }
 0x574   :  { %v2700_v29 = vpop.f32.mrf.mxu2  ;;  %v2687_v22 = vpop.f32.mrf.mxu1  ;;  %vm7311_vm10 = vmor %vm2826_vm9, %vm2827_vm8 }
 0x576   :  { %v7278_v33 = vpop.eup %4606 }
 0x577   :  { %v2784_v27 = vmul.f32 %v7278_v33, %v7264_v53  ;;  %vm2789_vm12 = vweird.f32 %v7278_v33 }
 0x578   :  { %v7280_v7 = vpop.eup %4608  ;;  %vm7329_vm15 = vmor %vm2788_vm11, %vm2789_vm12 }
 0x579   :  { %v7287_v22 = vpop.eup %4610  ;;  %v2837_v37 = vmul.f32 %v7280_v7, %v7267_v3  ;;  %v2785_v40 = vsub.f32 1.0, %v2784_v27  ;;  %vm2842_vm13 = vweird.f32 %v7280_v7 }
 0x57a   :  { %v2713_v47 = vpop.f32.mrf.mxu3  ;;  %v2799_v38 = vmul.f32 %v7287_v22, %v7270_v59  ;;  %vm7338_vm1 = vmor %vm2841_vm0, %vm2842_vm13  ;;  %vm2804_vm3 = vweird.f32 %v7287_v22 }
 0x57b   :  { %v2822_v47 = vmul.f32 %v7272_v17, %v7262_v10  ;;  %v2786_v8 = vmul.f32 %v7278_v33, %v2785_v40  ;;  %vm2805_vm6 = vmor %vm2803_vm4, %vm2804_vm3 }
 0x57d   :  { %v2823_v21 = vsub.f32 1.0, %v2822_v47  ;;  %v4268_v47 = vld [vmem:[%s7921_s0 + $0x160] sm:$0xff] }
 0x57f   :  { %v2824_v2 = vmul.f32 %v7272_v17, %v2823_v21 }
 0x581   :  { %v2825_v27 = vadd.f32 %v7272_v17, %v2824_v2  ;;  %v2809_v2 = vand.u32 2147483648, %v7270_v59 }
 0x586   :  { %v2724_v5 = vpop.f32.mrf.mxu0 }
 0x58c   :  { %v2737_v46 = vpop.f32.mrf.mxu1  ;;  %v2750_v29 = vpop.f32.mrf.mxu2 }
 0x58d   :  { %v2738_v19 = vadd.f32 %v2737_v46, %v2724_v5  ;;  %v2838_v5 = vsub.f32 1.0, %v2837_v37  ;;  %v4271_v46 = vld [vmem:[%s7921_s0 + $0x178] sm:$0xff]  ;;  %v2712_v37 = vadd.f32 %v2711_v26, %v7257_v4  ;;  %v2787_v4 = vadd.f32 %v7278_v33, %v2786_v8 }
 0x58e   :  { %v2726_v24 = vpop.f32.mrf.mxu0  ;;  %v2794_v26 = vand.u32 2147483648, %v7264_v53  ;;  %v2847_v8 = vand.u32 2147483648, %v7267_v3 }
 0x58f   :  { %v2773_v14 = vadd.f32 %v4270_v45, %v2738_v19  ;;  %v2771_v24 = vadd.f32 %v4268_v47, %v2686_v44  ;;  %v2800_v19 = vsub.f32 1.0, %v2799_v38  ;;  %v2839_v44 = vmul.f32 %v7280_v7, %v2838_v5 }
 0x590   :  { %v2792_v38 = vand.u32 2147483647, %v7264_v53  ;;  %v2795_v53 = vor.u32 1.1754944e-38, %v2794_v26 }
 0x591   :  { %v4276_v34 = vmul.f32 -1.442695, %v2773_v14  ;;  %v2832_v14 = vand.u32 2147483648, %v7262_v10 }
 0x592   :  { %v2763_v62 = vpop.f32.mrf.mxu3  ;;  %vm2793_vm2 = vcmp.eq.f32.partialorder %v2792_v38, 8.507059e+37 }
 0x593   :  { %4612 = vpow2.f32 %v4276_v34  ;;  %v2764_v16 = vadd.f32 %v2763_v62, %v2750_v29  ;;  %v2830_v62 = vand.u32 2147483647, %v7262_v10  ;;  %v4269_v34 = vld [vmem:[%s7921_s0 + $0x168] sm:$0xff]  ;;  %v2829_v10 = vsel %vm7311_vm10, %v7272_v17, %v2825_v27 }
 0x594   :  { %v2739_v21 = vpop.f32.mrf.mxu1  ;;  %v2752_v45 = vpop.f32.mrf.mxu2  ;;  %4614 = vtanh.f32 %v2771_v24  ;;  %v2833_v47 = vor.u32 1.1754944e-38, %v2832_v14  ;;  %v2772_v5 = vadd.f32 %v4269_v34, %v2712_v37  ;;  %v2791_v27 = vsel %vm7329_vm15, %v7278_v33, %v2787_v4 }
 0x595   :  { %v2774_v42 = vadd.f32 %v4271_v46, %v2764_v16  ;;  %v2801_v46 = vmul.f32 %v7287_v22, %v2800_v19  ;;  %vm2831_vm14 = vcmp.eq.f32.partialorder %v2830_v62, 8.507059e+37  ;;  %v2845_v45 = vand.u32 2147483647, %v7267_v3 }
 0x596   :  { %v2834_v17 = vsel %vm2831_vm14, %v2833_v47, %v2829_v10  ;;  %v2848_v62 = vor.u32 1.1754944e-38, %v2847_v8  ;;  %v2796_v34 = vsel %vm2793_vm2, %v2795_v53, %v2791_v27  ;;  %v2810_v47 = vor.u32 1.1754944e-38, %v2809_v2 }
 0x597   :  { %v4277_v40 = vmul.f32 -1.442695, %v2774_v42  ;;  %v2840_v42 = vadd.f32 %v7280_v7, %v2839_v44  ;;  %v2891_v37 = vmul.f32 %v2834_v17, %v7092_v25  ;;  %v2802_v44 = vadd.f32 %v7287_v22, %v2801_v46 }
 0x598   :  { %vm2846_vm5 = vcmp.eq.f32.partialorder %v2845_v45, 8.507059e+37 }
 0x599   :  { %v4613_v29 = vpop.eup %4612  ;;  %4616 = vpow2.f32 %v4277_v40  ;;  %v2844_v33 = vsel %vm7338_vm1, %v7280_v7, %v2840_v42  ;;  %v2807_v40 = vand.u32 2147483647, %v7270_v59 }
 0x59a   :  { %v2859_v24 = vadd.f32 1.0, %v4613_v29  ;;  %v2765_v16 = vpop.f32.mrf.mxu3  ;;  %v4615_v19 = vpop.eup %4614  ;;  %v2849_v4 = vsel %vm2846_vm5, %v2848_v62, %v2844_v33  ;;  %v2806_v29 = vsel %vm2805_vm6, %v7287_v22, %v2802_v44 }
 0x59b   :  { %v2893_v38 = vmul.f32 %v4615_v19, %v2796_v34  ;;  %vm2808_vm7 = vcmp.eq.f32.partialorder %v2807_v40, 8.507059e+37  ;;  %v2892_v46 = vmul.f32 %v2849_v4, %v7097_v11 }
 0x59c   :  { %4618 = vrcp.f32 %v2859_v24  ;;  %v2811_v42 = vsel %vm2808_vm7, %v2810_v47, %v2806_v29  ;;  %v2872_v8 = vand.u32 2147483648, %v2859_v24  ;;  %v2870_v17 = vand.u32 2147483647, %v2859_v24  ;;  %v8861_v47 = vld [vmem:[#allocation104_spill] sm:$0xff] }
 0x59d   :  { %4620 = vtanh.f32 %v2772_v5  ;;  %v7351_v10 = vadd.f32 %v2893_v38, %v2891_v37  ;;  %vm2866_vm9 = vweird.f32 %v2859_v24 }
 0x59e   :  { %v2873_v14 = vor.u32 1.1754944e-38, %v2872_v8  ;;  %vm2871_vm11 = vcmp.eq.f32.partialorder %v2870_v17, 8.507059e+37  ;;  %v8867_v8 = vld [vmem:[#allocation108_spill] sm:$0xff]  ;;  %v8869_v17 = vld [vmem:[#allocation105_spill] sm:$0xff] }
 0x59f   :  { %v4617_v3 = vpop.eup %4616 }
 0x5a0   :  { %v2860_v25 = vadd.f32 1.0, %v4617_v3 }
 0x5a2   :  { %v4619_v26 = vpop.eup %4618  ;;  %4622 = vrcp.f32 %v2860_v25  ;;  %v2887_v33 = vand.u32 2147483648, %v2860_v25  ;;  %v2885_v34 = vand.u32 2147483647, %v2860_v25  ;;  %vm2881_vm13 = vweird.f32 %v2860_v25 }
 0x5a3   :  { %v4621_v7 = vpop.eup %4620  ;;  %v2862_v5 = vmul.f32 %v4619_v26, %v2859_v24  ;;  %4624 = vtanh.f32 %v7351_v10  ;;  %vm2867_vm8 = vweird.f32 %v4619_v26 }
 0x5a4   :  { %v2894_v59 = vmul.f32 %v4621_v7, %v2811_v42  ;;  %vm2868_vm10 = vmor %vm2866_vm9, %vm2867_vm8  ;;  %v2888_v24 = vor.u32 1.1754944e-38, %v2887_v33  ;;  %vm2886_vm15 = vcmp.eq.f32.partialorder %v2885_v34, 8.507059e+37  ;;  %v8864_v42 = vld [vmem:[#allocation99_spill] sm:$0xff]  ;;  %v8878_v33 = vld [vmem:[#allocation118_spill] sm:$0xff] }
 0x5a5   :  { %v2863_v16 = vsub.f32 1.0, %v2862_v5  ;;  %v8862_v5 = vld [vmem:[#allocation95_spill] sm:$0xff]  ;;  %v8881_v34 = vld [vmem:[#allocation117_spill] sm:$0xff] }
 0x5a6   :  { %v7356_v45 = vadd.f32 %v2894_v59, %v2892_v46  ;;  %v8863_v46 = vld [vmem:[#allocation97_spill] sm:$0xff]  ;;  %v8866_v59 = vld [vmem:[#allocation106_spill] sm:$0xff] }
 0x5a7   :  { %v2864_v21 = vmul.f32 %v4619_v26, %v2863_v16  ;;  %v8865_v16 = vld [vmem:[#allocation101_spill] sm:$0xff] }
 0x5a8   :  { %v4623_v27 = vpop.eup %4622  ;;  %4626 = vtanh.f32 %v7356_v45 }
 0x5a9   :  { %v2865_v22 = vadd.f32 %v4619_v26, %v2864_v21  ;;  %v2877_v19 = vmul.f32 %v4623_v27, %v2860_v25  ;;  %v4625_v37 = vpop.eup %4624  ;;  %vm2882_vm12 = vweird.f32 %v4623_v27  ;;  %v8860_v25 = vld [vmem:[#allocation102_spill] sm:$0xff]  ;;  %v8868_v21 = vld [vmem:[#allocation103_spill] sm:$0xff] }
 0x5aa   :  { %vm2883_vm14 = vmor %vm2881_vm13, %vm2882_vm12 }
 0x5ab   :  { %v2869_v53 = vsel %vm2868_vm10, %v4619_v26, %v2865_v22  ;;  %v2878_v11 = vsub.f32 1.0, %v2877_v19  ;;  %v8871_v22 = vld [vmem:[#allocation112_spill] sm:$0xff]  ;;  %v8872_v19 = vld [vmem:[#allocation107_spill] sm:$0xff] }
 0x5ac   :  { %v2874_v44 = vsel %vm2871_vm11, %v2873_v14, %v2869_v53  ;;  %v8873_v14 = vld [vmem:[#allocation109_spill] sm:$0xff]  ;;  %v8874_v53 = vld [vmem:[#allocation114_spill] sm:$0xff] }
 0x5ad   :  { %v2899_v3 = vmul.f32 %v4625_v37, %v2874_v44  ;;  %v2879_v62 = vmul.f32 %v4623_v27, %v2878_v11  ;;  %v8875_v11 = vld [vmem:[#allocation116_spill] sm:$0xff]  ;;  %v8876_v37 = vld [vmem:[#allocation111_spill] sm:$0xff]  ;;  %v8877_v44 = vld [vmem:[#allocation113_spill] sm:$0xff] }
 0x5ae   :  { %v4627_v4 = vpop.eup %4626 }
 0x5af   :  { %v7359_v2 = vpack.c.bf16 %v2899_v3, %v2899_v3  ;;  %v2880_v38 = vadd.f32 %v4623_v27, %v2879_v62  ;;  %v8879_v3 = vld [vmem:[#allocation120_spill] sm:$0xff]  ;;  %v8880_v62 = vld [vmem:[#allocation115_spill] sm:$0xff] }
 0x5b1   :  { %v2884_v40 = vsel %vm2883_vm14, %v4623_v27, %v2880_v38  ;;  %2920 = vmatmul.bf16.vlgmr.msra.gmra.mxu0 %v7359_v2  ;;  %2946 = vmatmul.bf16.vlgmr.msra.gmra.mxu2 %v7359_v2  ;;  %v8870_v27 = vld [vmem:[#allocation110_spill] sm:$0xff] }
 0x5b2   :  { %v2889_v26 = vsel %vm2886_vm15, %v2888_v24, %v2884_v40  ;;  %3016 = vmatpush.bf16.msra.mxu0 %v8351_v15  ;;  %3042 = vmatpush.bf16.msra.mxu2 %v8352_v55  ;;  %v8882_v38 = vld [vmem:[#allocation122_spill] sm:$0xff]  ;;  %v8883_v24 = vld [vmem:[#allocation124_spill] sm:$0xff]  ;;  %v8884_v40 = vld [vmem:[#allocation119_spill] sm:$0xff] }
 0x5b3   :  { %v2900_v29 = vmul.f32 %v4627_v4, %v2889_v26  ;;  %v8885_v4 = vld [vmem:[#allocation121_spill] sm:$0xff]  ;;  %v8886_v26 = vld [vmem:[#allocation126_spill] sm:$0xff] }
 0x5b5   :  { %v7365_v7 = vpack.c.bf16 %v2900_v29, %v2900_v29  ;;  %v8887_v29 = vld [vmem:[#allocation128_spill] sm:$0xff] }
 0x5b6   :  { %3017 = vmatpush.bf16.msra.mxu0 %v8353_v63  ;;  %3043 = vmatpush.bf16.msra.mxu2 %v8354_v6 }
 0x5b7   :  { %2933 = vmatmul.bf16.vlgmr.msra.gmra.mxu1 %v7365_v7  ;;  %2959 = vmatmul.bf16.vlgmr.msra.gmra.mxu3 %v7365_v7 }
 0x5b8   :  { %3029 = vmatpush.bf16.msra.mxu1 %v8355_v60  ;;  %3055 = vmatpush.bf16.msra.mxu3 %v8356_v23 }
 0x5ba   :  { %3018 = vmatpush.bf16.msra.mxu0 %v8357_v54  ;;  %3044 = vmatpush.bf16.msra.mxu2 %v8358_v61 }
 0x5bc   :  { %3030 = vmatpush.bf16.msra.mxu1 %v8359_v51  ;;  %3056 = vmatpush.bf16.msra.mxu3 %v8360_v49 }
 0x5be   :  { %3019 = vmatpush.bf16.msra.mxu0 %v8361_v1  ;;  %3045 = vmatpush.bf16.msra.mxu2 %v8362_v52 }
 0x5c0   :  { %3031 = vmatpush.bf16.msra.mxu1 %v8363_v39  ;;  %3057 = vmatpush.bf16.msra.mxu3 %v8364_v43 }
 0x5c1   :  { %2972 = vmatmul.bf16.vlgmr.msrb.gmra.mxu0 %v7359_v2  ;;  %2998 = vmatmul.bf16.vlgmr.msrb.gmra.mxu2 %v7359_v2 }
 0x5c2   :  { %3020 = vmatpush.bf16.msra.mxu0 %v8365_v31  ;;  %3046 = vmatpush.bf16.msra.mxu2 %v8366_v35 }
 0x5c4   :  { %3032 = vmatpush.bf16.msra.mxu1 %v8367_v57  ;;  %3058 = vmatpush.bf16.msra.mxu3 %v8368_v9 }
 0x5c6   :  { %3021 = vmatpush.bf16.msra.mxu0 %v8369_v41  ;;  %3047 = vmatpush.bf16.msra.mxu2 %v8370_v20 }
 0x5c7   :  { %2985 = vmatmul.bf16.vlgmr.msrb.gmra.mxu1 %v7365_v7  ;;  %3011 = vmatmul.bf16.vlgmr.msrb.gmra.mxu3 %v7365_v7 }
 0x5c8   :  { %3033 = vmatpush.bf16.msra.mxu1 %v8371_v30  ;;  %3059 = vmatpush.bf16.msra.mxu3 %v8372_v48 }
 0x5ca   :  { %3022 = vmatpush.bf16.msra.mxu0 %v8452_v28  ;;  %3048 = vmatpush.bf16.msra.mxu2 %v8453_v0 }
 0x5cc   :  { %3034 = vmatpush.bf16.msra.mxu1 %v8454_v13  ;;  %3060 = vmatpush.bf16.msra.mxu3 %v8455_v12 }
 0x5ce   :  { %3023 = vmatpush.bf16.msra.mxu0 %v8456_v32  ;;  %3049 = vmatpush.bf16.msra.mxu2 %v8457_v36 }
 0x5d0   :  { %3035 = vmatpush.bf16.msra.mxu1 %v8460_v18  ;;  %3061 = vmatpush.bf16.msra.mxu3 %v8461_v58 }
 0x5d1   :  { %3024 = vmatmul.bf16.vlgmr.msra.gmra.mxu0 %v7359_v2  ;;  %3050 = vmatmul.bf16.vlgmr.msra.gmra.mxu2 %v7359_v2 }
 0x5d2   :  { %3068 = vmatpush.bf16.msrb.mxu0 %v8458_v56  ;;  %3094 = vmatpush.bf16.msrb.mxu2 %v8459_v50 }
 0x5d4   :  { %3036 = vmatpush.bf16.msra.mxu1 %v8862_v5  ;;  %3062 = vmatpush.bf16.msra.mxu3 %v8863_v46 }
 0x5d6   :  { %3069 = vmatpush.bf16.msrb.mxu0 %v8860_v25  ;;  %3095 = vmatpush.bf16.msrb.mxu2 %v8861_v47 }
 0x5d7   :  { %3037 = vmatmul.bf16.vlgmr.msra.gmra.mxu1 %v7365_v7  ;;  %3063 = vmatmul.bf16.vlgmr.msra.gmra.mxu3 %v7365_v7 }
 0x5d8   :  { %3081 = vmatpush.bf16.msrb.mxu1 %v8864_v42  ;;  %3107 = vmatpush.bf16.msrb.mxu3 %v8865_v16 }
 0x5da   :  { %3070 = vmatpush.bf16.msrb.mxu0 %v8866_v59  ;;  %3096 = vmatpush.bf16.msrb.mxu2 %v8867_v8 }
 0x5dc   :  { %3082 = vmatpush.bf16.msrb.mxu1 %v8868_v21  ;;  %3108 = vmatpush.bf16.msrb.mxu3 %v8869_v17 }
 0x5de   :  { %3071 = vmatpush.bf16.msrb.mxu0 %v8870_v27  ;;  %3097 = vmatpush.bf16.msrb.mxu2 %v8871_v22 }
 0x5e0   :  { %3083 = vmatpush.bf16.msrb.mxu1 %v8872_v19  ;;  %3109 = vmatpush.bf16.msrb.mxu3 %v8873_v14 }
 0x5e2   :  { %3072 = vmatpush.bf16.msrb.mxu0 %v8874_v53  ;;  %3098 = vmatpush.bf16.msrb.mxu2 %v8875_v11 }
 0x5e4   :  { %3084 = vmatpush.bf16.msrb.mxu1 %v8876_v37  ;;  %3110 = vmatpush.bf16.msrb.mxu3 %v8877_v44  ;;  %v8888_v44 = vld [vmem:[#allocation2_spill] sm:$0xff] }
 0x5e6   :  { %3073 = vmatpush.bf16.msrb.mxu0 %v8878_v33  ;;  %3099 = vmatpush.bf16.msrb.mxu2 %v8879_v3  ;;  %v8889_v33 = vld [vmem:[#allocation4_spill] sm:$0xff]  ;;  %v8890_v3 = vld [vmem:[#allocation123_spill] sm:$0xff] }
 0x5e8   :  { %3085 = vmatpush.bf16.msrb.mxu1 %v8880_v62  ;;  %3111 = vmatpush.bf16.msrb.mxu3 %v8881_v34  ;;  %v8891_v62 = vld [vmem:[#allocation125_spill] sm:$0xff] }
 0x5ea   :  { %3074 = vmatpush.bf16.msrb.mxu0 %v8882_v38  ;;  %3100 = vmatpush.bf16.msrb.mxu2 %v8883_v24  ;;  %v8892_v24 = vld [vmem:[#allocation6_spill] sm:$0xff] }
 0x5ec   :  { %3086 = vmatpush.bf16.msrb.mxu1 %v8884_v40  ;;  %3112 = vmatpush.bf16.msrb.mxu3 %v8885_v4  ;;  %v8893_v40 = vld [vmem:[#allocation8_spill] sm:$0xff]  ;;  %v8894_v4 = vld [vmem:[#allocation127_spill] sm:$0xff] }
 0x5ee   :  { %3075 = vmatpush.bf16.msrb.mxu0 %v8886_v26  ;;  %3101 = vmatpush.bf16.msrb.mxu2 %v8887_v29  ;;  %v8895_v26 = vld [vmem:[#allocation129_spill] sm:$0xff]  ;;  %v8896_v29 = vld [vmem:[#allocation3_spill] sm:$0xff] }
 0x5f0   :  { %3087 = vmatpush.bf16.msrb.mxu1 %v8890_v3  ;;  %3113 = vmatpush.bf16.msrb.mxu3 %v8891_v62  ;;  %v8899_v62 = vld [vmem:[#allocation12_spill] sm:$0xff] }
 0x5f1   :  { %3076 = vmatmul.bf16.vlgmr.msrb.gmra.mxu0 %v7359_v2  ;;  %3102 = vmatmul.bf16.vlgmr.msrb.gmra.mxu2 %v7359_v2  ;;  %v8900_v2 = vld [vmem:[#allocation7_spill] sm:$0xff]  ;;  %v8907_v3 = vld [vmem:[#allocation20_spill] sm:$0xff] }
 0x5f2   :  { %3265 = vmatpush.bf16.msra.mxu0 %v8888_v44  ;;  %3291 = vmatpush.bf16.msra.mxu2 %v8889_v33  ;;  %v8897_v44 = vld [vmem:[#allocation5_spill] sm:$0xff]  ;;  %v8898_v33 = vld [vmem:[#allocation10_spill] sm:$0xff] }
 0x5f4   :  { %3088 = vmatpush.bf16.msrb.mxu1 %v8894_v4  ;;  %3114 = vmatpush.bf16.msrb.mxu3 %v8895_v26  ;;  %v8903_v4 = vld [vmem:[#allocation16_spill] sm:$0xff]  ;;  %v8904_v26 = vld [vmem:[#allocation11_spill] sm:$0xff] }
 0x5f6   :  { %3266 = vmatpush.bf16.msra.mxu0 %v8892_v24  ;;  %3292 = vmatpush.bf16.msra.mxu2 %v8893_v40  ;;  %v8901_v24 = vld [vmem:[#allocation9_spill] sm:$0xff]  ;;  %v8902_v40 = vld [vmem:[#allocation14_spill] sm:$0xff] }
 0x5f7   :  { %3089 = vmatmul.bf16.vlgmr.msrb.gmra.mxu1 %v7365_v7  ;;  %3115 = vmatmul.bf16.vlgmr.msrb.gmra.mxu3 %v7365_v7  ;;  %v8908_v7 = vld [vmem:[#allocation15_spill] sm:$0xff] }
 0x5f8   :  { %3278 = vmatpush.bf16.msra.mxu1 %v8896_v29  ;;  %3304 = vmatpush.bf16.msra.mxu3 %v8897_v44  ;;  %v8905_v29 = vld [vmem:[#allocation13_spill] sm:$0xff]  ;;  %v8906_v44 = vld [vmem:[#allocation18_spill] sm:$0xff] }
 0x5fa   :  { %3267 = vmatpush.bf16.msra.mxu0 %v8898_v33  ;;  %3293 = vmatpush.bf16.msra.mxu2 %v8899_v62  ;;  %v8909_v33 = vld [vmem:[#allocation17_spill] sm:$0xff]  ;;  %v8910_v62 = vld [vmem:[#allocation22_spill] sm:$0xff] }
 0x5fc   :  { %3279 = vmatpush.bf16.msra.mxu1 %v8900_v2  ;;  %3305 = vmatpush.bf16.msra.mxu3 %v8901_v24  ;;  %v8911_v2 = vld [vmem:[#allocation24_spill] sm:$0xff]  ;;  %v8912_v24 = vld [vmem:[#allocation19_spill] sm:$0xff] }
 0x5fe   :  { %3268 = vmatpush.bf16.msra.mxu0 %v8902_v40  ;;  %3294 = vmatpush.bf16.msra.mxu2 %v8903_v4  ;;  %v8913_v40 = vld [vmem:[#allocation21_spill] sm:$0xff]  ;;  %v8914_v4 = vld [vmem:[#allocation26_spill] sm:$0xff] }
 0x600   :  { %3280 = vmatpush.bf16.msra.mxu1 %v8904_v26  ;;  %3306 = vmatpush.bf16.msra.mxu3 %v8905_v29  ;;  %v8915_v26 = vld [vmem:[#allocation28_spill] sm:$0xff]  ;;  %v8916_v29 = vld [vmem:[#allocation23_spill] sm:$0xff] }
 0x602   :  { %3269 = vmatpush.bf16.msra.mxu0 %v8906_v44  ;;  %3295 = vmatpush.bf16.msra.mxu2 %v8907_v3  ;;  %v8917_v44 = vld [vmem:[#allocation25_spill] sm:$0xff]  ;;  %v8918_v3 = vld [vmem:[#allocation30_spill] sm:$0xff] }
 0x604   :  { %3281 = vmatpush.bf16.msra.mxu1 %v8908_v7  ;;  %3307 = vmatpush.bf16.msra.mxu3 %v8909_v33  ;;  %v8919_v7 = vld [vmem:[#allocation32_spill] sm:$0xff]  ;;  %v8920_v33 = vld [vmem:[#allocation34_spill] sm:$0xff] }
 0x606   :  { %3270 = vmatpush.bf16.msra.mxu0 %v8910_v62  ;;  %3296 = vmatpush.bf16.msra.mxu2 %v8911_v2  ;;  %v8921_v62 = vld [vmem:[#allocation36_spill] sm:$0xff]  ;;  %v8922_v2 = vld [vmem:[#allocation27_spill] sm:$0xff] }
 0x608   :  { %3282 = vmatpush.bf16.msra.mxu1 %v8912_v24  ;;  %3308 = vmatpush.bf16.msra.mxu3 %v8913_v40  ;;  %v8923_v24 = vld [vmem:[#allocation29_spill] sm:$0xff]  ;;  %v8924_v40 = vld [vmem:[#allocation38_spill] sm:$0xff] }
 0x60a   :  { %3271 = vmatpush.bf16.msra.mxu0 %v8914_v4  ;;  %3297 = vmatpush.bf16.msra.mxu2 %v8915_v26  ;;  %v8925_v4 = vld [vmem:[#allocation40_spill] sm:$0xff]  ;;  %v8926_v26 = vld [vmem:[#allocation31_spill] sm:$0xff] }
 0x60c   :  { %3283 = vmatpush.bf16.msra.mxu1 %v8916_v29  ;;  %3309 = vmatpush.bf16.msra.mxu3 %v8917_v44  ;;  %v8927_v29 = vld [vmem:[#allocation33_spill] sm:$0xff]  ;;  %v8928_v44 = vld [vmem:[#allocation35_spill] sm:$0xff] }
 0x60e   :  { %3272 = vmatpush.bf16.msra.mxu0 %v8918_v3  ;;  %3298 = vmatpush.bf16.msra.mxu2 %v8919_v7  ;;  %v8929_v3 = vld [vmem:[#allocation37_spill] sm:$0xff]  ;;  %v8930_v7 = vld [vmem:[#allocation42_spill] sm:$0xff] }
 0x610   :  { %3284 = vmatpush.bf16.msra.mxu1 %v8922_v2  ;;  %3310 = vmatpush.bf16.msra.mxu3 %v8923_v24  ;;  %v8933_v2 = vld [vmem:[#allocation41_spill] sm:$0xff]  ;;  %v8934_v24 = vld [vmem:[#allocation46_spill] sm:$0xff] }
 0x612   :  { %3317 = vmatpush.bf16.msrb.mxu0 %v8920_v33  ;;  %3343 = vmatpush.bf16.msrb.mxu2 %v8921_v62  ;;  %v8931_v33 = vld [vmem:[#allocation44_spill] sm:$0xff]  ;;  %v8932_v62 = vld [vmem:[#allocation39_spill] sm:$0xff] }
 0x614   :  { %3285 = vmatpush.bf16.msra.mxu1 %v8926_v26  ;;  %3311 = vmatpush.bf16.msra.mxu3 %v8927_v29  ;;  %v8937_v26 = vld [vmem:[#allocation45_spill] sm:$0xff]  ;;  %v8938_v29 = vld [vmem:[#allocation50_spill] sm:$0xff] }
 0x616   :  { %3318 = vmatpush.bf16.msrb.mxu0 %v8924_v40  ;;  %3344 = vmatpush.bf16.msrb.mxu2 %v8925_v4  ;;  %v8935_v40 = vld [vmem:[#allocation48_spill] sm:$0xff]  ;;  %v8936_v4 = vld [vmem:[#allocation43_spill] sm:$0xff] }
 0x618   :  { %3330 = vmatpush.bf16.msrb.mxu1 %v8928_v44  ;;  %3356 = vmatpush.bf16.msrb.mxu3 %v8929_v3  ;;  %v8939_v44 = vld [vmem:[#allocation52_spill] sm:$0xff]  ;;  %v8940_v3 = vld [vmem:[#allocation47_spill] sm:$0xff] }
 0x61a   :  { %3319 = vmatpush.bf16.msrb.mxu0 %v8930_v7  ;;  %3345 = vmatpush.bf16.msrb.mxu2 %v8931_v33  ;;  %v8941_v7 = vld [vmem:[#allocation49_spill] sm:$0xff]  ;;  %v8942_v33 = vld [vmem:[#allocation54_spill] sm:$0xff] }
 0x61c   :  { %3331 = vmatpush.bf16.msrb.mxu1 %v8932_v62  ;;  %3357 = vmatpush.bf16.msrb.mxu3 %v8933_v2  ;;  %v8943_v62 = vld [vmem:[#allocation56_spill] sm:$0xff]  ;;  %v8944_v2 = vld [vmem:[#allocation51_spill] sm:$0xff] }
 0x61e   :  { %3320 = vmatpush.bf16.msrb.mxu0 %v8934_v24  ;;  %3346 = vmatpush.bf16.msrb.mxu2 %v8935_v40  ;;  %v8945_v24 = vld [vmem:[#allocation53_spill] sm:$0xff]  ;;  %v8946_v40 = vld [vmem:[#allocation58_spill] sm:$0xff] }
 0x620   :  { %3332 = vmatpush.bf16.msrb.mxu1 %v8936_v4  ;;  %3358 = vmatpush.bf16.msrb.mxu3 %v8937_v26  ;;  %v8947_v4 = vld [vmem:[#allocation60_spill] sm:$0xff]  ;;  %v8948_v26 = vld [vmem:[#allocation55_spill] sm:$0xff] }
 0x622   :  { %3321 = vmatpush.bf16.msrb.mxu0 %v8938_v29  ;;  %3347 = vmatpush.bf16.msrb.mxu2 %v8939_v44  ;;  %v8949_v29 = vld [vmem:[#allocation57_spill] sm:$0xff]  ;;  %v8950_v44 = vld [vmem:[#allocation62_spill] sm:$0xff] }
 0x624   :  { %3333 = vmatpush.bf16.msrb.mxu1 %v8940_v3  ;;  %3359 = vmatpush.bf16.msrb.mxu3 %v8941_v7  ;;  %v8951_v3 = vld [vmem:[#allocation64_spill] sm:$0xff]  ;;  %v8952_v7 = vld [vmem:[#allocation59_spill] sm:$0xff] }
 0x626   :  { %3322 = vmatpush.bf16.msrb.mxu0 %v8942_v33  ;;  %3348 = vmatpush.bf16.msrb.mxu2 %v8943_v62  ;;  %v8953_v33 = vld [vmem:[#allocation61_spill] sm:$0xff]  ;;  %v8954_v62 = vld [vmem:[#allocation63_spill] sm:$0xff] }
 0x628   :  { %3334 = vmatpush.bf16.msrb.mxu1 %v8944_v2  ;;  %3360 = vmatpush.bf16.msrb.mxu3 %v8945_v24  ;;  %v8955_v2 = vld [vmem:[#allocation65_spill] sm:$0xff] }
 0x62a   :  { %3323 = vmatpush.bf16.msrb.mxu0 %v8946_v40  ;;  %3349 = vmatpush.bf16.msrb.mxu2 %v8947_v4 }
 0x62c   :  { %3335 = vmatpush.bf16.msrb.mxu1 %v8948_v26  ;;  %3361 = vmatpush.bf16.msrb.mxu3 %v8949_v29 }
 0x62e   :  { %3324 = vmatpush.bf16.msrb.mxu0 %v8950_v44  ;;  %3350 = vmatpush.bf16.msrb.mxu2 %v8951_v3  ;;  %v2921_v24 = vpop.f32.mrf.mxu0 }
 0x630   :  { %3336 = vmatpush.bf16.msrb.mxu1 %v8952_v7  ;;  %3362 = vmatpush.bf16.msrb.mxu3 %v8953_v33  ;;  %v4280_v33 = vld [vmem:[%s7921_s0 + $0x190] sm:$0xff] }
 0x634   :  { %3337 = vmatpush.bf16.msrb.mxu1 %v8954_v62  ;;  %3363 = vmatpush.bf16.msrb.mxu3 %v8955_v2  ;;  %v2934_v40 = vpop.f32.mrf.mxu1  ;;  %v2947_v38 = vpop.f32.mrf.mxu2 }
 0x635   :  { %v2935_v22 = vadd.f32 %v2934_v40, %v2921_v24  ;;  %v4279_v24 = vld [vmem:[%s7921_s0 + $0x188] sm:$0xff] }
 0x636   :  { %v2923_v4 = vpop.f32.mrf.mxu0 }
 0x63a   :  { %v2960_v34 = vpop.f32.mrf.mxu3 }
 0x63c   :  { %v2936_v26 = vpop.f32.mrf.mxu1  ;;  %v2949_v37 = vpop.f32.mrf.mxu2 }
 0x63d   :  { %v4278_v37 = vld [vmem:[%s7921_s0 + $0x180] sm:$0xff] }
 0x63e   :  { %v2973_v29 = vpop.f32.mrf.mxu0 }
 0x642   :  { %v2962_v11 = vpop.f32.mrf.mxu3 }
 0x643   :  { %v4281_v11 = vld [vmem:[%s7921_s0 + $0x198] sm:$0xff] }
 0x644   :  { %v2986_v44 = vpop.f32.mrf.mxu1  ;;  %v2999_v53 = vpop.f32.mrf.mxu2 }
 0x645   :  { %v2987_v7 = vadd.f32 %v2986_v44, %v2973_v29  ;;  %v3120_v29 = vadd.f32 %v4278_v37, %v2935_v22 }
 0x646   :  { %v2975_v3 = vpop.f32.mrf.mxu0 }
 0x647   :  { %v3122_v27 = vadd.f32 %v4280_v33, %v2987_v7  ;;  %v2961_v3 = vadd.f32 %v2960_v34, %v2947_v38 }
 0x649   :  { %v4288_v44 = vmul.f32 -1.442695, %v3122_v27 }
 0x64a   :  { %v3012_v14 = vpop.f32.mrf.mxu3 }
 0x64b   :  { %v3013_v4 = vadd.f32 %v3012_v14, %v2999_v53  ;;  %4628 = vpow2.f32 %v4288_v44  ;;  %v3121_v14 = vadd.f32 %v4279_v24, %v2961_v3 }
 0x64c   :  { %v2988_v62 = vpop.f32.mrf.mxu1  ;;  %v3001_v2 = vpop.f32.mrf.mxu2 }
 0x64d   :  { %v3123_v40 = vadd.f32 %v4281_v11, %v3013_v4  ;;  %v4286_v62 = vmul.f32 -1.442695, %v3120_v29  ;;  %v4287_v21 = vmul.f32 -1.442695, %v3121_v14  ;;  %v4284_v14 = vld [vmem:[%s7921_s0 + $0x1b0] sm:$0xff] }
 0x64e   :  { %v3025_v19 = vpop.f32.mrf.mxu0 }
 0x64f   :  { %v4289_v53 = vmul.f32 -1.442695, %v3123_v40  ;;  %4630 = vpow2.f32 %v4286_v62 }
 0x651   :  { %v4629_v22 = vpop.eup %4628  ;;  %4632 = vpow2.f32 %v4289_v53 }
 0x652   :  { %v3014_v26 = vpop.f32.mrf.mxu3  ;;  %4634 = vpow2.f32 %v4287_v21  ;;  %v7521_v34 = vadd.f32 1.0, %v4629_v22 }
 0x654   :  { %v7516_v17 = vpop.f32.mrf.mxu2  ;;  %v3038_v7 = vpop.f32.mrf.mxu1  ;;  %4636 = vrcp.f32 %v7521_v34  ;;  %vm3179_vm1 = vweird.f32 %v7521_v34 }
 0x655   :  { %v4631_v38 = vpop.eup %4630 }
 0x656   :  { %v3027_v33 = vpop.f32.mrf.mxu0  ;;  %v7523_v4 = vadd.f32 1.0, %v4631_v38 }
 0x657   :  { %v4633_v37 = vpop.eup %4632 }
 0x658   :  { %v4635_v11 = vpop.eup %4634  ;;  %v7526_v29 = vadd.f32 1.0, %v4633_v37  ;;  %4638 = vrcp.f32 %v7523_v4  ;;  %vm3141_vm3 = vweird.f32 %v7523_v4 }
 0x659   :  { %v7529_v44 = vadd.f32 1.0, %v4635_v11  ;;  %v3039_v11 = vadd.f32 %v3038_v7, %v3025_v19 }
 0x65a   :  { %v3064_v2 = vpop.f32.mrf.mxu3  ;;  %v7531_v3 = vpop.eup %4636  ;;  %4640 = vrcp.f32 %v7526_v29  ;;  %vm3194_vm8 = vweird.f32 %v7526_v29 }
 0x65b   :  { %4642 = vrcp.f32 %v7529_v44  ;;  %vm3180_vm0 = vweird.f32 %v7531_v3  ;;  %vm3156_vm12 = vweird.f32 %v7529_v44 }
 0x65c   :  { %v3053_v26 = vpop.f32.mrf.mxu2  ;;  %v3040_v27 = vpop.f32.mrf.mxu1  ;;  %vm7570_vm2 = vmor %vm3179_vm1, %vm3180_vm0 }
 0x65e   :  { %v7537_v24 = vpop.eup %4638 }
 0x65f   :  { %v3137_v33 = vmul.f32 %v7537_v24, %v7523_v4  ;;  %vm3142_vm4 = vweird.f32 %v7537_v24 }
 0x660   :  { %v7539_v40 = vpop.eup %4640  ;;  %vm7588_vm7 = vmor %vm3141_vm3, %vm3142_vm4 }
 0x661   :  { %v7546_v27 = vpop.eup %4642  ;;  %v3190_v38 = vmul.f32 %v7539_v40, %v7526_v29  ;;  %v3138_v16 = vsub.f32 1.0, %v3137_v33  ;;  %vm3195_vm5 = vweird.f32 %v7539_v40 }
 0x662   :  { %v3066_v8 = vpop.f32.mrf.mxu3  ;;  %v3152_v46 = vmul.f32 %v7546_v27, %v7529_v44  ;;  %vm7597_vm9 = vmor %vm3194_vm8, %vm3195_vm5  ;;  %vm3157_vm11 = vweird.f32 %v7546_v27 }
 0x663   :  { %v3175_v8 = vmul.f32 %v7531_v3, %v7521_v34  ;;  %v3139_v7 = vmul.f32 %v7537_v24, %v3138_v16  ;;  %vm3158_vm14 = vmor %vm3156_vm12, %vm3157_vm11 }
 0x665   :  { %v3176_v62 = vsub.f32 1.0, %v3175_v8  ;;  %v4282_v8 = vld [vmem:[%s7921_s0 + $0x1a0] sm:$0xff] }
 0x667   :  { %v3177_v42 = vmul.f32 %v7531_v3, %v3176_v62 }
 0x669   :  { %v3178_v33 = vadd.f32 %v7531_v3, %v3177_v42  ;;  %v3162_v42 = vand.u32 2147483648, %v7529_v44 }
 0x66e   :  { %v3077_v21 = vpop.f32.mrf.mxu0 }
 0x674   :  { %v3090_v53 = vpop.f32.mrf.mxu1  ;;  %v3103_v26 = vpop.f32.mrf.mxu2 }
 0x675   :  { %v3091_v22 = vadd.f32 %v3090_v53, %v3077_v21  ;;  %v3191_v21 = vsub.f32 1.0, %v3190_v38  ;;  %v4285_v53 = vld [vmem:[%s7921_s0 + $0x1b8] sm:$0xff]  ;;  %v3065_v38 = vadd.f32 %v3064_v2, %v7516_v17  ;;  %v3140_v17 = vadd.f32 %v7537_v24, %v3139_v7 }
 0x676   :  { %v3079_v37 = vpop.f32.mrf.mxu0  ;;  %v3147_v2 = vand.u32 2147483648, %v7523_v4  ;;  %v3200_v7 = vand.u32 2147483648, %v7526_v29 }
 0x677   :  { %v3126_v59 = vadd.f32 %v4284_v14, %v3091_v22  ;;  %v3124_v37 = vadd.f32 %v4282_v8, %v3039_v11  ;;  %v3153_v22 = vsub.f32 1.0, %v3152_v46  ;;  %v3192_v11 = vmul.f32 %v7539_v40, %v3191_v21 }
 0x678   :  { %v3145_v46 = vand.u32 2147483647, %v7523_v4  ;;  %v3148_v4 = vor.u32 1.1754944e-38, %v3147_v2 }
 0x679   :  { %v4290_v5 = vmul.f32 -1.442695, %v3126_v59  ;;  %v3185_v59 = vand.u32 2147483648, %v7521_v34 }
 0x67a   :  { %v3116_v47 = vpop.f32.mrf.mxu3  ;;  %vm3146_vm10 = vcmp.eq.f32.partialorder %v3145_v46, 8.507059e+37 }
 0x67b   :  { %4644 = vpow2.f32 %v4290_v5  ;;  %v3117_v19 = vadd.f32 %v3116_v47, %v3103_v26  ;;  %v3183_v47 = vand.u32 2147483647, %v7521_v34  ;;  %v4283_v5 = vld [vmem:[%s7921_s0 + $0x1a8] sm:$0xff]  ;;  %v3182_v34 = vsel %vm7570_vm2, %v7531_v3, %v3178_v33 }
 0x67c   :  { %v3092_v62 = vpop.f32.mrf.mxu1  ;;  %v3105_v14 = vpop.f32.mrf.mxu2  ;;  %4646 = vtanh.f32 %v3124_v37  ;;  %v3186_v8 = vor.u32 1.1754944e-38, %v3185_v59  ;;  %v3125_v21 = vadd.f32 %v4283_v5, %v3065_v38  ;;  %v3144_v33 = vsel %vm7588_vm7, %v7537_v24, %v3140_v17 }
 0x67d   :  { %v3127_v25 = vadd.f32 %v4285_v53, %v3117_v19  ;;  %v3154_v53 = vmul.f32 %v7546_v27, %v3153_v22  ;;  %vm3184_vm6 = vcmp.eq.f32.partialorder %v3183_v47, 8.507059e+37  ;;  %v3198_v14 = vand.u32 2147483647, %v7526_v29 }
 0x67e   :  { %v3187_v3 = vsel %vm3184_vm6, %v3186_v8, %v3182_v34  ;;  %v3201_v47 = vor.u32 1.1754944e-38, %v3200_v7  ;;  %v3149_v5 = vsel %vm3146_vm10, %v3148_v4, %v3144_v33  ;;  %v3163_v8 = vor.u32 1.1754944e-38, %v3162_v42 }
 0x67f   :  { %v4291_v16 = vmul.f32 -1.442695, %v3127_v25  ;;  %v3193_v25 = vadd.f32 %v7539_v40, %v3192_v11  ;;  %v3244_v38 = vmul.f32 %v3187_v3, %v7351_v10  ;;  %v3155_v11 = vadd.f32 %v7546_v27, %v3154_v53 }
 0x680   :  { %vm3199_vm13 = vcmp.eq.f32.partialorder %v3198_v14, 8.507059e+37 }
 0x681   :  { %v4645_v26 = vpop.eup %4644  ;;  %4648 = vpow2.f32 %v4291_v16  ;;  %v3197_v24 = vsel %vm7597_vm9, %v7539_v40, %v3193_v25  ;;  %v3160_v16 = vand.u32 2147483647, %v7529_v44 }
 0x682   :  { %v3212_v37 = vadd.f32 1.0, %v4645_v26  ;;  %v3118_v19 = vpop.f32.mrf.mxu3  ;;  %v4647_v22 = vpop.eup %4646  ;;  %v3202_v17 = vsel %vm3199_vm13, %v3201_v47, %v3197_v24  ;;  %v3159_v26 = vsel %vm3158_vm14, %v7546_v27, %v3155_v11 }
 0x683   :  { %v3246_v46 = vmul.f32 %v4647_v22, %v3149_v5  ;;  %vm3161_vm15 = vcmp.eq.f32.partialorder %v3160_v16, 8.507059e+37  ;;  %v3245_v53 = vmul.f32 %v3202_v17, %v7356_v45 }
 0x684   :  { %4650 = vrcp.f32 %v3212_v37  ;;  %v3164_v25 = vsel %vm3161_vm15, %v3163_v8, %v3159_v26  ;;  %v3225_v7 = vand.u32 2147483648, %v3212_v37  ;;  %v3223_v3 = vand.u32 2147483647, %v3212_v37 }
 0x685   :  { %4652 = vtanh.f32 %v3125_v21  ;;  %v7610_v34 = vadd.f32 %v3246_v46, %v3244_v38  ;;  %vm3219_vm1 = vweird.f32 %v3212_v37 }
 0x686   :  { %v3226_v59 = vor.u32 1.1754944e-38, %v3225_v7  ;;  %vm3224_vm3 = vcmp.eq.f32.partialorder %v3223_v3, 8.507059e+37 }
 0x687   :  { %v4649_v29 = vpop.eup %4648 }
 0x688   :  { %v3213_v10 = vadd.f32 1.0, %v4649_v29 }
 0x68a   :  { %v4651_v2 = vpop.eup %4650  ;;  %4654 = vrcp.f32 %v3213_v10  ;;  %v3240_v24 = vand.u32 2147483648, %v3213_v10  ;;  %v3238_v5 = vand.u32 2147483647, %v3213_v10  ;;  %vm3234_vm5 = vweird.f32 %v3213_v10 }
 0x68b   :  { %v4653_v40 = vpop.eup %4652  ;;  %v3215_v21 = vmul.f32 %v4651_v2, %v3212_v37  ;;  %4656 = vtanh.f32 %v7610_v34  ;;  %vm3220_vm0 = vweird.f32 %v4651_v2 }
 0x68c   :  { %v3247_v44 = vmul.f32 %v4653_v40, %v3164_v25  ;;  %vm3221_vm2 = vmor %vm3219_vm1, %vm3220_vm0  ;;  %v3241_v37 = vor.u32 1.1754944e-38, %v3240_v24  ;;  %vm3239_vm7 = vcmp.eq.f32.partialorder %v3238_v5, 8.507059e+37 }
 0x68d   :  { %v3216_v19 = vsub.f32 1.0, %v3215_v21 }
 0x68e   :  { %v7615_v14 = vadd.f32 %v3247_v44, %v3245_v53 }
 0x68f   :  { %v3217_v62 = vmul.f32 %v4651_v2, %v3216_v19 }
 0x690   :  { %v4655_v33 = vpop.eup %4654  ;;  %4658 = vtanh.f32 %v7615_v14 }
 0x691   :  { %v3218_v27 = vadd.f32 %v4651_v2, %v3217_v62  ;;  %v3230_v22 = vmul.f32 %v4655_v33, %v3213_v10  ;;  %v4657_v38 = vpop.eup %4656  ;;  %vm3235_vm4 = vweird.f32 %v4655_v33 }
 0x692   :  { %vm3236_vm6 = vmor %vm3234_vm5, %vm3235_vm4 }
 0x693   :  { %v3222_v4 = vsel %vm3221_vm2, %v4651_v2, %v3218_v27  ;;  %v3231_v45 = vsub.f32 1.0, %v3230_v22 }
 0x694   :  { %v3227_v11 = vsel %vm3224_vm3, %v3226_v59, %v3222_v4  ;;  %v4294_v4 = vld [vmem:[%s7921_s0 + $0x1d0] sm:$0xff] }
 0x695   :  { %v3252_v29 = vmul.f32 %v4657_v38, %v3227_v11  ;;  %v3232_v47 = vmul.f32 %v4655_v33, %v3231_v45 }
 0x696   :  { %v4659_v17 = vpop.eup %4658 }
 0x697   :  { %v7618_v42 = vpack.c.bf16 %v3252_v29, %v3252_v29  ;;  %v3233_v46 = vadd.f32 %v4655_v33, %v3232_v47  ;;  %v4292_v47 = vld [vmem:[%s7921_s0 + $0x1c0] sm:$0xff] }
 0x699   :  { %v3237_v16 = vsel %vm3236_vm6, %v4655_v33, %v3233_v46  ;;  %3273 = vmatmul.bf16.vlgmr.msra.gmra.mxu0 %v7618_v42  ;;  %3299 = vmatmul.bf16.vlgmr.msra.gmra.mxu2 %v7618_v42 }
 0x69a   :  { %v3242_v2 = vsel %vm3239_vm7, %v3241_v37, %v3237_v16  ;;  %3369 = vmatpush.bf16.msra.mxu0 %v8351_v15  ;;  %3395 = vmatpush.bf16.msra.mxu2 %v8352_v55  ;;  %v8962_v15 = vld [vmem:[#allocation102_spill] sm:$0xff]  ;;  %v8963_v55 = vld [vmem:[#allocation104_spill] sm:$0xff] }
 0x69b   :  { %v3253_v26 = vmul.f32 %v4659_v17, %v3242_v2 }
 0x69d   :  { %v7624_v40 = vpack.c.bf16 %v3253_v26, %v3253_v26  ;;  %v4293_v26 = vld [vmem:[%s7921_s0 + $0x1c8] sm:$0xff] }
 0x69e   :  { %3370 = vmatpush.bf16.msra.mxu0 %v8353_v63  ;;  %3396 = vmatpush.bf16.msra.mxu2 %v8354_v6  ;;  %v8964_v63 = vld [vmem:[#allocation95_spill] sm:$0xff]  ;;  %v8965_v6 = vld [vmem:[#allocation97_spill] sm:$0xff] }
 0x69f   :  { %3286 = vmatmul.bf16.vlgmr.msra.gmra.mxu1 %v7624_v40  ;;  %3312 = vmatmul.bf16.vlgmr.msra.gmra.mxu3 %v7624_v40 }
 0x6a0   :  { %3382 = vmatpush.bf16.msra.mxu1 %v8355_v60  ;;  %3408 = vmatpush.bf16.msra.mxu3 %v8356_v23  ;;  %v8966_v60 = vld [vmem:[#allocation99_spill] sm:$0xff]  ;;  %v8967_v23 = vld [vmem:[#allocation101_spill] sm:$0xff] }
 0x6a2   :  { %3371 = vmatpush.bf16.msra.mxu0 %v8357_v54  ;;  %3397 = vmatpush.bf16.msra.mxu2 %v8358_v61  ;;  %v8968_v54 = vld [vmem:[#allocation106_spill] sm:$0xff]  ;;  %v8969_v61 = vld [vmem:[#allocation108_spill] sm:$0xff] }
 0x6a4   :  { %3383 = vmatpush.bf16.msra.mxu1 %v8359_v51  ;;  %3409 = vmatpush.bf16.msra.mxu3 %v8360_v49  ;;  %v8970_v51 = vld [vmem:[#allocation103_spill] sm:$0xff]  ;;  %v8971_v49 = vld [vmem:[#allocation105_spill] sm:$0xff] }
 0x6a6   :  { %3372 = vmatpush.bf16.msra.mxu0 %v8361_v1  ;;  %3398 = vmatpush.bf16.msra.mxu2 %v8362_v52  ;;  %v8972_v1 = vld [vmem:[#allocation110_spill] sm:$0xff]  ;;  %v8973_v52 = vld [vmem:[#allocation112_spill] sm:$0xff] }
 0x6a8   :  { %3384 = vmatpush.bf16.msra.mxu1 %v8363_v39  ;;  %3410 = vmatpush.bf16.msra.mxu3 %v8364_v43  ;;  %v8974_v39 = vld [vmem:[#allocation107_spill] sm:$0xff]  ;;  %v8975_v43 = vld [vmem:[#allocation109_spill] sm:$0xff] }
 0x6a9   :  { %3325 = vmatmul.bf16.vlgmr.msrb.gmra.mxu0 %v7618_v42  ;;  %3351 = vmatmul.bf16.vlgmr.msrb.gmra.mxu2 %v7618_v42 }
 0x6aa   :  { %3373 = vmatpush.bf16.msra.mxu0 %v8365_v31  ;;  %3399 = vmatpush.bf16.msra.mxu2 %v8366_v35  ;;  %v8976_v31 = vld [vmem:[#allocation114_spill] sm:$0xff]  ;;  %v8977_v35 = vld [vmem:[#allocation116_spill] sm:$0xff] }
 0x6ac   :  { %3385 = vmatpush.bf16.msra.mxu1 %v8367_v57  ;;  %3411 = vmatpush.bf16.msra.mxu3 %v8368_v9  ;;  %v8978_v57 = vld [vmem:[#allocation111_spill] sm:$0xff]  ;;  %v8979_v9 = vld [vmem:[#allocation113_spill] sm:$0xff] }
 0x6ae   :  { %3374 = vmatpush.bf16.msra.mxu0 %v8369_v41  ;;  %3400 = vmatpush.bf16.msra.mxu2 %v8370_v20  ;;  %v8980_v41 = vld [vmem:[#allocation118_spill] sm:$0xff]  ;;  %v8981_v20 = vld [vmem:[#allocation120_spill] sm:$0xff] }
 0x6af   :  { %3338 = vmatmul.bf16.vlgmr.msrb.gmra.mxu1 %v7624_v40  ;;  %3364 = vmatmul.bf16.vlgmr.msrb.gmra.mxu3 %v7624_v40 }
 0x6b0   :  { %3386 = vmatpush.bf16.msra.mxu1 %v8371_v30  ;;  %3412 = vmatpush.bf16.msra.mxu3 %v8372_v48  ;;  %v8982_v30 = vld [vmem:[#allocation115_spill] sm:$0xff]  ;;  %v8983_v48 = vld [vmem:[#allocation117_spill] sm:$0xff] }
 0x6b2   :  { %3375 = vmatpush.bf16.msra.mxu0 %v8452_v28  ;;  %3401 = vmatpush.bf16.msra.mxu2 %v8453_v0  ;;  %v8984_v28 = vld [vmem:[#allocation122_spill] sm:$0xff]  ;;  %v8985_v0 = vld [vmem:[#allocation124_spill] sm:$0xff] }
 0x6b4   :  { %3387 = vmatpush.bf16.msra.mxu1 %v8454_v13  ;;  %3413 = vmatpush.bf16.msra.mxu3 %v8455_v12  ;;  %v8986_v13 = vld [vmem:[#allocation119_spill] sm:$0xff]  ;;  %v8987_v12 = vld [vmem:[#allocation121_spill] sm:$0xff] }
 0x6b6   :  { %3376 = vmatpush.bf16.msra.mxu0 %v8456_v32  ;;  %3402 = vmatpush.bf16.msra.mxu2 %v8457_v36  ;;  %v8988_v32 = vld [vmem:[#allocation126_spill] sm:$0xff]  ;;  %v8989_v36 = vld [vmem:[#allocation128_spill] sm:$0xff] }
 0x6b8   :  { %3388 = vmatpush.bf16.msra.mxu1 %v8460_v18  ;;  %3414 = vmatpush.bf16.msra.mxu3 %v8461_v58  ;;  %v8992_v18 = vld [vmem:[#allocation127_spill] sm:$0xff]  ;;  %v8993_v58 = vld [vmem:[#allocation129_spill] sm:$0xff] }
 0x6b9   :  { %3377 = vmatmul.bf16.vlgmr.msra.gmra.mxu0 %v7618_v42  ;;  %3403 = vmatmul.bf16.vlgmr.msra.gmra.mxu2 %v7618_v42 }
 0x6ba   :  { %3421 = vmatpush.bf16.msrb.mxu0 %v8458_v56  ;;  %3447 = vmatpush.bf16.msrb.mxu2 %v8459_v50  ;;  %v8990_v56 = vld [vmem:[#allocation123_spill] sm:$0xff]  ;;  %v8991_v50 = vld [vmem:[#allocation125_spill] sm:$0xff] }
 0x6bc   :  { %3389 = vmatpush.bf16.msra.mxu1 %v8964_v63  ;;  %3415 = vmatpush.bf16.msra.mxu3 %v8965_v6  ;;  %v3624_v6 = vld [vmem:[%s7923_s2 + $0x78] sm:$0xff] }
 0x6be   :  { %3422 = vmatpush.bf16.msrb.mxu0 %v8962_v15  ;;  %3448 = vmatpush.bf16.msrb.mxu2 %v8963_v55 }
 0x6bf   :  { %3390 = vmatmul.bf16.vlgmr.msra.gmra.mxu1 %v7624_v40  ;;  %3416 = vmatmul.bf16.vlgmr.msra.gmra.mxu3 %v7624_v40 }
 0x6c0   :  { %3434 = vmatpush.bf16.msrb.mxu1 %v8966_v60  ;;  %3460 = vmatpush.bf16.msrb.mxu3 %v8967_v23 }
 0x6c2   :  { %3423 = vmatpush.bf16.msrb.mxu0 %v8968_v54  ;;  %3449 = vmatpush.bf16.msrb.mxu2 %v8969_v61  ;;  %v3623_v54 = vld [vmem:[%s7923_s2 + $0x70] sm:$0xff] }
 0x6c4   :  { %3435 = vmatpush.bf16.msrb.mxu1 %v8970_v51  ;;  %3461 = vmatpush.bf16.msrb.mxu3 %v8971_v49  ;;  %v3622_v51 = vld [vmem:[%s7923_s2 + $0x68] sm:$0xff] }
 0x6c6   :  { %3424 = vmatpush.bf16.msrb.mxu0 %v8972_v1  ;;  %3450 = vmatpush.bf16.msrb.mxu2 %v8973_v52 }
 0x6c8   :  { %3436 = vmatpush.bf16.msrb.mxu1 %v8974_v39  ;;  %3462 = vmatpush.bf16.msrb.mxu3 %v8975_v43  ;;  %v3621_v43 = vld [vmem:[%s7923_s2 + $0x60] sm:$0xff] }
 0x6ca   :  { %3425 = vmatpush.bf16.msrb.mxu0 %v8976_v31  ;;  %3451 = vmatpush.bf16.msrb.mxu2 %v8977_v35  ;;  %v3640_v31 = vld [vmem:[%s7923_s2 + $0xf8] sm:$0xff] }
 0x6cb   :  { %v3620_v35 = vld [vmem:[%s7923_s2 + $0x58] sm:$0xff] }
 0x6cc   :  { %3437 = vmatpush.bf16.msrb.mxu1 %v8978_v57  ;;  %3463 = vmatpush.bf16.msrb.mxu3 %v8979_v9  ;;  %v3639_v57 = vld [vmem:[%s7923_s2 + $0xf0] sm:$0xff] }
 0x6ce   :  { %3426 = vmatpush.bf16.msrb.mxu0 %v8980_v41  ;;  %3452 = vmatpush.bf16.msrb.mxu2 %v8981_v20  ;;  %v3619_v20 = vld [vmem:[%s7923_s2 + $0x50] sm:$0xff] }
 0x6d0   :  { %3438 = vmatpush.bf16.msrb.mxu1 %v8982_v30  ;;  %3464 = vmatpush.bf16.msrb.mxu3 %v8983_v48  ;;  %v3638_v30 = vld [vmem:[%s7923_s2 + $0xe8] sm:$0xff] }
 0x6d2   :  { %3427 = vmatpush.bf16.msrb.mxu0 %v8984_v28  ;;  %3453 = vmatpush.bf16.msrb.mxu2 %v8985_v0  ;;  %v3618_v0 = vld [vmem:[%s7923_s2 + $0x48] sm:$0xff] }
 0x6d4   :  { %3439 = vmatpush.bf16.msrb.mxu1 %v8986_v13  ;;  %3465 = vmatpush.bf16.msrb.mxu3 %v8987_v12  ;;  %v3637_v13 = vld [vmem:[%s7923_s2 + $0xe0] sm:$0xff] }
 0x6d6   :  { %3428 = vmatpush.bf16.msrb.mxu0 %v8988_v32  ;;  %3454 = vmatpush.bf16.msrb.mxu2 %v8989_v36  ;;  %v3617_v32 = vld [vmem:[%s7923_s2 + $0x40] sm:$0xff]  ;;  %v3636_v36 = vld [vmem:[%s7923_s2 + $0xd8] sm:$0xff] }
 0x6d8   :  { %3440 = vmatpush.bf16.msrb.mxu1 %v8990_v56  ;;  %3466 = vmatpush.bf16.msrb.mxu3 %v8991_v50 }
 0x6d9   :  { %3429 = vmatmul.bf16.vlgmr.msrb.gmra.mxu0 %v7618_v42  ;;  %3455 = vmatmul.bf16.vlgmr.msrb.gmra.mxu2 %v7618_v42  ;;  %v4295_v42 = vld [vmem:[%s7921_s0 + $0x1d8] sm:$0xff] }
 0x6da   :  { %3645 = vmatpush.msra.mxu0 %v3624_v6 }
 0x6dc   :  { %3441 = vmatpush.bf16.msrb.mxu1 %v8992_v18  ;;  %3467 = vmatpush.bf16.msrb.mxu3 %v8993_v58  ;;  %v3616_v18 = vld [vmem:[%s7923_s2 + $0x38] sm:$0xff]  ;;  %v3635_v58 = vld [vmem:[%s7923_s2 + $0xd0] sm:$0xff] }
 0x6dd   :  { %3646 = vmatpush.msra.mxu0 %v3623_v54  ;;  %v4296_v54 = vld [vmem:[%s7921_s0 + $0x1e0] sm:$0xff] }
 0x6df   :  { %3442 = vmatmul.bf16.vlgmr.msrb.gmra.mxu1 %v7624_v40  ;;  %3468 = vmatmul.bf16.vlgmr.msrb.gmra.mxu3 %v7624_v40 }
 0x6e0   :  { %3647 = vmatpush.msra.mxu0 %v3622_v51  ;;  %3665 = vmatpush.msra.mxu1 %v3640_v31 }
 0x6e2   :  { %3648 = vmatpush.msra.mxu0 %v3621_v43  ;;  %3666 = vmatpush.msra.mxu1 %v3639_v57 }
 0x6e4   :  { %3649 = vmatpush.msra.mxu0 %v3620_v35  ;;  %3667 = vmatpush.msra.mxu1 %v3638_v30  ;;  %v3625_v30 = vld [vmem:[%s7923_s2 + $0x80] sm:$0xff] }
 0x6e6   :  { %3650 = vmatpush.msra.mxu0 %v3619_v20  ;;  %3668 = vmatpush.msra.mxu1 %v3637_v13 }
 0x6e8   :  { %3651 = vmatpush.msra.mxu0 %v3618_v0  ;;  %3669 = vmatpush.msra.mxu1 %v3636_v36 }
 0x6ea   :  { %3652 = vmatpush.msra.mxu0 %v3617_v32  ;;  %3670 = vmatpush.msra.mxu1 %v3635_v58 }
 0x6ec   :  { %3653 = vmatpush.msra.mxu0 %v3616_v18 }
 0x716   :  { %v3274_v10 = vpop.f32.mrf.mxu0 }
 0x71c   :  { %v3287_v8 = vpop.f32.mrf.mxu1  ;;  %v3300_v21 = vpop.f32.mrf.mxu2 }
 0x71d   :  { %v3288_v24 = vadd.f32 %v3287_v8, %v3274_v10  ;;  %v3615_v8 = vld [vmem:[%s7923_s2 + $0x30] sm:$0xff] }
 0x71e   :  { %v3276_v53 = vpop.f32.mrf.mxu0  ;;  %3654 = vmatpush.msra.mxu0 %v3615_v8 }
 0x71f   :  { %v3473_v37 = vadd.f32 %v4292_v47, %v3288_v24  ;;  %v3611_v47 = vld [vmem:[%s7923_s2 + $0x10] sm:$0xff] }
 0x721   :  { %v4300_v63 = vmul.f32 -1.442695, %v3473_v37  ;;  %v3629_v37 = vld [vmem:[%s7923_s2 + $0xa0] sm:$0xff] }
 0x722   :  { %v3313_v25 = vpop.f32.mrf.mxu3 }
 0x723   :  { %v3314_v17 = vadd.f32 %v3313_v25, %v3300_v21  ;;  %v3634_v21 = vld [vmem:[%s7923_s2 + $0xc8] sm:$0xff] }
 0x724   :  { %v3289_v19 = vpop.f32.mrf.mxu1  ;;  %v3302_v44 = vpop.f32.mrf.mxu2  ;;  %3671 = vmatpush.msra.mxu1 %v3634_v21 }
 0x725   :  { %v3474_v60 = vadd.f32 %v4293_v26, %v3314_v17  ;;  %v3614_v19 = vld [vmem:[%s7923_s2 + $0x28] sm:$0xff]  ;;  %v3633_v44 = vld [vmem:[%s7923_s2 + $0xc0] sm:$0xff] }
 0x726   :  { %v3326_v7 = vpop.f32.mrf.mxu0  ;;  %3655 = vmatpush.msra.mxu0 %v3614_v19  ;;  %3672 = vmatpush.msra.mxu1 %v3633_v44 }
 0x727   :  { %v4301_v49 = vmul.f32 -1.442695, %v3474_v60 }
 0x72a   :  { %v3315_v62 = vpop.f32.mrf.mxu3 }
 0x72b   :  { %v3613_v62 = vld [vmem:[%s7923_s2 + $0x20] sm:$0xff] }
 0x72c   :  { %v3339_v3 = vpop.f32.mrf.mxu1  ;;  %v3352_v33 = vpop.f32.mrf.mxu2  ;;  %3656 = vmatpush.msra.mxu0 %v3613_v62 }
 0x72d   :  { %v3340_v59 = vadd.f32 %v3339_v3, %v3326_v7  ;;  %v3632_v3 = vld [vmem:[%s7923_s2 + $0xb8] sm:$0xff] }
 0x72e   :  { %v3328_v27 = vpop.f32.mrf.mxu0  ;;  %3673 = vmatpush.msra.mxu1 %v3632_v3 }
 0x72f   :  { %v3475_v29 = vadd.f32 %v4294_v4, %v3340_v59  ;;  %v3612_v27 = vld [vmem:[%s7923_s2 + $0x18] sm:$0xff] }
 0x730   :  { %3657 = vmatpush.msra.mxu0 %v3612_v27 }
 0x731   :  { %v4302_v16 = vmul.f32 -1.442695, %v3475_v29 }
 0x732   :  { %v3365_v22 = vpop.f32.mrf.mxu3  ;;  %3658 = vmatpush.msra.mxu0 %v3611_v47 }
 0x733   :  { %v3366_v5 = vadd.f32 %v3365_v22, %v3352_v33  ;;  %4660 = vpow2.f32 %v4302_v16  ;;  %v3631_v22 = vld [vmem:[%s7923_s2 + $0xb0] sm:$0xff] }
 0x734   :  { %v3341_v45 = vpop.f32.mrf.mxu1  ;;  %v3354_v38 = vpop.f32.mrf.mxu2  ;;  %4662 = vpow2.f32 %v4300_v63  ;;  %3674 = vmatpush.msra.mxu1 %v3631_v22 }
 0x735   :  { %v3476_v40 = vadd.f32 %v4295_v42, %v3366_v5  ;;  %v4298_v38 = vld [vmem:[%s7921_s0 + $0x1f0] sm:$0xff]  ;;  %v3630_v5 = vld [vmem:[%s7923_s2 + $0xa8] sm:$0xff] }
 0x736   :  { %v7705_v11 = vpop.f32.mrf.mxu0  ;;  %3675 = vmatpush.msra.mxu1 %v3630_v5 }
 0x737   :  { %v4303_v23 = vmul.f32 -1.442695, %v3476_v40  ;;  %v3609_v40 = vld [vmem:[%s7923_s2] sm:$0xff] }
 0x738   :  { %3676 = vmatpush.msra.mxu1 %v3629_v37 }
 0x739   :  { %v4661_v52 = vpop.eup %4660  ;;  %4664 = vpow2.f32 %v4303_v23 }
 0x73a   :  { %v3367_v46 = vpop.f32.mrf.mxu3  ;;  %4666 = vpow2.f32 %v4301_v49  ;;  %v7743_v9 = vadd.f32 1.0, %v4661_v52  ;;  %v4663_v41 = vpop.eup %4662 }
 0x73b   :  { %v7757_v12 = vadd.f32 1.0, %v4663_v41  ;;  %v3610_v46 = vld [vmem:[%s7923_s2 + $0x8] sm:$0xff] }
 0x73c   :  { %v7713_v2 = vpop.f32.mrf.mxu2  ;;  %v7718_v15 = vpop.f32.mrf.mxu1  ;;  %4668 = vrcp.f32 %v7743_v9  ;;  %3659 = vmatpush.msra.mxu0 %v3610_v46  ;;  %vm3532_vm9 = vweird.f32 %v7743_v9  ;;  %v3536_v36 = vand.u32 2147483647, %v7743_v9 }
 0x73d   :  { %4670 = vrcp.f32 %v7757_v12  ;;  %v3392_v63 = vadd.f32 %v7718_v15, %v7705_v11  ;;  %v3627_v11 = vld [vmem:[%s7923_s2 + $0x90] sm:$0xff]  ;;  %vm3494_vm11 = vweird.f32 %v7757_v12 }
 0x73e   :  { %v3380_v55 = vpop.f32.mrf.mxu0  ;;  %3660 = vmatpush.msra.mxu0 %v3609_v40  ;;  %vm3537_vm14 = vcmp.eq.f32.partialorder %v3536_v36, 8.507059e+37 }
 0x73f   :  { %v4665_v48 = vpop.eup %4664  ;;  %v3628_v55 = vld [vmem:[%s7923_s2 + $0x98] sm:$0xff]  ;;  %v3477_v43 = vadd.f32 %v4296_v54, %v3392_v63 }
 0x740   :  { %v4667_v56 = vpop.eup %4666  ;;  %v7766_v50 = vadd.f32 1.0, %v4665_v48  ;;  %3677 = vmatpush.msra.mxu1 %v3628_v55 }
 0x741   :  { %v7775_v10 = vadd.f32 1.0, %v4667_v56  ;;  %v4297_v56 = vld [vmem:[%s7921_s0 + $0x1e8] sm:$0xff] }
 0x742   :  { %v7726_v61 = vpop.f32.mrf.mxu3  ;;  %v7783_v53 = vpop.eup %4668  ;;  %4672 = vrcp.f32 %v7766_v50  ;;  %3678 = vmatpush.msra.mxu1 %v3627_v11  ;;  %v3553_v27 = vand.u32 2147483648, %v7766_v50  ;;  %vm3547_vm0 = vweird.f32 %v7766_v50 }
 0x743   :  { %4674 = vrcp.f32 %v7775_v10  ;;  %v3528_v7 = vmul.f32 %v7783_v53, %v7743_v9  ;;  %v7801_v33 = vpop.eup %4670  ;;  %vm3533_vm8 = vweird.f32 %v7783_v53  ;;  %v3418_v0 = vadd.f32 %v7726_v61, %v7713_v2 }
 0x744   :  { %v3406_v1 = vpop.f32.mrf.mxu2  ;;  %v3393_v39 = vpop.f32.mrf.mxu1  ;;  %v3490_v4 = vmul.f32 %v7801_v33, %v7757_v12  ;;  %vm7872_vm10 = vmor %vm3532_vm9, %vm3533_vm8  ;;  %v3498_v2 = vand.u32 2147483647, %v7757_v12  ;;  %vm3495_vm12 = vweird.f32 %v7801_v33  ;;  %v3554_v5 = vor.u32 1.1754944e-38, %v3553_v27 }
 0x745   :  { %v3529_v45 = vsub.f32 1.0, %v3528_v7  ;;  %v4299_v1 = vld [vmem:[%s7921_s0 + $0x1f8] sm:$0xff]  ;;  %v3626_v39 = vld [vmem:[%s7923_s2 + $0x88] sm:$0xff]  ;;  %v3478_v19 = vadd.f32 %v4297_v56, %v3418_v0  ;;  %vm7890_vm15 = vmor %vm3494_vm11, %vm3495_vm12  ;;  %vm3509_vm4 = vweird.f32 %v7775_v10  ;;  %v3515_v46 = vand.u32 2147483648, %v7775_v10 }
 0x746   :  { %v3491_v60 = vsub.f32 1.0, %v3490_v4  ;;  %3679 = vmatpush.msra.mxu1 %v3626_v39  ;;  %vm3499_vm2 = vcmp.eq.f32.partialorder %v3498_v2, 8.507059e+37 }
 0x747   :  { %v3530_v23 = vmul.f32 %v7783_v53, %v3529_v45  ;;  %v3551_v45 = vand.u32 2147483647, %v7766_v50 }
 0x748   :  { %v7809_v59 = vpop.eup %4672  ;;  %v3492_v35 = vmul.f32 %v7801_v33, %v3491_v60  ;;  %3680 = vmatpush.msra.mxu1 %v3625_v30 }
 0x749   :  { %v7828_v16 = vpop.eup %4674  ;;  %v3543_v17 = vmul.f32 %v7809_v59, %v7766_v50  ;;  %v3531_v57 = vadd.f32 %v7783_v53, %v3530_v23  ;;  %vm3548_vm13 = vweird.f32 %v7809_v59  ;;  %vm3552_vm5 = vcmp.eq.f32.partialorder %v3551_v45, 8.507059e+37 }
 0x74a   :  { %v3419_v28 = vpop.f32.mrf.mxu3  ;;  %v3505_v51 = vmul.f32 %v7828_v16, %v7775_v10  ;;  %v3493_v58 = vadd.f32 %v7801_v33, %v3492_v35  ;;  %vm7899_vm1 = vmor %vm3547_vm0, %vm3548_vm13  ;;  %vm3510_vm3 = vweird.f32 %v7828_v16 }
 0x74b   :  { %v3544_v15 = vsub.f32 1.0, %v3543_v17  ;;  %v3538_v28 = vand.u32 2147483648, %v7743_v9  ;;  %v3500_v9 = vand.u32 2147483648, %v7757_v12  ;;  %v3535_v8 = vsel %vm7872_vm10, %v7783_v53, %v3531_v57  ;;  %vm3511_vm6 = vmor %vm3509_vm4, %vm3510_vm3 }
 0x74c   :  { %v3506_v48 = vsub.f32 1.0, %v3505_v51  ;;  %v3497_v4 = vsel %vm7890_vm15, %v7801_v33, %v3493_v58  ;;  %v3513_v17 = vand.u32 2147483647, %v7775_v10 }
 0x74d   :  { %v3545_v32 = vmul.f32 %v7809_v59, %v3544_v15  ;;  %v3501_v12 = vor.u32 1.1754944e-38, %v3500_v9 }
 0x74e   :  { %v3507_v44 = vmul.f32 %v7828_v16, %v3506_v48  ;;  %vm3514_vm7 = vcmp.eq.f32.partialorder %v3513_v17, 8.507059e+37 }
 0x74f   :  { %v3546_v7 = vadd.f32 %v7809_v59, %v3545_v32 }
 0x750   :  { %v3508_v47 = vadd.f32 %v7828_v16, %v3507_v44 }
 0x751   :  { %v3550_v33 = vsel %vm7899_vm1, %v7809_v59, %v3546_v7 }
 0x752   :  { %v3512_v63 = vsel %vm3511_vm6, %v7828_v16, %v3508_v47 }
 0x756   :  { %v3430_v25 = vpop.f32.mrf.mxu0 }
 0x75c   :  { %v3443_v24 = vpop.f32.mrf.mxu1  ;;  %v3456_v29 = vpop.f32.mrf.mxu2 }
 0x75d   :  { %v3444_v42 = vadd.f32 %v3443_v24, %v3430_v25  ;;  %v3539_v25 = vor.u32 1.1754944e-38, %v3538_v28 }
 0x75e   :  { %v3432_v26 = vpop.f32.mrf.mxu0 }
 0x75f   :  { %v3479_v6 = vadd.f32 %v4298_v38, %v3444_v42  ;;  %v3540_v53 = vsel %vm3537_vm14, %v3539_v25, %v3535_v8  ;;  %v3502_v42 = vsel %vm3499_vm2, %v3501_v12, %v3497_v4  ;;  %v3555_v26 = vsel %vm3552_vm5, %v3554_v5, %v3550_v33 }
 0x760   :  { %v3598_v23 = vmul.f32 %v3555_v26, %v7615_v14 }
 0x761   :  { %v4304_v49 = vmul.f32 -1.442695, %v3479_v6  ;;  %v3516_v6 = vor.u32 1.1754944e-38, %v3515_v46 }
 0x762   :  { %v3469_v52 = vpop.f32.mrf.mxu3 }
 0x763   :  { %4676 = vpow2.f32 %v4304_v49  ;;  %v3470_v31 = vadd.f32 %v3469_v52, %v3456_v29  ;;  %v3597_v29 = vmul.f32 %v3540_v53, %v7610_v34  ;;  %v3517_v54 = vsel %vm3514_vm7, %v3516_v6, %v3512_v63 }
 0x764   :  { %v3445_v41 = vpop.f32.mrf.mxu1  ;;  %v3458_v20 = vpop.f32.mrf.mxu2  ;;  %4678 = vtanh.f32 %v3477_v43 }
 0x765   :  { %v3480_v13 = vadd.f32 %v4299_v1, %v3470_v31 }
 0x767   :  { %v4305_v61 = vmul.f32 -1.442695, %v3480_v13 }
 0x769   :  { %v4677_v21 = vpop.eup %4676  ;;  %4680 = vpow2.f32 %v4305_v61  ;;  %v4435_v61 = vld [vmem:[%s7922_s3] ss:$0 sm:$0xff] }
 0x76a   :  { %v3565_v62 = vadd.f32 1.0, %v4677_v21  ;;  %v3471_v3 = vpop.f32.mrf.mxu3  ;;  %v4679_v38 = vpop.eup %4678 }
 0x76b   :  { %v3599_v37 = vmul.f32 %v4679_v38, %v3502_v42 }
 0x76c   :  { %4682 = vrcp.f32 %v3565_v62  ;;  %v3578_v10 = vand.u32 2147483648, %v3565_v62  ;;  %v3576_v15 = vand.u32 2147483647, %v3565_v62  ;;  %vm3572_vm9 = vweird.f32 %v3565_v62 }
 0x76d   :  { %4684 = vtanh.f32 %v3478_v19  ;;  %v3601_v55 = vadd.f32 %v3599_v37, %v3597_v29 }
 0x76e   :  { %v3579_v43 = vor.u32 1.1754944e-38, %v3578_v10  ;;  %vm3577_vm11 = vcmp.eq.f32.partialorder %v3576_v15, 8.507059e+37 }
 0x76f   :  { %v4681_v50 = vpop.eup %4680 }
 0x770   :  { %v3566_v34 = vadd.f32 1.0, %v4681_v50 }
 0x772   :  { %v4683_v40 = vpop.eup %4682  ;;  %4686 = vrcp.f32 %v3566_v34  ;;  %v3593_v14 = vand.u32 2147483648, %v3566_v34  ;;  %v3591_v48 = vand.u32 2147483647, %v3566_v34  ;;  %vm3587_vm13 = vweird.f32 %v3566_v34 }
 0x773   :  { %v4685_v59 = vpop.eup %4684  ;;  %v3568_v60 = vmul.f32 %v4683_v40, %v3565_v62  ;;  %4688 = vtanh.f32 %v3601_v55  ;;  %vm3573_vm8 = vweird.f32 %v4683_v40 }
 0x774   :  { %v3600_v49 = vmul.f32 %v4685_v59, %v3517_v54  ;;  %vm3574_vm10 = vmor %vm3572_vm9, %vm3573_vm8  ;;  %v3594_v13 = vor.u32 1.1754944e-38, %v3593_v14  ;;  %vm3592_vm15 = vcmp.eq.f32.partialorder %v3591_v48, 8.507059e+37 }
 0x775   :  { %v3569_v51 = vsub.f32 1.0, %v3568_v60 }
 0x776   :  { %v3602_v52 = vadd.f32 %v3600_v49, %v3598_v23 }
 0x777   :  { %v3570_v11 = vmul.f32 %v4683_v40, %v3569_v51 }
 0x778   :  { %v4687_v1 = vpop.eup %4686  ;;  %4690 = vtanh.f32 %v3602_v52 }
 0x779   :  { %v3583_v39 = vmul.f32 %v4687_v1, %v3566_v34  ;;  %v3571_v16 = vadd.f32 %v4683_v40, %v3570_v11  ;;  %v4689_v57 = vpop.eup %4688  ;;  %vm3588_vm12 = vweird.f32 %v4687_v1 }
 0x77a   :  { %vm3589_vm14 = vmor %vm3587_vm13, %vm3588_vm12 }
 0x77b   :  { %v3584_v31 = vsub.f32 1.0, %v3583_v39  ;;  %v3575_v35 = vsel %vm3574_vm10, %v4683_v40, %v3571_v16 }
 0x77c   :  { %v3580_v41 = vsel %vm3577_vm11, %v3579_v43, %v3575_v35 }
 0x77d   :  { %v3585_v20 = vmul.f32 %v4687_v1, %v3584_v31  ;;  %v3605_v30 = vmul.f32 %v4689_v57, %v3580_v41 }
 0x77e   :  { %v4691_v36 = vpop.eup %4690 }
 0x77f   :  { %v3607_v28 = vmax.f32 %v3605_v30, 0.0  ;;  %v3586_v0 = vadd.f32 %v4687_v1, %v3585_v20 }
 0x781   :  { %3661 = vmatmul.f32.vlgmr.msra.gmra.mxu0 %v3607_v28  ;;  %v3590_v32 = vsel %vm3589_vm14, %v4687_v1, %v3586_v0 }
 0x782   :  { %v3595_v56 = vsel %vm3592_vm15, %v3594_v13, %v3590_v32 }
 0x783   :  { %v3606_v18 = vmul.f32 %v4691_v36, %v3595_v56 }
 0x785   :  { %v3608_v2 = vmax.f32 %v3606_v18, 0.0 }
 0x787   :  { %3681 = vmatmul.f32.vlgmr.msra.gmra.mxu1 %v3608_v2 }
 0x7fe   :  { %v3662_v58 = vpop.f32.mrf.mxu0 }
 0x7ff   :  { %v3663_v9 = vadd.f32 %v4435_v61, %v3662_v58 }
 0x804   :  { %v3682_v8 = vpop.f32.mrf.mxu1 }
 0x805   :  { %v3683_v21 = vadd.f32 %v3682_v8, %v3663_v9 }
 0x807   :  { %3685 = vst [vmem:[%s7924_s4] sm:$0xff] %v3683_v21 }

</bundles_post_ra>
